<compile_context>
chip_gen: v7x
topology: tpu7x:2x2x1
jax: 0.10.0
libtpu: 0.0.40
codegen_flags: <defaults>
</compile_context>

<pallas_src>
import functools

import jax
import jax.numpy as jnp
from jax.experimental import pallas as pl
from jax.experimental.pallas import tpu as pltpu

LN_EPS = 1e-5  # PyTorch nn.LayerNorm default


def _patch_expand_kernel(x_ref, wt_ref, g_ref, b_ref, o_ref):
    # x_ref:  (tm, C)         tm = tr * W tokens
    # wt_ref: (C, 2C)         expand weight, pre-transposed (Linear is x @ W.T)
    # g_ref:  (1, Ch)         LayerNorm gamma, Ch = C // 2
    # b_ref:  (1, Ch)         LayerNorm beta
    # o_ref:  (tr, 2, W, C)   axis 1 = p1, last axis = (p2, c)
    tr, _, W, C = o_ref.shape
    Ch = C // 2

    # MXU matmul, f32 accumulation (operands may be f32 or bf16).
    y = jnp.dot(x_ref[...], wt_ref[...], preferred_element_type=jnp.float32)

    gamma = g_ref[...].astype(jnp.float32)   # (1, Ch)
    beta = b_ref[...].astype(jnp.float32)    # (1, Ch)
    inv_ch = jnp.float32(1.0 / Ch)

    # After the rearrange, every output pixel's Ch channels are exactly one
    # contiguous Ch-wide chunk of the expanded 2C vector, so LayerNorm can be
    # applied per-chunk *before* the spatial split with identical results.
    def _norm_chunk(k):
        seg = y[:, k * Ch:(k + 1) * Ch]                    # (tm, Ch) f32
        mu = jnp.sum(seg, axis=-1, keepdims=True) * inv_ch
        # NOTE: one-pass variance (E[x^2] - mu^2); adequate in f32 for
        # normalized activations, slightly less robust than two-pass.
        var = jnp.sum(seg * seg, axis=-1, keepdims=True) * inv_ch - mu * mu
        rinv = jax.lax.rsqrt(var + LN_EPS)                 # (tm, 1) -> EUP
        # (tm,1) broadcasts along lanes, (1,Ch) along sublanes: no (tm, Ch)
        # scale/shift temporaries are materialized.
        return ((seg - mu) * rinv) * gamma + beta

    if Ch % 128 == 0:
        # Lane offsets are multiples of 128 -> still unmasked full-lane
        # stores, and the two (tm, C) concatenation assemblies disappear.
        for p1 in range(2):
            for p2 in range(2):
                chunk = _norm_chunk(2 * p1 + p2).astype(o_ref.dtype)
                o_ref[:, p1:p1 + 1, :, p2 * Ch:(p2 + 1) * Ch] = (
                    chunk.reshape(tr, 1, W, Ch))
    else:
        # Narrow channels: assemble two lane-dense (tm, C) slabs instead.
        h0 = jnp.concatenate([_norm_chunk(0), _norm_chunk(1)], axis=-1)
        h1 = jnp.concatenate([_norm_chunk(2), _norm_chunk(3)], axis=-1)
        o_ref[:, 0:1, :, :] = h0.astype(o_ref.dtype).reshape(tr, 1, W, C)
        o_ref[:, 1:2, :, :] = h1.astype(o_ref.dtype).reshape(tr, 1, W, C)


def _tpu_vmem_budget_and_cores():
    """Generation-aware scoped-VMEM budget + TensorCore count (best effort)."""
    try:
        info = pltpu.get_tpu_info()
        phys = int(getattr(info, "vmem_capacity_bytes", 0)) or (128 << 20)
    except Exception:
        phys = 64 << 20                       # conservative fallback
    # v5e/v6e: 128 MiB VMEM, 1 TC per chip.  v7x: 64 MiB VMEM, 2 TCs per chip.
    cores = 2 if phys <= (64 << 20) else 1
    budget = int(0.75 * phys)                 # ~96 MiB v5e/v6e, ~48 MiB v7x
    return budget, cores


def _choose_tile_rows(n_rows, W, C, budget_bytes, *, in_itemsize=4,
                      out_itemsize=4, num_cores=1, target_tokens=4096):
    """Rows-of-W tokens per grid step.

    Picks the largest tile that (a) fits the VMEM budget, (b) is near
    `target_tokens` tokens so the ~0.35 us per-step overhead is amortized,
    and (c) leaves >= 2 grid steps only on dual-TC chips (v7x megacore)."""
    per_token = (2 * C * in_itemsize          # x tile, double-buffered
                 + 2 * 2 * C * out_itemsize   # output tile, double-buffered
                 + 2 * C * 4                  # f32 matmul accumulator y
                 + 2 * C * 4)                 # live normalized-chunk temporaries
    fixed = (C * 2 * C * in_itemsize          # weight, single-buffered
             + 2 * (C // 2) * 4               # LN params
             + (256 << 10))                   # compiler scratch headroom
    avail = int(0.85 * budget_bytes) - fixed
    max_tokens = max(W, avail // per_token) if avail > 0 else W
    tokens = max(W, min(target_tokens, max_tokens))
    tr = max(1, min(int(tokens) // W, n_rows))
    if num_cores >= 2 and n_rows > 1:
        # Keep >= 2 grid steps so the "parallel" axis shards across both
        # v7x TensorCores.  Single-TC v5e/v6e skip this (no benefit).
        tr = min(tr, -(-n_rows // 2))
    return tr


def prepare_patch_expand_params(w_expand, gamma, beta, *, param_dtype=None):
    """One-time param prep (hoisted out of the per-call path).
    w_expand: (2C, C) torch nn.Linear(dim, 2*dim, bias=False).weight
    returns   wt (C, 2C), gamma (1, C//2), beta (1, C//2).
    Pass param_dtype=jnp.bfloat16 to pre-cast the matmul weight (pairs with
    compute_dtype=jnp.bfloat16 in patch_expand, recommended on v7x/v5e)."""
    C = w_expand.shape[1]
    Ch = C // 2
    wt = jnp.transpose(w_expand)
    if param_dtype is not None:
        wt = wt.astype(param_dtype)
    return wt, gamma.reshape(1, Ch), beta.reshape(1, Ch)


def patch_expand(x, wt, gamma2, beta2, *, tile_rows=None, compute_dtype=None,
                 out_dtype=None, vmem_limit_bytes=None,
                 single_buffer_params=True):
    """
    x:      (B, n, H, W, C)
    wt:     (C, 2C)    pre-transposed expand weight (prepare_patch_expand_params)
    gamma2: (1, C//2)  LayerNorm weight
    beta2:  (1, C//2)  LayerNorm bias
    compute_dtype: optional (e.g. jnp.bfloat16) matmul operand dtype; LN math
        stays f32.  Big win on v7x/v5e, relaxes f32 bit-exactness.
    out_dtype: optional output dtype (e.g. jnp.bfloat16) to halve output HBM
        bytes when the consumer accepts it.
    returns (B, n, 2H, 2W, C//2)
    """
    B, n, H, W, C = x.shape
    assert C % 2 == 0, C
    Ch = C // 2
    assert wt.shape == (C, 2 * C), wt.shape
    # The in-kernel (tm, C)->(tr, 1, W, C) reshape and the (tm, C) input block
    # are only layout-preserving / (8,128)-legal for W % 8 == 0.
    # TODO(synk): add a padded-W path for resolutions not divisible by 8.
    assert W % 8 == 0, f"W={W} must be a multiple of 8"

    out_dtype = out_dtype or x.dtype
    in_dtype = compute_dtype or x.dtype
    in_itemsize = jnp.dtype(in_dtype).itemsize
    out_itemsize = jnp.dtype(out_dtype).itemsize

    n_rows = B * n * H                     # rows of W tokens each
    M = n_rows * W

    budget, cores = _tpu_vmem_budget_and_cores()
    if vmem_limit_bytes is None:
        vmem_limit_bytes = budget

    tr = tile_rows if tile_rows is not None else _choose_tile_rows(
        n_rows, W, C, vmem_limit_bytes, in_itemsize=in_itemsize,
        out_itemsize=out_itemsize, num_cores=cores)
    if in_itemsize == 2 and (tr * W) % 16 != 0:
        tr += 1                            # bf16 sublane packing: tm % 16 == 0
    tm = tr * W

    steps = pl.cdiv(n_rows, tr)
    rows_padded = steps * tr

    x_flat = x.reshape(M, C)
    if compute_dtype is not None:
        x_flat = x_flat.astype(compute_dtype)
        wt = wt.astype(compute_dtype)
    if rows_padded != n_rows:
        # cdiv grid + zero-padding: awkward/prime B*n*H keeps a near-target
        # tile instead of collapsing to tr=1.  LN of zero rows is finite
        # (eps > 0); the padded rows are sliced off below.
        x_flat = jnp.pad(x_flat, ((0, (rows_padded - n_rows) * W), (0, 0)))

    # Constant-index operands (weight, LN params): single-buffered to halve
    # their resident VMEM footprint.  Fallback for JAX without pipeline_mode.
    const_kw = {"pipeline_mode": pl.Buffered(1)} if single_buffer_params else {}

    def _const_spec(shape):
        try:
            return pl.BlockSpec(shape, lambda i: (0,) * len(shape), **const_kw)
        except TypeError:
            return pl.BlockSpec(shape, lambda i: (0,) * len(shape))

    cost = pl.CostEstimate(
        flops=2 * M * C * (2 * C),
        transcendentals=4 * M,             # one rsqrt per output pixel
        bytes_accessed=(M * C * in_itemsize + M * 2 * C * out_itemsize
                        + C * 2 * C * jnp.dtype(wt.dtype).itemsize))

    y = pl.pallas_call(
        _patch_expand_kernel,
        out_shape=jax.ShapeDtypeStruct((rows_padded, 2, W, C), out_dtype),
        grid_spec=pltpu.PrefetchScalarGridSpec(
            num_scalar_prefetch=0,
            grid=(steps,),
            in_specs=[
                pl.BlockSpec((tm, C), lambda i: (i, 0)),
                _const_spec((C, 2 * C)),   # resident expand weight
                _const_spec((1, Ch)),      # gamma
                _const_spec((1, Ch)),      # beta
            ],
            out_specs=pl.BlockSpec((tr, 2, W, C), lambda i: (i, 0, 0, 0)),
        ),
        compiler_params=pltpu.CompilerParams(
            dimension_semantics=("parallel",),
            vmem_limit_bytes=vmem_limit_bytes),
        cost_estimate=cost,
    )(x_flat, wt, gamma2, beta2)

    if rows_padded != n_rows:
        y = y[:n_rows]
    # 'b n h w (p1 p2 c) -> b n (h p1) (w p2) c' is a pure row-major reshape
    # of the (B*n*H, 2, W, 2*Ch) kernel output: no transpose, no extra HBM pass.
    return y.reshape(B, n, 2 * H, 2 * W, Ch)


def _reference(x, w_expand, gamma, beta):
    B, n, H, W, C = x.shape
    Ch = C // 2
    y = jnp.einsum('bnhwc,oc->bnhwo', x, w_expand,
                   precision=jax.lax.Precision.HIGHEST)      # Linear, no bias
    y = y.reshape(B, n, H, W, 2, 2, Ch)
    y = jnp.transpose(y, (0, 1, 2, 4, 3, 5, 6)).reshape(B, n, 2 * H, 2 * W, Ch)
    mu = jnp.mean(y, axis=-1, keepdims=True)
    var = jnp.mean((y - mu) ** 2, axis=-1, keepdims=True)
    return (y - mu) * jax.lax.rsqrt(var + LN_EPS) * gamma + beta


if __name__ == "__main__":
    B, n_contrast, H, W, C = 2, 2, 8, 8, 256
    key = jax.random.PRNGKey(0)
    kx, kw, kg, kb = jax.random.split(key, 4)

    x = jax.random.normal(kx, (B, n_contrast, H, W, C), dtype=jnp.float32)
    # nn.Linear(dim, 2*dim, bias=False).weight -> shape (2C, C)
    w_expand = (jax.random.normal(kw, (2 * C, C), dtype=jnp.float32)
                * (1.0 / jnp.sqrt(C)))
    # Random affine params to exercise the full LN math.
    gamma = 1.0 + 0.1 * jax.random.normal(kg, (C // 2,), dtype=jnp.float32)
    beta = 0.1 * jax.random.normal(kb, (C // 2,), dtype=jnp.float32)

    # One-time parameter prep (hoisted transpose / reshapes).
    wt, g2, b2 = prepare_patch_expand_params(w_expand, gamma, beta)

    run = jax.jit(patch_expand)
    try:
        out = jax.block_until_ready(run(x, wt, g2, b2))
    except Exception:
        # Fallback for JAX versions where BlockSpec(pipeline_mode=Buffered(1))
        # is not supported in lowering.
        run = jax.jit(functools.partial(patch_expand, single_buffer_params=False))
        out = jax.block_until_ready(run(x, wt, g2, b2))

    ref = _reference(x, w_expand, gamma, beta)
    assert out.shape == (B, n_contrast, 2 * H, 2 * W, C // 2), out.shape
    max_err = float(jnp.max(jnp.abs(out - ref)))
    assert max_err < 2e-3, max_err
    print("KERNEL_OK")
</pallas_src>

<mosaic_0001>
module attributes {stable_mosaic.version = 11 : i64} {
  func.func @_patch_expand_kernel(%arg0: i32, %arg1: memref<128x256xf32, #tpu.memory_space<vmem>>, %arg2: memref<256x512xf32, #tpu.memory_space<vmem>>, %arg3: memref<1x128xf32, #tpu.memory_space<vmem>>, %arg4: memref<1x128xf32, #tpu.memory_space<vmem>>, %arg5: memref<16x2x8x256xf32, #tpu.memory_space<vmem>>) attributes {dimension_semantics = [#tpu.dimension_semantics<parallel>], iteration_bounds = array<i64: 2>, scalar_prefetch = 0 : i64, scratch_operands = 0 : i64, tpu.core_type = #tpu.core_type<tc>, window_params = [{transform_indices = @transform_0, window_bounds = array<i64: 128, 256>}, {pipeline_mode = #tpu.pipeline_mode<synchronous>, transform_indices = @transform_1, window_bounds = array<i64: 256, 512>}, {pipeline_mode = #tpu.pipeline_mode<synchronous>, transform_indices = @transform_2, window_bounds = array<i64: 1, 128>}, {pipeline_mode = #tpu.pipeline_mode<synchronous>, transform_indices = @transform_3, window_bounds = array<i64: 1, 128>}, {transform_indices = @transform_4, window_bounds = array<i64: 16, 2, 8, 256>}]} {
    %c0 = arith.constant 0 : index
    %c0_0 = arith.constant 0 : index
    %0 = vector.load %arg1[%c0, %c0_0] : memref<128x256xf32, #tpu.memory_space<vmem>>, vector<128x256xf32>
    %c0_1 = arith.constant 0 : index
    %c0_2 = arith.constant 0 : index
    %1 = vector.load %arg2[%c0_1, %c0_2] : memref<256x512xf32, #tpu.memory_space<vmem>>, vector<256x512xf32>
    %cst = arith.constant dense<0.000000e+00> : vector<128x512xf32>
    %2 = tpu.matmul %0, %1, %cst {dimension_numbers = #tpu.dot_dimension_numbers<[1], [0], [0], [1], [0, 0, 1, 1], [], []>} : vector<128x256xf32>, vector<256x512xf32>, vector<128x512xf32> -> vector<128x512xf32>
    %c0_3 = arith.constant 0 : index
    %c0_4 = arith.constant 0 : index
    %3 = vector.load %arg3[%c0_3, %c0_4] : memref<1x128xf32, #tpu.memory_space<vmem>>, vector<1x128xf32>
    %c0_5 = arith.constant 0 : index
    %c0_6 = arith.constant 0 : index
    %4 = vector.load %arg4[%c0_5, %c0_6] : memref<1x128xf32, #tpu.memory_space<vmem>>, vector<1x128xf32>
    %5 = vector.extract_strided_slice %2 {offsets = [0, 0], sizes = [128, 128], strides = [1, 1]} : vector<128x512xf32> to vector<128x128xf32>
    %cst_7 = arith.constant dense<0.000000e+00> : vector<128xf32>
    %6 = vector.multi_reduction <add>, %5, %cst_7 [1] : vector<128x128xf32> to vector<128xf32>
    %7 = vector.shape_cast %6 : vector<128xf32> to vector<128x1xf32>
    %cst_8 = arith.constant 7.812500e-03 : f32
    %8 = vector.broadcast %cst_8 : f32 to vector<128x1xf32>
    %9 = arith.mulf %7, %8 : vector<128x1xf32>
    %10 = arith.mulf %5, %5 : vector<128x128xf32>
    %cst_9 = arith.constant dense<0.000000e+00> : vector<128xf32>
    %11 = vector.multi_reduction <add>, %10, %cst_9 [1] : vector<128x128xf32> to vector<128xf32>
    %12 = vector.shape_cast %11 : vector<128xf32> to vector<128x1xf32>
    %cst_10 = arith.constant 7.812500e-03 : f32
    %13 = vector.broadcast %cst_10 : f32 to vector<128x1xf32>
    %14 = arith.mulf %12, %13 : vector<128x1xf32>
    %15 = arith.mulf %9, %9 : vector<128x1xf32>
    %16 = arith.subf %14, %15 : vector<128x1xf32>
    %cst_11 = arith.constant 9.99999974E-6 : f32
    %17 = vector.broadcast %cst_11 : f32 to vector<128x1xf32>
    %18 = arith.addf %16, %17 : vector<128x1xf32>
    %19 = math.rsqrt %18 : vector<128x1xf32>
    %20 = vector.broadcast %9 : vector<128x1xf32> to vector<128x128xf32>
    %21 = arith.subf %5, %20 : vector<128x128xf32>
    %22 = vector.broadcast %19 : vector<128x1xf32> to vector<128x128xf32>
    %23 = arith.mulf %21, %22 : vector<128x128xf32>
    %24 = vector.broadcast %3 : vector<1x128xf32> to vector<128x128xf32>
    %25 = arith.mulf %23, %24 : vector<128x128xf32>
    %26 = vector.broadcast %4 : vector<1x128xf32> to vector<128x128xf32>
    %27 = arith.addf %25, %26 : vector<128x128xf32>
    %28 = vector.shape_cast %27 : vector<128x128xf32> to vector<16x1x8x128xf32>
    %c0_12 = arith.constant 0 : index
    %c0_13 = arith.constant 0 : index
    %c0_14 = arith.constant 0 : index
    %c0_15 = arith.constant 0 : index
    %29 = vector.load %arg5[%c0_12, %c0_13, %c0_14, %c0_15] : memref<16x2x8x256xf32, #tpu.memory_space<vmem>>, vector<16x1x8x128xf32>
    tpu.vector_store %arg5[%c0_12, %c0_13, %c0_14, %c0_15], %28 {strides = array<i32>} : memref<16x2x8x256xf32, #tpu.memory_space<vmem>>, vector<16x1x8x128xf32>,
    %30 = vector.extract_strided_slice %2 {offsets = [0, 128], sizes = [128, 128], strides = [1, 1]} : vector<128x512xf32> to vector<128x128xf32>
    %cst_16 = arith.constant dense<0.000000e+00> : vector<128xf32>
    %31 = vector.multi_reduction <add>, %30, %cst_16 [1] : vector<128x128xf32> to vector<128xf32>
    %32 = vector.shape_cast %31 : vector<128xf32> to vector<128x1xf32>
    %cst_17 = arith.constant 7.812500e-03 : f32
    %33 = vector.broadcast %cst_17 : f32 to vector<128x1xf32>
    %34 = arith.mulf %32, %33 : vector<128x1xf32>
    %35 = arith.mulf %30, %30 : vector<128x128xf32>
    %cst_18 = arith.constant dense<0.000000e+00> : vector<128xf32>
    %36 = vector.multi_reduction <add>, %35, %cst_18 [1] : vector<128x128xf32> to vector<128xf32>
    %37 = vector.shape_cast %36 : vector<128xf32> to vector<128x1xf32>
    %cst_19 = arith.constant 7.812500e-03 : f32
    %38 = vector.broadcast %cst_19 : f32 to vector<128x1xf32>
    %39 = arith.mulf %37, %38 : vector<128x1xf32>
    %40 = arith.mulf %34, %34 : vector<128x1xf32>
    %41 = arith.subf %39, %40 : vector<128x1xf32>
    %cst_20 = arith.constant 9.99999974E-6 : f32
    %42 = vector.broadcast %cst_20 : f32 to vector<128x1xf32>
    %43 = arith.addf %41, %42 : vector<128x1xf32>
    %44 = math.rsqrt %43 : vector<128x1xf32>
    %45 = vector.broadcast %34 : vector<128x1xf32> to vector<128x128xf32>
    %46 = arith.subf %30, %45 : vector<128x128xf32>
    %47 = vector.broadcast %44 : vector<128x1xf32> to vector<128x128xf32>
    %48 = arith.mulf %46, %47 : vector<128x128xf32>
    %49 = vector.broadcast %3 : vector<1x128xf32> to vector<128x128xf32>
    %50 = arith.mulf %48, %49 : vector<128x128xf32>
    %51 = vector.broadcast %4 : vector<1x128xf32> to vector<128x128xf32>
    %52 = arith.addf %50, %51 : vector<128x128xf32>
    %53 = vector.shape_cast %52 : vector<128x128xf32> to vector<16x1x8x128xf32>
    %c0_21 = arith.constant 0 : index
    %c0_22 = arith.constant 0 : index
    %c0_23 = arith.constant 0 : index
    %c128 = arith.constant 128 : index
    %54 = vector.load %arg5[%c0_21, %c0_22, %c0_23, %c128] : memref<16x2x8x256xf32, #tpu.memory_space<vmem>>, vector<16x1x8x128xf32>
    tpu.vector_store %arg5[%c0_21, %c0_22, %c0_23, %c128], %53 {strides = array<i32>} : memref<16x2x8x256xf32, #tpu.memory_space<vmem>>, vector<16x1x8x128xf32>,
    %55 = vector.extract_strided_slice %2 {offsets = [0, 256], sizes = [128, 128], strides = [1, 1]} : vector<128x512xf32> to vector<128x128xf32>
    %cst_24 = arith.constant dense<0.000000e+00> : vector<128xf32>
    %56 = vector.multi_reduction <add>, %55, %cst_24 [1] : vector<128x128xf32> to vector<128xf32>
    %57 = vector.shape_cast %56 : vector<128xf32> to vector<128x1xf32>
    %cst_25 = arith.constant 7.812500e-03 : f32
    %58 = vector.broadcast %cst_25 : f32 to vector<128x1xf32>
    %59 = arith.mulf %57, %58 : vector<128x1xf32>
    %60 = arith.mulf %55, %55 : vector<128x128xf32>
    %cst_26 = arith.constant dense<0.000000e+00> : vector<128xf32>
    %61 = vector.multi_reduction <add>, %60, %cst_26 [1] : vector<128x128xf32> to vector<128xf32>
    %62 = vector.shape_cast %61 : vector<128xf32> to vector<128x1xf32>
    %cst_27 = arith.constant 7.812500e-03 : f32
    %63 = vector.broadcast %cst_27 : f32 to vector<128x1xf32>
    %64 = arith.mulf %62, %63 : vector<128x1xf32>
    %65 = arith.mulf %59, %59 : vector<128x1xf32>
    %66 = arith.subf %64, %65 : vector<128x1xf32>
    %cst_28 = arith.constant 9.99999974E-6 : f32
    %67 = vector.broadcast %cst_28 : f32 to vector<128x1xf32>
    %68 = arith.addf %66, %67 : vector<128x1xf32>
    %69 = math.rsqrt %68 : vector<128x1xf32>
    %70 = vector.broadcast %59 : vector<128x1xf32> to vector<128x128xf32>
    %71 = arith.subf %55, %70 : vector<128x128xf32>
    %72 = vector.broadcast %69 : vector<128x1xf32> to vector<128x128xf32>
    %73 = arith.mulf %71, %72 : vector<128x128xf32>
    %74 = vector.broadcast %3 : vector<1x128xf32> to vector<128x128xf32>
    %75 = arith.mulf %73, %74 : vector<128x128xf32>
    %76 = vector.broadcast %4 : vector<1x128xf32> to vector<128x128xf32>
    %77 = arith.addf %75, %76 : vector<128x128xf32>
    %78 = vector.shape_cast %77 : vector<128x128xf32> to vector<16x1x8x128xf32>
    %c0_29 = arith.constant 0 : index
    %c1 = arith.constant 1 : index
    %c0_30 = arith.constant 0 : index
    %c0_31 = arith.constant 0 : index
    %79 = vector.load %arg5[%c0_29, %c1, %c0_30, %c0_31] : memref<16x2x8x256xf32, #tpu.memory_space<vmem>>, vector<16x1x8x128xf32>
    tpu.vector_store %arg5[%c0_29, %c1, %c0_30, %c0_31], %78 {strides = array<i32>} : memref<16x2x8x256xf32, #tpu.memory_space<vmem>>, vector<16x1x8x128xf32>,
    %80 = vector.extract_strided_slice %2 {offsets = [0, 384], sizes = [128, 128], strides = [1, 1]} : vector<128x512xf32> to vector<128x128xf32>
    %cst_32 = arith.constant dense<0.000000e+00> : vector<128xf32>
    %81 = vector.multi_reduction <add>, %80, %cst_32 [1] : vector<128x128xf32> to vector<128xf32>
    %82 = vector.shape_cast %81 : vector<128xf32> to vector<128x1xf32>
    %cst_33 = arith.constant 7.812500e-03 : f32
    %83 = vector.broadcast %cst_33 : f32 to vector<128x1xf32>
    %84 = arith.mulf %82, %83 : vector<128x1xf32>
    %85 = arith.mulf %80, %80 : vector<128x128xf32>
    %cst_34 = arith.constant dense<0.000000e+00> : vector<128xf32>
    %86 = vector.multi_reduction <add>, %85, %cst_34 [1] : vector<128x128xf32> to vector<128xf32>
    %87 = vector.shape_cast %86 : vector<128xf32> to vector<128x1xf32>
    %cst_35 = arith.constant 7.812500e-03 : f32
    %88 = vector.broadcast %cst_35 : f32 to vector<128x1xf32>
    %89 = arith.mulf %87, %88 : vector<128x1xf32>
    %90 = arith.mulf %84, %84 : vector<128x1xf32>
    %91 = arith.subf %89, %90 : vector<128x1xf32>
    %cst_36 = arith.constant 9.99999974E-6 : f32
    %92 = vector.broadcast %cst_36 : f32 to vector<128x1xf32>
    %93 = arith.addf %91, %92 : vector<128x1xf32>
    %94 = math.rsqrt %93 : vector<128x1xf32>
    %95 = vector.broadcast %84 : vector<128x1xf32> to vector<128x128xf32>
    %96 = arith.subf %80, %95 : vector<128x128xf32>
    %97 = vector.broadcast %94 : vector<128x1xf32> to vector<128x128xf32>
    %98 = arith.mulf %96, %97 : vector<128x128xf32>
    %99 = vector.broadcast %3 : vector<1x128xf32> to vector<128x128xf32>
    %100 = arith.mulf %98, %99 : vector<128x128xf32>
    %101 = vector.broadcast %4 : vector<1x128xf32> to vector<128x128xf32>
    %102 = arith.addf %100, %101 : vector<128x128xf32>
    %103 = vector.shape_cast %102 : vector<128x128xf32> to vector<16x1x8x128xf32>
    %c0_37 = arith.constant 0 : index
    %c1_38 = arith.constant 1 : index
    %c0_39 = arith.constant 0 : index
    %c128_40 = arith.constant 128 : index
    %104 = vector.load %arg5[%c0_37, %c1_38, %c0_39, %c128_40] : memref<16x2x8x256xf32, #tpu.memory_space<vmem>>, vector<16x1x8x128xf32>
    tpu.vector_store %arg5[%c0_37, %c1_38, %c0_39, %c128_40], %103 {strides = array<i32>} : memref<16x2x8x256xf32, #tpu.memory_space<vmem>>, vector<16x1x8x128xf32>,
    return
  }
  func.func @transform_0(%arg0: i32) -> (i32, i32) {
    %c0_i32 = arith.constant 0 : i32
    %c0_i32_0 = arith.constant 0 : i32
    return %arg0, %c0_i32 : i32, i32
  }
  func.func @transform_1(%arg0: i32) -> (i32, i32) {
    %c0_i32 = arith.constant 0 : i32
    %c0_i32_0 = arith.constant 0 : i32
    %c0_i32_1 = arith.constant 0 : i32
    return %c0_i32, %c0_i32_0 : i32, i32
  }
  func.func @transform_2(%arg0: i32) -> (i32, i32) {
    %c0_i32 = arith.constant 0 : i32
    %c0_i32_0 = arith.constant 0 : i32
    %c0_i32_1 = arith.constant 0 : i32
    return %c0_i32, %c0_i32_0 : i32, i32
  }
  func.func @transform_3(%arg0: i32) -> (i32, i32) {
    %c0_i32 = arith.constant 0 : i32
    %c0_i32_0 = arith.constant 0 : i32
    %c0_i32_1 = arith.constant 0 : i32
    return %c0_i32, %c0_i32_0 : i32, i32
  }
  func.func @transform_4(%arg0: i32) -> (i32, i32, i32, i32) {
    %c0_i32 = arith.constant 0 : i32
    %c0_i32_0 = arith.constant 0 : i32
    %c0_i32_1 = arith.constant 0 : i32
    %c0_i32_2 = arith.constant 0 : i32
    return %arg0, %c0_i32, %c0_i32_0, %c0_i32_1 : i32, i32, i32, i32
  }
}

module attributes {stable_mosaic.version = 11 : i64} {
  func.func @_patch_expand_kernel(%arg0: i32, %arg1: memref<128x256xf32, #tpu.memory_space<vmem>>, %arg2: memref<256x512xf32, #tpu.memory_space<vmem>>, %arg3: memref<1x128xf32, #tpu.memory_space<vmem>>, %arg4: memref<1x128xf32, #tpu.memory_space<vmem>>, %arg5: memref<16x2x8x256xf32, #tpu.memory_space<vmem>>) attributes {dimension_semantics = [#tpu.dimension_semantics<parallel>], iteration_bounds = array<i64: 2>, scalar_prefetch = 0 : i64, scratch_operands = 0 : i64, tpu.core_type = #tpu.core_type<tc>, window_params = [{transform_indices = @transform_0, window_bounds = array<i64: 128, 256>}, {pipeline_mode = #tpu.pipeline_mode<synchronous>, transform_indices = @transform_1, window_bounds = array<i64: 256, 512>}, {pipeline_mode = #tpu.pipeline_mode<synchronous>, transform_indices = @transform_2, window_bounds = array<i64: 1, 128>}, {pipeline_mode = #tpu.pipeline_mode<synchronous>, transform_indices = @transform_3, window_bounds = array<i64: 1, 128>}, {transform_indices = @transform_4, window_bounds = array<i64: 16, 2, 8, 256>}]} {
    %c0 = arith.constant 0 : index
    %c0_0 = arith.constant 0 : index
    %0 = vector.load %arg1[%c0, %c0_0] : memref<128x256xf32, #tpu.memory_space<vmem>>, vector<128x256xf32>
    %c0_1 = arith.constant 0 : index
    %c0_2 = arith.constant 0 : index
    %1 = vector.load %arg2[%c0_1, %c0_2] : memref<256x512xf32, #tpu.memory_space<vmem>>, vector<256x512xf32>
    %cst = arith.constant dense<0.000000e+00> : vector<128x512xf32>
    %2 = tpu.matmul %0, %1, %cst {dimension_numbers = #tpu.dot_dimension_numbers<[1], [0], [0], [1], [0, 0, 1, 1], [], []>} : vector<128x256xf32>, vector<256x512xf32>, vector<128x512xf32> -> vector<128x512xf32>
    %c0_3 = arith.constant 0 : index
    %c0_4 = arith.constant 0 : index
    %3 = vector.load %arg3[%c0_3, %c0_4] : memref<1x128xf32, #tpu.memory_space<vmem>>, vector<1x128xf32>
    %c0_5 = arith.constant 0 : index
    %c0_6 = arith.constant 0 : index
    %4 = vector.load %arg4[%c0_5, %c0_6] : memref<1x128xf32, #tpu.memory_space<vmem>>, vector<1x128xf32>
    %5 = vector.extract_strided_slice %2 {offsets = [0, 0], sizes = [128, 128], strides = [1, 1]} : vector<128x512xf32> to vector<128x128xf32>
    %cst_7 = arith.constant dense<0.000000e+00> : vector<128xf32>
    %6 = vector.multi_reduction <add>, %5, %cst_7 [1] : vector<128x128xf32> to vector<128xf32>
    %7 = vector.shape_cast %6 : vector<128xf32> to vector<128x1xf32>
    %cst_8 = arith.constant 7.812500e-03 : f32
    %8 = vector.broadcast %cst_8 : f32 to vector<128x1xf32>
    %9 = arith.mulf %7, %8 : vector<128x1xf32>
    %10 = arith.mulf %5, %5 : vector<128x128xf32>
    %cst_9 = arith.constant dense<0.000000e+00> : vector<128xf32>
    %11 = vector.multi_reduction <add>, %10, %cst_9 [1] : vector<128x128xf32> to vector<128xf32>
    %12 = vector.shape_cast %11 : vector<128xf32> to vector<128x1xf32>
    %cst_10 = arith.constant 7.812500e-03 : f32
    %13 = vector.broadcast %cst_10 : f32 to vector<128x1xf32>
    %14 = arith.mulf %12, %13 : vector<128x1xf32>
    %15 = arith.mulf %9, %9 : vector<128x1xf32>
    %16 = arith.subf %14, %15 : vector<128x1xf32>
    %cst_11 = arith.constant 9.99999974E-6 : f32
    %17 = vector.broadcast %cst_11 : f32 to vector<128x1xf32>
    %18 = arith.addf %16, %17 : vector<128x1xf32>
    %19 = math.rsqrt %18 : vector<128x1xf32>
    %20 = vector.broadcast %9 : vector<128x1xf32> to vector<128x128xf32>
    %21 = arith.subf %5, %20 : vector<128x128xf32>
    %22 = vector.broadcast %19 : vector<128x1xf32> to vector<128x128xf32>
    %23 = arith.mulf %21, %22 : vector<128x128xf32>
    %24 = vector.broadcast %3 : vector<1x128xf32> to vector<128x128xf32>
    %25 = arith.mulf %23, %24 : vector<128x128xf32>
    %26 = vector.broadcast %4 : vector<1x128xf32> to vector<128x128xf32>
    %27 = arith.addf %25, %26 : vector<128x128xf32>
    %28 = vector.shape_cast %27 : vector<128x128xf32> to vector<16x1x8x128xf32>
    %c0_12 = arith.constant 0 : index
    %c0_13 = arith.constant 0 : index
    %c0_14 = arith.constant 0 : index
    %c0_15 = arith.constant 0 : index
    %29 = vector.load %arg5[%c0_12, %c0_13, %c0_14, %c0_15] : memref<16x2x8x256xf32, #tpu.memory_space<vmem>>, vector<16x1x8x128xf32>
    tpu.vector_store %arg5[%c0_12, %c0_13, %c0_14, %c0_15], %28 {strides = array<i32>} : memref<16x2x8x256xf32, #tpu.memory_space<vmem>>, vector<16x1x8x128xf32>,
    %30 = vector.extract_strided_slice %2 {offsets = [0, 128], sizes = [128, 128], strides = [1, 1]} : vector<128x512xf32> to vector<128x128xf32>
    %cst_16 = arith.constant dense<0.000000e+00> : vector<128xf32>
    %31 = vector.multi_reduction <add>, %30, %cst_16 [1] : vector<128x128xf32> to vector<128xf32>
    %32 = vector.shape_cast %31 : vector<128xf32> to vector<128x1xf32>
    %cst_17 = arith.constant 7.812500e-03 : f32
    %33 = vector.broadcast %cst_17 : f32 to vector<128x1xf32>
    %34 = arith.mulf %32, %33 : vector<128x1xf32>
    %35 = arith.mulf %30, %30 : vector<128x128xf32>
    %cst_18 = arith.constant dense<0.000000e+00> : vector<128xf32>
    %36 = vector.multi_reduction <add>, %35, %cst_18 [1] : vector<128x128xf32> to vector<128xf32>
    %37 = vector.shape_cast %36 : vector<128xf32> to vector<128x1xf32>
    %cst_19 = arith.constant 7.812500e-03 : f32
    %38 = vector.broadcast %cst_19 : f32 to vector<128x1xf32>
    %39 = arith.mulf %37, %38 : vector<128x1xf32>
    %40 = arith.mulf %34, %34 : vector<128x1xf32>
    %41 = arith.subf %39, %40 : vector<128x1xf32>
    %cst_20 = arith.constant 9.99999974E-6 : f32
    %42 = vector.broadcast %cst_20 : f32 to vector<128x1xf32>
    %43 = arith.addf %41, %42 : vector<128x1xf32>
    %44 = math.rsqrt %43 : vector<128x1xf32>
    %45 = vector.broadcast %34 : vector<128x1xf32> to vector<128x128xf32>
    %46 = arith.subf %30, %45 : vector<128x128xf32>
    %47 = vector.broadcast %44 : vector<128x1xf32> to vector<128x128xf32>
    %48 = arith.mulf %46, %47 : vector<128x128xf32>
    %49 = vector.broadcast %3 : vector<1x128xf32> to vector<128x128xf32>
    %50 = arith.mulf %48, %49 : vector<128x128xf32>
    %51 = vector.broadcast %4 : vector<1x128xf32> to vector<128x128xf32>
    %52 = arith.addf %50, %51 : vector<128x128xf32>
    %53 = vector.shape_cast %52 : vector<128x128xf32> to vector<16x1x8x128xf32>
    %c0_21 = arith.constant 0 : index
    %c0_22 = arith.constant 0 : index
    %c0_23 = arith.constant 0 : index
    %c128 = arith.constant 128 : index
    %54 = vector.load %arg5[%c0_21, %c0_22, %c0_23, %c128] : memref<16x2x8x256xf32, #tpu.memory_space<vmem>>, vector<16x1x8x128xf32>
    tpu.vector_store %arg5[%c0_21, %c0_22, %c0_23, %c128], %53 {strides = array<i32>} : memref<16x2x8x256xf32, #tpu.memory_space<vmem>>, vector<16x1x8x128xf32>,
    %55 = vector.extract_strided_slice %2 {offsets = [0, 256], sizes = [128, 128], strides = [1, 1]} : vector<128x512xf32> to vector<128x128xf32>
    %cst_24 = arith.constant dense<0.000000e+00> : vector<128xf32>
    %56 = vector.multi_reduction <add>, %55, %cst_24 [1] : vector<128x128xf32> to vector<128xf32>
    %57 = vector.shape_cast %56 : vector<128xf32> to vector<128x1xf32>
    %cst_25 = arith.constant 7.812500e-03 : f32
    %58 = vector.broadcast %cst_25 : f32 to vector<128x1xf32>
    %59 = arith.mulf %57, %58 : vector<128x1xf32>
    %60 = arith.mulf %55, %55 : vector<128x128xf32>
    %cst_26 = arith.constant dense<0.000000e+00> : vector<128xf32>
    %61 = vector.multi_reduction <add>, %60, %cst_26 [1] : vector<128x128xf32> to vector<128xf32>
    %62 = vector.shape_cast %61 : vector<128xf32> to vector<128x1xf32>
    %cst_27 = arith.constant 7.812500e-03 : f32
    %63 = vector.broadcast %cst_27 : f32 to vector<128x1xf32>
    %64 = arith.mulf %62, %63 : vector<128x1xf32>
    %65 = arith.mulf %59, %59 : vector<128x1xf32>
    %66 = arith.subf %64, %65 : vector<128x1xf32>
    %cst_28 = arith.constant 9.99999974E-6 : f32
    %67 = vector.broadcast %cst_28 : f32 to vector<128x1xf32>
    %68 = arith.addf %66, %67 : vector<128x1xf32>
    %69 = math.rsqrt %68 : vector<128x1xf32>
    %70 = vector.broadcast %59 : vector<128x1xf32> to vector<128x128xf32>
    %71 = arith.subf %55, %70 : vector<128x128xf32>
    %72 = vector.broadcast %69 : vector<128x1xf32> to vector<128x128xf32>
    %73 = arith.mulf %71, %72 : vector<128x128xf32>
    %74 = vector.broadcast %3 : vector<1x128xf32> to vector<128x128xf32>
    %75 = arith.mulf %73, %74 : vector<128x128xf32>
    %76 = vector.broadcast %4 : vector<1x128xf32> to vector<128x128xf32>
    %77 = arith.addf %75, %76 : vector<128x128xf32>
    %78 = vector.shape_cast %77 : vector<128x128xf32> to vector<16x1x8x128xf32>
    %c0_29 = arith.constant 0 : index
    %c1 = arith.constant 1 : index
    %c0_30 = arith.constant 0 : index
    %c0_31 = arith.constant 0 : index
    %79 = vector.load %arg5[%c0_29, %c1, %c0_30, %c0_31] : memref<16x2x8x256xf32, #tpu.memory_space<vmem>>, vector<16x1x8x128xf32>
    tpu.vector_store %arg5[%c0_29, %c1, %c0_30, %c0_31], %78 {strides = array<i32>} : memref<16x2x8x256xf32, #tpu.memory_space<vmem>>, vector<16x1x8x128xf32>,
    %80 = vector.extract_strided_slice %2 {offsets = [0, 384], sizes = [128, 128], strides = [1, 1]} : vector<128x512xf32> to vector<128x128xf32>
    %cst_32 = arith.constant dense<0.000000e+00> : vector<128xf32>
    %81 = vector.multi_reduction <add>, %80, %cst_32 [1] : vector<128x128xf32> to vector<128xf32>
    %82 = vector.shape_cast %81 : vector<128xf32> to vector<128x1xf32>
    %cst_33 = arith.constant 7.812500e-03 : f32
    %83 = vector.broadcast %cst_33 : f32 to vector<128x1xf32>
    %84 = arith.mulf %82, %83 : vector<128x1xf32>
    %85 = arith.mulf %80, %80 : vector<128x128xf32>
    %cst_34 = arith.constant dense<0.000000e+00> : vector<128xf32>
    %86 = vector.multi_reduction <add>, %85, %cst_34 [1] : vector<128x128xf32> to vector<128xf32>
    %87 = vector.shape_cast %86 : vector<128xf32> to vector<128x1xf32>
    %cst_35 = arith.constant 7.812500e-03 : f32
    %88 = vector.broadcast %cst_35 : f32 to vector<128x1xf32>
    %89 = arith.mulf %87, %88 : vector<128x1xf32>
    %90 = arith.mulf %84, %84 : vector<128x1xf32>
    %91 = arith.subf %89, %90 : vector<128x1xf32>
    %cst_36 = arith.constant 9.99999974E-6 : f32
    %92 = vector.broadcast %cst_36 : f32 to vector<128x1xf32>
    %93 = arith.addf %91, %92 : vector<128x1xf32>
    %94 = math.rsqrt %93 : vector<128x1xf32>
    %95 = vector.broadcast %84 : vector<128x1xf32> to vector<128x128xf32>
    %96 = arith.subf %80, %95 : vector<128x128xf32>
    %97 = vector.broadcast %94 : vector<128x1xf32> to vector<128x128xf32>
    %98 = arith.mulf %96, %97 : vector<128x128xf32>
    %99 = vector.broadcast %3 : vector<1x128xf32> to vector<128x128xf32>
    %100 = arith.mulf %98, %99 : vector<128x128xf32>
    %101 = vector.broadcast %4 : vector<1x128xf32> to vector<128x128xf32>
    %102 = arith.addf %100, %101 : vector<128x128xf32>
    %103 = vector.shape_cast %102 : vector<128x128xf32> to vector<16x1x8x128xf32>
    %c0_37 = arith.constant 0 : index
    %c1_38 = arith.constant 1 : index
    %c0_39 = arith.constant 0 : index
    %c128_40 = arith.constant 128 : index
    %104 = vector.load %arg5[%c0_37, %c1_38, %c0_39, %c128_40] : memref<16x2x8x256xf32, #tpu.memory_space<vmem>>, vector<16x1x8x128xf32>
    tpu.vector_store %arg5[%c0_37, %c1_38, %c0_39, %c128_40], %103 {strides = array<i32>} : memref<16x2x8x256xf32, #tpu.memory_space<vmem>>, vector<16x1x8x128xf32>,
    return
  }
  func.func @transform_0(%arg0: i32) -> (i32, i32) {
    %c0_i32 = arith.constant 0 : i32
    %c0_i32_0 = arith.constant 0 : i32
    return %arg0, %c0_i32 : i32, i32
  }
  func.func @transform_1(%arg0: i32) -> (i32, i32) {
    %c0_i32 = arith.constant 0 : i32
    %c0_i32_0 = arith.constant 0 : i32
    %c0_i32_1 = arith.constant 0 : i32
    return %c0_i32, %c0_i32_0 : i32, i32
  }
  func.func @transform_2(%arg0: i32) -> (i32, i32) {
    %c0_i32 = arith.constant 0 : i32
    %c0_i32_0 = arith.constant 0 : i32
    %c0_i32_1 = arith.constant 0 : i32
    return %c0_i32, %c0_i32_0 : i32, i32
  }
  func.func @transform_3(%arg0: i32) -> (i32, i32) {
    %c0_i32 = arith.constant 0 : i32
    %c0_i32_0 = arith.constant 0 : i32
    %c0_i32_1 = arith.constant 0 : i32
    return %c0_i32, %c0_i32_0 : i32, i32
  }
  func.func @transform_4(%arg0: i32) -> (i32, i32, i32, i32) {
    %c0_i32 = arith.constant 0 : i32
    %c0_i32_0 = arith.constant 0 : i32
    %c0_i32_1 = arith.constant 0 : i32
    %c0_i32_2 = arith.constant 0 : i32
    return %arg0, %c0_i32, %c0_i32_0, %c0_i32_1 : i32, i32, i32, i32
  }
}

</mosaic_0001>

<bundles_post_ra>
// kernel: patch_expand.1
= control target key start
LH: loop header
LB: loop body
LE: loop exit
PB: predicated region body
PF: predicated region fallthrough
CT: control target
= control target key end

     0   :  { %9 = vsyncpa [#allocation3], 0  ;;  %s3432_s0 = inlined_call_operand.hbm [shape: f32[256,256], index: 0, kind: input, shape index: {}]   ;;  %s3433_s1 = inlined_call_operand.hbm [shape: f32[256,512], index: 1, kind: input, shape index: {}]   ;;  %s3434_s2 = inlined_call_operand.vmem [shape: f32[1,128], index: 2, kind: input, shape index: {}]   ;;  %s3435_s3 = inlined_call_operand.vmem [shape: f32[1,128], index: 3, kind: input, shape index: {}]   ;;  %s3436_s4 = inlined_call_operand.vmem [shape: f32[32,2,8,256], index: 4, kind: output, shape index: {}]  }
   0x1   :  { %11 = vsyncpa [#allocation3 + $0x1], 0 }
   0x2   :  { %12 = vsyncpa [#allocation5], 0  ;;  %s2333_s15 = smov 0   ;;  %s2335_s16 = smov 0  }
   0x3   :  { %s2337_s17 = smov 0   ;;  %s2339_s18 = smov 0  }
   0x4 LB: > { %s1838_s19 = sadd.s32 4294967295, %s2300_s18   ;;  %p38_p0 = scmp.ne.s32.totalorder %s2292_s16, %s2288_s15  ;;  %s2300_s18 = sphi %s2339_s18, %s3525_s18   ;;  %s2296_s17 = sphi %s2337_s17, %s3524_s17   ;;  %s2292_s16 = sphi %s2335_s16, %s3523_s16   ;;  %s2288_s15 = sphi %s2333_s15, %s3522_s15  }
   0x5   : > { %p2355_p1 = scmp.eq.s32.totalorder %s1838_s19, 0  ;;  %p1840_p2 = scmp.ge.s32.totalorder %s2300_s18, 1 }
   0x6   : > { %p138_p3 = scmp.lt.s32.totalorder %s2300_s18, 3  ;;  %s2302_s23 = smov [#allocation4]  }
   0x7   : > { %s3465_s20 = scalar_select %p2355_p1, 1, 0 }
   0x8   : > { %p2363_p4 = por %p2355_p1, %p38_p0  ;;  %p2367_p5 = pnand %p1840_p2, %p138_p3 }
   0x9   : > { %s150_s24 = sshll.u32 %s2302_s23, 4  ;;  %s2380_s26 = sadd.s32 1, %s2300_s18   ;;  %s151_s24 = int_to_ptr.vmem [resolvable:$true] %s150_s24 }
   0xa   : > { %s3466_s21 = scalar_select %p2363_p4, 1, 0 }
   0xb   : > { %s3467_s22 = scalar_select %p2367_p5, 1, 0 }
   0xc   : > { %p2026_p6 = pneg %p2367_p5  ;;  %s25_s27 = sadd.s32 1, %s2296_s17 }
   0xd   : > { %s22_s28 = ssub.s32 %s2300_s18, %s2380_s26  ;;  %s2204_s5 = scalar_lea.hbm %s3433_s1, 16384 }
   0xe   : > { %p2375_p7 = pnand %p2026_p6, %p2355_p1  ;;  %p2205_p8 = scmp.ne.s32.totalorder %s3433_s1, %s2204_s5 }
   0xf   : > { %p2211_p12 = scmp.lt.u32.totalorder %s2204_s5, %s3433_s1 }
  0x10   : > { %p2206_p9 = pneg %p2375_p7 }
  0x12   : > { %p2207_p10 = pnand %p2206_p9, %p2205_p8 }
  0x14   : > { %p2208_p11 = pneg %p2207_p10 }
  0x16   : > { %p2213_p13 = pnand %p2211_p12, %p2208_p11 }
  0x18   : > { %2216 = shalt.err (!%p2213_p13)
}
  0x19   : > { %s2217_s10 = scalar_lea.vmem %s151_s24, 16384  ;;  %p2225_p6 = scmp.lt.s32.totalorder %s151_s24, %s151_s24 }
  0x1a   : > { %p2218_p0 = scmp.ne.s32.totalorder %s151_s24, %s2217_s10  ;;  %p2226_p1 = scmp.lt.s32.totalorder %s2217_s10, %s2217_s10 }
  0x1c   : > { %p2220_p2 = pnand %p2218_p0, %p2206_p9  ;;  %p2227_p4 = por %p2226_p1, %p2225_p6 }
  0x1e   : > { %p2221_p3 = pneg %p2220_p2 }
  0x20   : > { %p2228_p5 = pnand %p2227_p4, %p2221_p3 }
  0x22   : > { %2231 = shalt.err (!%p2228_p5)
}
  0x23   : > { %s2303_s11 = smov 512   ;;  %s2304_s12 = smov 32  }
  0x24   : > { %2029 = dma.hbm_to_vmem [thread:$0]  (!%p2375_p7), %s3433_s1, 16384, %s151_s24, [#allocation5], %s2303_s11, %s2303_s11, %s2304_s12  }
  0x25   : > { %p23_p8 = scmp.eq.s32.totalorder %s22_s28, 0  ;;  %p32_p9 = scmp.ne.s32.totalorder %s2296_s17, %s2292_s16 }
  0x26   : > { %p33_p1 = scmp.eq.s32.totalorder %s2300_s18, 0  ;;  %p2035_p4 = scmp.lt.s32.totalorder %s2300_s18, 2 }
  0x27   : > { %s2406_s15 = scalar_select %p23_p8, %s2296_s17, %s25_s27  }
  0x28   : > { %p34_p5 = por %p33_p1, %p32_p9  ;;  %s170_s23 = sand.u32 1, %s2296_s17  }
  0x29   : > { %s1843_s29 = sshll.u32 %s170_s23, 8  ;;  %s1890_s30 = sshll.u32 %s2300_s18, 12 }
  0x2a   : > { %s2413_s7 = scalar_lea.hbm %s3432_s0, %s1890_s30  ;;  %s174_s24 = scalar_lea.vmem [#allocation2], %s1843_s29 }
  0x2b   : > { %s182_s25 = sshll.u32 %s174_s24, 4  ;;  %p2417_p7 = pnand %p2035_p4, %p34_p5  ;;  %s2415_s25 = int_to_ptr.vmem [resolvable:$true] %s182_s25 }
  0x2c   : > { %s2421_s28 = scalar_lea.sflag [#allocation3], %s170_s23  ;;  %s2232_s8 = scalar_lea.hbm %s2413_s7, 4096 }
  0x2d   : > { %p2233_p10 = scmp.ne.s32.totalorder %s2413_s7, %s2232_s8  ;;  %p2234_p11 = pneg %p2417_p7 }
  0x2e   : > { %s2237_s11 = scalar_lea.hbm %s3432_s0, 8192  ;;  %p2238_p0 = scmp.lt.u32.totalorder %s2413_s7, %s3432_s0 }
  0x2f   : > { %p2235_p12 = pnand %p2234_p11, %p2233_p10  ;;  %p2239_p2 = scmp.lt.u32.totalorder %s2237_s11, %s2232_s8 }
  0x30   : > { %p2241_p6 = scmp.lt.u32.totalorder %s2232_s8, %s2413_s7 }
  0x31   : > { %p2236_p13 = pneg %p2235_p12  ;;  %p2240_p3 = por %p2239_p2, %p2238_p0 }
  0x33   : > { %p2242_p8 = por %p2241_p6, %p2240_p3 }
  0x35   : > { %p2243_p9 = pnand %p2242_p8, %p2236_p13 }
  0x37   : > { %2246 = shalt.err (!%p2243_p9)
}
  0x38   : > { %s2247_s14 = scalar_lea.vmem %s2415_s25, 4096  ;;  %s2305_s23 = smov [#allocation2]  }
  0x39   : > { %p2248_p1 = scmp.ne.s32.totalorder %s2415_s25, %s2247_s14  ;;  %s2252_s29 = sshll.u32 %s2305_s23, 4  ;;  %s2253_s29 = int_to_ptr.vmem [resolvable:$false] %s2252_s29 }
  0x3a   : > { %s2254_s30 = scalar_lea.vmem %s2253_s29, 8192  ;;  %p2255_p10 = scmp.lt.s32.totalorder %s2415_s25, %s2253_s29 }
  0x3b   : > { %p2250_p4 = pnand %p2248_p1, %p2234_p11  ;;  %p2256_p12 = scmp.lt.s32.totalorder %s2254_s30, %s2247_s14 }
  0x3d   : > { %p2251_p5 = pneg %p2250_p4  ;;  %p2257_p0 = por %p2256_p12, %p2255_p10 }
  0x3f   : > { %p2258_p2 = pnand %p2257_p0, %p2251_p5 }
  0x41   : > { %2261 = shalt.err (!%p2258_p2)
}
  0x42   : > { %s2306_s5 = smov 256   ;;  %s2307_s6 = smov 16  }
  0x43   : > { %2033 = dma.hbm_to_vmem [thread:$0]  (!%p2417_p7), %s2413_s7, 4096, %s2415_s25, %s2421_s28, %s2306_s5, %s2306_s5, %s2307_s6  }
  0x44   : > { %p3470_p11 = scmp.ne.s32.totalorder %s3467_s22, 0 }
  0x46   : > { %194 = sbr.rel (%p3470_p11) target bundleno = 787 (0x313), region = 36 }
  0x4d   : > { %s196_s24 = sand.u32 1, %s2292_s16   ;;  %p3471_p13 = scmp.ne.s32.totalorder %s3466_s21, 0 }
  0x4e   : > { %s1848_s8 = sshll.u32 %s196_s24, 8  ;;  %s197_s9 = scalar_lea.sflag [#allocation3], %s196_s24 }
  0x4f   : > { %s2452_s10 = scalar_lea.vmem [#allocation2], %s1848_s8 }
  0x50   : > { %2279 = dma.done.wait (%p3471_p13), %s197_s9, 4096  }
  0x51   : > { %2281 = vsyncadd (%p3471_p13), %s197_s9, 4294963200  ;;  %p3472_p3 = scmp.ne.s32.totalorder %s3465_s20, 0 }
  0x53   : > { %2283 = dma.done.wait (%p3472_p3), [#allocation5], 16384  }
  0x54   : > { %2285 = vsyncadd (%p3472_p3), [#allocation5], 4294950912  ;;  %v271_v0 = vld [vmem:[#allocation4 + $0x8] sm:$0xff]  ;;  %v273_v2 = vld [vmem:[#allocation4 + $0x18] sm:$0xff]  ;;  %s1850_s20 = sshll.u32 %s1838_s19, 4 }
  0x55   : > { %v275_v1 = vld [vmem:[#allocation4 + $0x28] sm:$0xff]  ;;  %v277_v4 = vld [vmem:[#allocation4 + $0x38] sm:$0xff]  ;;  %v270_v5 = vld [vmem:[#allocation4] sm:$0xff]  ;;  %p232_p7 = scmp.lt.s32.totalorder %s1850_s20, 31 }
  0x56   : > { %v1892_v3 = vpack.c.bf16 %v275_v1, %v271_v0  ;;  %v274_v6 = vld [vmem:[#allocation4 + $0x20] sm:$0xff]  ;;  %v1956_v7 = vpack.c.bf16 %v277_v4, %v273_v2  ;;  %v272_v9 = vld [vmem:[#allocation4 + $0x10] sm:$0xff]  ;;  %v279_v11 = vld [vmem:[#allocation4 + $0x48] sm:$0xff] }
  0x57   : > { %v1894_v8 = vpack.c.bf16 %v274_v6, %v270_v5  ;;  %v276_v10 = vld [vmem:[#allocation4 + $0x30] sm:$0xff]  ;;  %v283_v13 = vld [vmem:[#allocation4 + $0x68] sm:$0xff]  ;;  %v281_v14 = vld [vmem:[#allocation4 + $0x58] sm:$0xff]  ;;  %s3527_s20 = smov (!%p232_p7, %s1850_s20), 31 }
  0x58   : > { %1893 = vmatprep.subr.bf16.mxu0 %v1892_v3  ;;  %v1958_v12 = vpack.c.bf16 %v276_v10, %v272_v9  ;;  %v285_v15 = vld [vmem:[#allocation4 + $0x78] sm:$0xff]  ;;  %1957 = vmatprep.subr.bf16.mxu1 %v1956_v7  ;;  %v1896_v16 = vpack.c.bf16 %v283_v13, %v279_v11  ;;  %v278_v18 = vld [vmem:[#allocation4 + $0x40] sm:$0xff]  ;;  %v280_v20 = vld [vmem:[#allocation4 + $0x50] sm:$0xff]  ;;  %s1891_s21 = sshll.u32 %s3527_s20, 5 }
  0x59   : > { %1895 = vmatpush1.bf16.msra.mxu0 %v1894_v8  ;;  %v1960_v17 = vpack.c.bf16 %v285_v15, %v281_v14  ;;  %v282_v19 = vld [vmem:[#allocation4 + $0x60] sm:$0xff]  ;;  %v284_v22 = vld [vmem:[#allocation4 + $0x70] sm:$0xff]  ;;  %v287_v23 = vld [vmem:[#allocation4 + $0x88] sm:$0xff]  ;;  %s2813_s28 = scalar_lea.vmem %s3436_s4, %s1891_s21 }
  0x5a   : > { %1959 = vmatpush1.bf16.msra.mxu1 %v1958_v12  ;;  %v1898_v21 = vpack.c.bf16 %v282_v19, %v278_v18  ;;  %v291_v24 = vld [vmem:[#allocation4 + $0xa8] sm:$0xff]  ;;  %1897 = vmatprep.subr.bf16.mxu0 %v1896_v16  ;;  %v1962_v25 = vpack.c.bf16 %v284_v22, %v280_v20  ;;  %v289_v27 = vld [vmem:[#allocation4 + $0x98] sm:$0xff]  ;;  %v286_v29 = vld [vmem:[#allocation4 + $0x80] sm:$0xff] }
  0x5b   : > { %1961 = vmatprep.subr.bf16.mxu1 %v1960_v17  ;;  %v1900_v26 = vpack.c.bf16 %v291_v24, %v287_v23  ;;  %v293_v28 = vld [vmem:[#allocation4 + $0xb8] sm:$0xff]  ;;  %v290_v31 = vld [vmem:[#allocation4 + $0xa0] sm:$0xff]  ;;  %v288_v32 = vld [vmem:[#allocation4 + $0x90] sm:$0xff] }
  0x5c   : > { %v1964_v30 = vpack.c.bf16 %v293_v28, %v289_v27  ;;  %v292_v33 = vld [vmem:[#allocation4 + $0xb0] sm:$0xff]  ;;  %v1902_v34 = vpack.c.bf16 %v290_v31, %v286_v29  ;;  %v295_v35 = vld [vmem:[#allocation4 + $0xc8] sm:$0xff]  ;;  %v297_v37 = vld [vmem:[#allocation4 + $0xd8] sm:$0xff] }
  0x5d   : > { %1899 = vmatpush1.bf16.msra.mxu0 %v1898_v21  ;;  %v299_v36 = vld [vmem:[#allocation4 + $0xe8] sm:$0xff]  ;;  %v1966_v38 = vpack.c.bf16 %v292_v33, %v288_v32  ;;  %v301_v40 = vld [vmem:[#allocation4 + $0xf8] sm:$0xff]  ;;  %v294_v41 = vld [vmem:[#allocation4 + $0xc0] sm:$0xff] }
  0x5e   : > { %1963 = vmatpush1.bf16.msra.mxu1 %v1962_v25  ;;  %1901 = vmatprep.subr.bf16.mxu0 %v1900_v26  ;;  %v1904_v39 = vpack.c.bf16 %v299_v36, %v295_v35  ;;  %v298_v42 = vld [vmem:[#allocation4 + $0xe0] sm:$0xff]  ;;  %v1968_v43 = vpack.c.bf16 %v301_v40, %v297_v37  ;;  %v296_v44 = vld [vmem:[#allocation4 + $0xd0] sm:$0xff]  ;;  %v303_v46 = vld [vmem:[#allocation4 + $0x108] sm:$0xff] }
  0x5f   : > { %1965 = vmatprep.subr.bf16.mxu1 %v1964_v30  ;;  %v300_v45 = vld [vmem:[#allocation4 + $0xf0] sm:$0xff]  ;;  %v307_v47 = vld [vmem:[#allocation4 + $0x128] sm:$0xff]  ;;  %v305_v48 = vld [vmem:[#allocation4 + $0x118] sm:$0xff]  ;;  %v1906_v50 = vpack.c.bf16 %v298_v42, %v294_v41 }
  0x60   : > { %v309_v49 = vld [vmem:[#allocation4 + $0x138] sm:$0xff]  ;;  %v1970_v51 = vpack.c.bf16 %v300_v45, %v296_v44  ;;  %v1908_v52 = vpack.c.bf16 %v307_v47, %v303_v46  ;;  %v302_v53 = vld [vmem:[#allocation4 + $0x100] sm:$0xff]  ;;  %v304_v55 = vld [vmem:[#allocation4 + $0x110] sm:$0xff] }
  0x61   : > { %1903 = vmatpush1.bf16.msra.mxu0 %v1902_v34  ;;  %v306_v54 = vld [vmem:[#allocation4 + $0x120] sm:$0xff]  ;;  %v1972_v56 = vpack.c.bf16 %v309_v49, %v305_v48  ;;  %v308_v57 = vld [vmem:[#allocation4 + $0x130] sm:$0xff]  ;;  %v311_v58 = vld [vmem:[#allocation4 + $0x148] sm:$0xff] }
  0x62   : > { %1967 = vmatpush1.bf16.msra.mxu1 %v1966_v38  ;;  %1905 = vmatprep.subr.bf16.mxu0 %v1904_v39  ;;  %v315_v59 = vld [vmem:[#allocation4 + $0x168] sm:$0xff]  ;;  %v313_v60 = vld [vmem:[#allocation4 + $0x158] sm:$0xff]  ;;  %v1910_v62 = vpack.c.bf16 %v306_v54, %v302_v53  ;;  %v1974_v63 = vpack.c.bf16 %v308_v57, %v304_v55  ;;  %v310_v1 = vld [vmem:[#allocation4 + $0x140] sm:$0xff] }
  0x63   : > { %1969 = vmatprep.subr.bf16.mxu1 %v1968_v43  ;;  %v317_v61 = vld [vmem:[#allocation4 + $0x178] sm:$0xff]  ;;  %v1912_v0 = vpack.c.bf16 %v315_v59, %v311_v58  ;;  %v314_v2 = vld [vmem:[#allocation4 + $0x160] sm:$0xff]  ;;  %v312_v3 = vld [vmem:[#allocation4 + $0x150] sm:$0xff] }
  0x64   : > { %v1976_v4 = vpack.c.bf16 %v317_v61, %v313_v60  ;;  %v316_v5 = vld [vmem:[#allocation4 + $0x170] sm:$0xff]  ;;  %v319_v6 = vld [vmem:[#allocation4 + $0x188] sm:$0xff]  ;;  %v321_v8 = vld [vmem:[#allocation4 + $0x198] sm:$0xff]  ;;  %v1914_v10 = vpack.c.bf16 %v314_v2, %v310_v1 }
  0x65   : > { %1907 = vmatpush1.bf16.msra.mxu0 %v1906_v50  ;;  %v323_v7 = vld [vmem:[#allocation4 + $0x1a8] sm:$0xff]  ;;  %v325_v9 = vld [vmem:[#allocation4 + $0x1b8] sm:$0xff]  ;;  %v1978_v11 = vpack.c.bf16 %v316_v5, %v312_v3  ;;  %v318_v13 = vld [vmem:[#allocation4 + $0x180] sm:$0xff] }
  0x66   : > { %1971 = vmatpush1.bf16.msra.mxu1 %v1970_v51  ;;  %1909 = vmatprep.subr.bf16.mxu0 %v1908_v52  ;;  %v1916_v12 = vpack.c.bf16 %v323_v7, %v319_v6  ;;  %v322_v14 = vld [vmem:[#allocation4 + $0x1a0] sm:$0xff]  ;;  %v320_v15 = vld [vmem:[#allocation4 + $0x190] sm:$0xff]  ;;  %v1980_v16 = vpack.c.bf16 %v325_v9, %v321_v8  ;;  %v327_v18 = vld [vmem:[#allocation4 + $0x1c8] sm:$0xff] }
  0x67   : > { %1973 = vmatprep.subr.bf16.mxu1 %v1972_v56  ;;  %v324_v17 = vld [vmem:[#allocation4 + $0x1b0] sm:$0xff]  ;;  %v331_v19 = vld [vmem:[#allocation4 + $0x1e8] sm:$0xff]  ;;  %v329_v20 = vld [vmem:[#allocation4 + $0x1d8] sm:$0xff]  ;;  %v1918_v22 = vpack.c.bf16 %v322_v14, %v318_v13 }
  0x68   : > { %v333_v21 = vld [vmem:[#allocation4 + $0x1f8] sm:$0xff]  ;;  %v1982_v23 = vpack.c.bf16 %v324_v17, %v320_v15  ;;  %v1920_v24 = vpack.c.bf16 %v331_v19, %v327_v18  ;;  %v326_v25 = vld [vmem:[#allocation4 + $0x1c0] sm:$0xff]  ;;  %v328_v27 = vld [vmem:[#allocation4 + $0x1d0] sm:$0xff] }
  0x69   : > { %1911 = vmatpush1.bf16.msra.mxu0 %v1910_v62  ;;  %v330_v26 = vld [vmem:[#allocation4 + $0x1e0] sm:$0xff]  ;;  %v1984_v28 = vpack.c.bf16 %v333_v21, %v329_v20  ;;  %v332_v29 = vld [vmem:[#allocation4 + $0x1f0] sm:$0xff]  ;;  %v335_v30 = vld [vmem:[#allocation4 + $0x208] sm:$0xff] }
  0x6a   : > { %1975 = vmatpush1.bf16.msra.mxu1 %v1974_v63  ;;  %1913 = vmatprep.subr.bf16.mxu0 %v1912_v0  ;;  %v339_v31 = vld [vmem:[#allocation4 + $0x228] sm:$0xff]  ;;  %v337_v32 = vld [vmem:[#allocation4 + $0x218] sm:$0xff]  ;;  %v1922_v34 = vpack.c.bf16 %v330_v26, %v326_v25  ;;  %v1986_v35 = vpack.c.bf16 %v332_v29, %v328_v27  ;;  %v334_v37 = vld [vmem:[#allocation4 + $0x200] sm:$0xff] }
  0x6b   : > { %1977 = vmatprep.subr.bf16.mxu1 %v1976_v4  ;;  %v341_v33 = vld [vmem:[#allocation4 + $0x238] sm:$0xff]  ;;  %v1924_v36 = vpack.c.bf16 %v339_v31, %v335_v30  ;;  %v338_v38 = vld [vmem:[#allocation4 + $0x220] sm:$0xff]  ;;  %v336_v39 = vld [vmem:[#allocation4 + $0x210] sm:$0xff] }
  0x6c   : > { %v1988_v40 = vpack.c.bf16 %v341_v33, %v337_v32  ;;  %v340_v41 = vld [vmem:[#allocation4 + $0x230] sm:$0xff]  ;;  %v343_v42 = vld [vmem:[#allocation4 + $0x248] sm:$0xff]  ;;  %v345_v44 = vld [vmem:[#allocation4 + $0x258] sm:$0xff]  ;;  %v1926_v46 = vpack.c.bf16 %v338_v38, %v334_v37 }
  0x6d   : > { %1915 = vmatpush1.bf16.msra.mxu0 %v1914_v10  ;;  %v347_v43 = vld [vmem:[#allocation4 + $0x268] sm:$0xff]  ;;  %v349_v45 = vld [vmem:[#allocation4 + $0x278] sm:$0xff]  ;;  %v1990_v47 = vpack.c.bf16 %v340_v41, %v336_v39  ;;  %v342_v49 = vld [vmem:[#allocation4 + $0x240] sm:$0xff] }
  0x6e   : > { %1979 = vmatpush1.bf16.msra.mxu1 %v1978_v11  ;;  %1917 = vmatprep.subr.bf16.mxu0 %v1916_v12  ;;  %v1928_v48 = vpack.c.bf16 %v347_v43, %v343_v42  ;;  %v346_v50 = vld [vmem:[#allocation4 + $0x260] sm:$0xff]  ;;  %v344_v51 = vld [vmem:[#allocation4 + $0x250] sm:$0xff]  ;;  %v1992_v52 = vpack.c.bf16 %v349_v45, %v345_v44  ;;  %v351_v54 = vld [vmem:[#allocation4 + $0x288] sm:$0xff] }
  0x6f   : > { %1981 = vmatprep.subr.bf16.mxu1 %v1980_v16  ;;  %v348_v53 = vld [vmem:[#allocation4 + $0x270] sm:$0xff]  ;;  %v355_v55 = vld [vmem:[#allocation4 + $0x2a8] sm:$0xff]  ;;  %v353_v56 = vld [vmem:[#allocation4 + $0x298] sm:$0xff]  ;;  %v1930_v58 = vpack.c.bf16 %v346_v50, %v342_v49 }
  0x70   : > { %v357_v57 = vld [vmem:[#allocation4 + $0x2b8] sm:$0xff]  ;;  %v1994_v59 = vpack.c.bf16 %v348_v53, %v344_v51  ;;  %v1932_v60 = vpack.c.bf16 %v355_v55, %v351_v54  ;;  %v350_v61 = vld [vmem:[#allocation4 + $0x280] sm:$0xff]  ;;  %v352_v63 = vld [vmem:[#allocation4 + $0x290] sm:$0xff] }
  0x71   : > { %1919 = vmatpush1.bf16.msra.mxu0 %v1918_v22  ;;  %v354_v62 = vld [vmem:[#allocation4 + $0x2a0] sm:$0xff]  ;;  %v1996_v0 = vpack.c.bf16 %v357_v57, %v353_v56  ;;  %v356_v1 = vld [vmem:[#allocation4 + $0x2b0] sm:$0xff]  ;;  %v359_v2 = vld [vmem:[#allocation4 + $0x2c8] sm:$0xff] }
  0x72   : > { %1983 = vmatpush1.bf16.msra.mxu1 %v1982_v23  ;;  %1921 = vmatprep.subr.bf16.mxu0 %v1920_v24  ;;  %v363_v3 = vld [vmem:[#allocation4 + $0x2e8] sm:$0xff]  ;;  %v361_v4 = vld [vmem:[#allocation4 + $0x2d8] sm:$0xff]  ;;  %v1934_v6 = vpack.c.bf16 %v354_v62, %v350_v61  ;;  %v358_v7 = vld [vmem:[#allocation4 + $0x2c0] sm:$0xff]  ;;  %v1998_v8 = vpack.c.bf16 %v356_v1, %v352_v63 }
  0x73   : > { %1985 = vmatprep.subr.bf16.mxu1 %v1984_v28  ;;  %v365_v5 = vld [vmem:[#allocation4 + $0x2f8] sm:$0xff]  ;;  %v1936_v9 = vpack.c.bf16 %v363_v3, %v359_v2  ;;  %v362_v10 = vld [vmem:[#allocation4 + $0x2e0] sm:$0xff]  ;;  %v360_v11 = vld [vmem:[#allocation4 + $0x2d0] sm:$0xff] }
  0x74   : > { %v364_v12 = vld [vmem:[#allocation4 + $0x2f0] sm:$0xff]  ;;  %v2000_v13 = vpack.c.bf16 %v365_v5, %v361_v4  ;;  %v367_v14 = vld [vmem:[#allocation4 + $0x308] sm:$0xff]  ;;  %v369_v17 = vld [vmem:[#allocation4 + $0x318] sm:$0xff]  ;;  %v1938_v19 = vpack.c.bf16 %v362_v10, %v358_v7 }
  0x75   : > { %1923 = vmatpush1.bf16.msra.mxu0 %v1922_v34  ;;  %v371_v15 = vld [vmem:[#allocation4 + $0x328] sm:$0xff]  ;;  %v373_v18 = vld [vmem:[#allocation4 + $0x338] sm:$0xff]  ;;  %v2002_v20 = vpack.c.bf16 %v364_v12, %v360_v11  ;;  %v366_v22 = vld [vmem:[#allocation4 + $0x300] sm:$0xff] }
  0x76   : > { %1987 = vmatpush1.bf16.msra.mxu1 %v1986_v35  ;;  %1925 = vmatprep.subr.bf16.mxu0 %v1924_v36  ;;  %v239_v16 = vld [vmem:[%s2452_s10 + $0x8] sm:$0xff]  ;;  %v1940_v21 = vpack.c.bf16 %v371_v15, %v367_v14  ;;  %v370_v23 = vld [vmem:[#allocation4 + $0x320] sm:$0xff]  ;;  %v368_v24 = vld [vmem:[#allocation4 + $0x310] sm:$0xff]  ;;  %v2004_v25 = vpack.c.bf16 %v373_v18, %v369_v17 }
  0x77   : > { %1989 = vmatprep.subr.bf16.mxu1 %v1988_v40  ;;  %462 = vmatprep.mubr.f32.mxu0 %v239_v16  ;;  %v372_v26 = vld [vmem:[#allocation4 + $0x330] sm:$0xff]  ;;  %v375_v27 = vld [vmem:[#allocation4 + $0x348] sm:$0xff]  ;;  %v377_v29 = vld [vmem:[#allocation4 + $0x358] sm:$0xff]  ;;  %v1942_v31 = vpack.c.bf16 %v370_v23, %v366_v22 }
  0x78   : > { %623 = vmatprep.mubr.f32.mxu1 %v239_v16  ;;  %v379_v28 = vld [vmem:[#allocation4 + $0x368] sm:$0xff]  ;;  %v381_v30 = vld [vmem:[#allocation4 + $0x378] sm:$0xff]  ;;  %v2006_v32 = vpack.c.bf16 %v372_v26, %v368_v24  ;;  %v374_v34 = vld [vmem:[#allocation4 + $0x340] sm:$0xff] }
  0x79   : > { %1927 = vmatpush1.bf16.msra.mxu0 %v1926_v46  ;;  %v1944_v33 = vpack.c.bf16 %v379_v28, %v375_v27  ;;  %v378_v35 = vld [vmem:[#allocation4 + $0x360] sm:$0xff]  ;;  %v376_v36 = vld [vmem:[#allocation4 + $0x350] sm:$0xff]  ;;  %v2008_v37 = vpack.c.bf16 %v381_v30, %v377_v29  ;;  %v383_v39 = vld [vmem:[#allocation4 + $0x388] sm:$0xff] }
  0x7a   : > { %1991 = vmatpush1.bf16.msra.mxu1 %v1990_v47  ;;  %1929 = vmatprep.subr.bf16.mxu0 %v1928_v48  ;;  %v380_v38 = vld [vmem:[#allocation4 + $0x370] sm:$0xff]  ;;  %v387_v40 = vld [vmem:[#allocation4 + $0x3a8] sm:$0xff]  ;;  %v385_v41 = vld [vmem:[#allocation4 + $0x398] sm:$0xff]  ;;  %v1946_v43 = vpack.c.bf16 %v378_v35, %v374_v34 }
  0x7b   : > { %1993 = vmatprep.subr.bf16.mxu1 %v1992_v52  ;;  %v389_v42 = vld [vmem:[#allocation4 + $0x3b8] sm:$0xff]  ;;  %v2010_v44 = vpack.c.bf16 %v380_v38, %v376_v36  ;;  %v1948_v45 = vpack.c.bf16 %v387_v40, %v383_v39  ;;  %v382_v46 = vld [vmem:[#allocation4 + $0x380] sm:$0xff]  ;;  %v384_v48 = vld [vmem:[#allocation4 + $0x390] sm:$0xff] }
  0x7c   : > { %v386_v47 = vld [vmem:[#allocation4 + $0x3a0] sm:$0xff]  ;;  %v2012_v49 = vpack.c.bf16 %v389_v42, %v385_v41  ;;  %v388_v50 = vld [vmem:[#allocation4 + $0x3b0] sm:$0xff]  ;;  %v391_v51 = vld [vmem:[#allocation4 + $0x3c8] sm:$0xff] }
  0x7d   : > { %1931 = vmatpush1.bf16.msra.mxu0 %v1930_v58  ;;  %v395_v52 = vld [vmem:[#allocation4 + $0x3e8] sm:$0xff]  ;;  %v393_v53 = vld [vmem:[#allocation4 + $0x3d8] sm:$0xff]  ;;  %v1950_v55 = vpack.c.bf16 %v386_v47, %v382_v46  ;;  %v2014_v56 = vpack.c.bf16 %v388_v50, %v384_v48  ;;  %v390_v58 = vld [vmem:[#allocation4 + $0x3c0] sm:$0xff] }
  0x7e   : > { %1995 = vmatpush1.bf16.msra.mxu1 %v1994_v59  ;;  %1933 = vmatprep.subr.bf16.mxu0 %v1932_v60  ;;  %v397_v54 = vld [vmem:[#allocation4 + $0x3f8] sm:$0xff]  ;;  %v1952_v57 = vpack.c.bf16 %v395_v52, %v391_v51  ;;  %v394_v59 = vld [vmem:[#allocation4 + $0x3e0] sm:$0xff]  ;;  %v392_v61 = vld [vmem:[#allocation4 + $0x3d0] sm:$0xff] }
  0x7f   : > { %1997 = vmatprep.subr.bf16.mxu1 %v1996_v0  ;;  %v2016_v60 = vpack.c.bf16 %v397_v54, %v393_v53  ;;  %v396_v62 = vld [vmem:[#allocation4 + $0x3f0] sm:$0xff]  ;;  %v1954_v63 = vpack.c.bf16 %v394_v59, %v390_v58  ;;  %v238_v1 = vld [vmem:[%s2452_s10] sm:$0xff]  ;;  %v241_v2 = vld [vmem:[%s2452_s10 + $0x18] sm:$0xff] }
  0x80   : > { %v2018_v0 = vpack.c.bf16 %v396_v62, %v392_v61  ;;  %v240_v3 = vld [vmem:[%s2452_s10 + $0x10] sm:$0xff]  ;;  %v243_v4 = vld [vmem:[%s2452_s10 + $0x28] sm:$0xff]  ;;  %v242_v5 = vld [vmem:[%s2452_s10 + $0x20] sm:$0xff] }
  0x81   : > { %1935 = vmatpush1.bf16.msra.mxu0 %v1934_v6  ;;  %v245_v6 = vld [vmem:[%s2452_s10 + $0x38] sm:$0xff]  ;;  %v244_v7 = vld [vmem:[%s2452_s10 + $0x30] sm:$0xff]  ;;  %v251_v12 = vld [vmem:[%s2452_s10 + $0x68] sm:$0xff] }
  0x82   : > { %1999 = vmatpush1.bf16.msra.mxu1 %v1998_v8  ;;  %1937 = vmatprep.subr.bf16.mxu0 %v1936_v9  ;;  %v247_v8 = vld [vmem:[%s2452_s10 + $0x48] sm:$0xff]  ;;  %v246_v9 = vld [vmem:[%s2452_s10 + $0x40] sm:$0xff]  ;;  %v249_v10 = vld [vmem:[%s2452_s10 + $0x58] sm:$0xff] }
  0x83   : > { %2001 = vmatprep.subr.bf16.mxu1 %v2000_v13  ;;  %v248_v11 = vld [vmem:[%s2452_s10 + $0x50] sm:$0xff]  ;;  %v250_v13 = vld [vmem:[%s2452_s10 + $0x60] sm:$0xff]  ;;  %v253_v14 = vld [vmem:[%s2452_s10 + $0x78] sm:$0xff] }
  0x84   : > { %v252_v15 = vld [vmem:[%s2452_s10 + $0x70] sm:$0xff]  ;;  %v255_v16 = vld [vmem:[%s2452_s10 + $0x88] sm:$0xff]  ;;  %v254_v17 = vld [vmem:[%s2452_s10 + $0x80] sm:$0xff] }
  0x85   : > { %1939 = vmatpush1.bf16.msra.mxu0 %v1938_v19  ;;  %v257_v18 = vld [vmem:[%s2452_s10 + $0x98] sm:$0xff]  ;;  %v256_v19 = vld [vmem:[%s2452_s10 + $0x90] sm:$0xff]  ;;  %v263_v24 = vld [vmem:[%s2452_s10 + $0xc8] sm:$0xff] }
  0x86   : > { %2003 = vmatpush1.bf16.msra.mxu1 %v2002_v20  ;;  %1941 = vmatprep.subr.bf16.mxu0 %v1940_v21  ;;  %v259_v20 = vld [vmem:[%s2452_s10 + $0xa8] sm:$0xff]  ;;  %v258_v21 = vld [vmem:[%s2452_s10 + $0xa0] sm:$0xff]  ;;  %v261_v22 = vld [vmem:[%s2452_s10 + $0xb8] sm:$0xff] }
  0x87   : > { %2005 = vmatprep.subr.bf16.mxu1 %v2004_v25  ;;  %v260_v23 = vld [vmem:[%s2452_s10 + $0xb0] sm:$0xff]  ;;  %v262_v25 = vld [vmem:[%s2452_s10 + $0xc0] sm:$0xff]  ;;  %v265_v26 = vld [vmem:[%s2452_s10 + $0xd8] sm:$0xff] }
  0x88   : > { %v264_v27 = vld [vmem:[%s2452_s10 + $0xd0] sm:$0xff]  ;;  %v267_v28 = vld [vmem:[%s2452_s10 + $0xe8] sm:$0xff]  ;;  %v266_v29 = vld [vmem:[%s2452_s10 + $0xe0] sm:$0xff] }
  0x89   : > { %1943 = vmatpush1.bf16.msra.mxu0 %v1942_v31  ;;  %v269_v30 = vld [vmem:[%s2452_s10 + $0xf8] sm:$0xff]  ;;  %v268_v31 = vld [vmem:[%s2452_s10 + $0xf0] sm:$0xff] }
  0x8a   : > { %2007 = vmatpush1.bf16.msra.mxu1 %v2006_v32  ;;  %1945 = vmatprep.subr.bf16.mxu0 %v1944_v33 }
  0x8b   : > { %2009 = vmatprep.subr.bf16.mxu1 %v2008_v37 }
  0x8d   : > { %1947 = vmatpush1.bf16.msra.mxu0 %v1946_v43 }
  0x8e   : > { %2011 = vmatpush1.bf16.msra.mxu1 %v2010_v44  ;;  %1949 = vmatprep.subr.bf16.mxu0 %v1948_v45 }
  0x8f   : > { %2013 = vmatprep.subr.bf16.mxu1 %v2012_v49 }
  0x91   : > { %1951 = vmatpush1.bf16.msra.mxu0 %v1950_v55 }
  0x92   : > { %2015 = vmatpush1.bf16.msra.mxu1 %v2014_v56  ;;  %1953 = vmatprep.subr.bf16.mxu0 %v1952_v57 }
  0x93   : > { %2017 = vmatprep.subr.bf16.mxu1 %v2016_v60 }
  0x95   : > { %1955 = vmatpush1.bf16.msra.mxu0 %v1954_v63 }
  0x96   : > { %2019 = vmatpush1.bf16.msra.mxu1 %v2018_v0 }
  0x98   : > { %463 = vmatmul.mubr.f32.vlgmr.msra.gmra.mrb[0].mxu0 %v238_v1 }
  0x99   : > { %624 = vmatmul.mubr.f32.vlgmr.msra.gmra.mrb[0].mxu1 %v238_v1  ;;  %468 = vmatprep.mubr.f32.mxu0 %v241_v2 }
  0x9a   : > { %629 = vmatprep.mubr.f32.mxu1 %v241_v2 }
  0x9c   : > { %469 = vmatmul.mubr.f32.gmra.mrb[2].mxu0 %v240_v3 }
  0x9d   : > { %630 = vmatmul.mubr.f32.gmra.mrb[2].mxu1 %v240_v3  ;;  %474 = vmatprep.mubr.f32.mxu0 %v243_v4 }
  0x9e   : > { %635 = vmatprep.mubr.f32.mxu1 %v243_v4 }
  0xa0   : > { %475 = vmatmul.mubr.f32.gmra.mrb[4].mxu0 %v242_v5 }
  0xa1   : > { %480 = vmatprep.mubr.f32.mxu0 %v245_v6  ;;  %636 = vmatmul.mubr.f32.gmra.mrb[4].mxu1 %v242_v5 }
  0xa2   : > { %641 = vmatprep.mubr.f32.mxu1 %v245_v6 }
  0xa4   : > { %481 = vmatmul.mubr.f32.gmra.mrb[6].mxu0 %v244_v7 }
  0xa5   : > { %642 = vmatmul.mubr.f32.gmra.mrb[6].mxu1 %v244_v7  ;;  %486 = vmatprep.mubr.f32.mxu0 %v247_v8 }
  0xa6   : > { %647 = vmatprep.mubr.f32.mxu1 %v247_v8 }
  0xa8   : > { %487 = vmatmul.mubr.f32.gmra.mrb[8].mxu0 %v246_v9 }
  0xa9   : > { %492 = vmatprep.mubr.f32.mxu0 %v249_v10  ;;  %648 = vmatmul.mubr.f32.gmra.mrb[8].mxu1 %v246_v9 }
  0xaa   : > { %653 = vmatprep.mubr.f32.mxu1 %v249_v10 }
  0xac   : > { %493 = vmatmul.mubr.f32.gmra.mrb[10].mxu0 %v248_v11 }
  0xad   : > { %654 = vmatmul.mubr.f32.gmra.mrb[10].mxu1 %v248_v11  ;;  %498 = vmatprep.mubr.f32.mxu0 %v251_v12 }
  0xae   : > { %659 = vmatprep.mubr.f32.mxu1 %v251_v12 }
  0xb0   : > { %499 = vmatmul.mubr.f32.gmra.mrb[12].mxu0 %v250_v13 }
  0xb1   : > { %504 = vmatprep.mubr.f32.mxu0 %v253_v14  ;;  %660 = vmatmul.mubr.f32.gmra.mrb[12].mxu1 %v250_v13 }
  0xb2   : > { %665 = vmatprep.mubr.f32.mxu1 %v253_v14 }
  0xb4   : > { %505 = vmatmul.mubr.f32.gmra.mrb[14].mxu0 %v252_v15 }
  0xb5   : > { %666 = vmatmul.mubr.f32.gmra.mrb[14].mxu1 %v252_v15  ;;  %510 = vmatprep.mubr.f32.mxu0 %v255_v16 }
  0xb6   : > { %671 = vmatprep.mubr.f32.mxu1 %v255_v16 }
  0xb8   : > { %511 = vmatmul.mubr.f32.gmra.mrb[16].mxu0 %v254_v17 }
  0xb9   : > { %516 = vmatprep.mubr.f32.mxu0 %v257_v18  ;;  %672 = vmatmul.mubr.f32.gmra.mrb[16].mxu1 %v254_v17 }
  0xba   : > { %677 = vmatprep.mubr.f32.mxu1 %v257_v18 }
  0xbc   : > { %517 = vmatmul.mubr.f32.gmra.mrb[18].mxu0 %v256_v19 }
  0xbd   : > { %678 = vmatmul.mubr.f32.gmra.mrb[18].mxu1 %v256_v19  ;;  %522 = vmatprep.mubr.f32.mxu0 %v259_v20 }
  0xbe   : > { %683 = vmatprep.mubr.f32.mxu1 %v259_v20 }
  0xc0   : > { %523 = vmatmul.mubr.f32.gmra.mrb[20].mxu0 %v258_v21 }
  0xc1   : > { %528 = vmatprep.mubr.f32.mxu0 %v261_v22  ;;  %684 = vmatmul.mubr.f32.gmra.mrb[20].mxu1 %v258_v21 }
  0xc2   : > { %689 = vmatprep.mubr.f32.mxu1 %v261_v22 }
  0xc4   : > { %529 = vmatmul.mubr.f32.gmra.mrb[22].mxu0 %v260_v23 }
  0xc5   : > { %690 = vmatmul.mubr.f32.gmra.mrb[22].mxu1 %v260_v23  ;;  %534 = vmatprep.mubr.f32.mxu0 %v263_v24 }
  0xc6   : > { %695 = vmatprep.mubr.f32.mxu1 %v263_v24 }
  0xc8   : > { %535 = vmatmul.mubr.f32.gmra.mrb[24].mxu0 %v262_v25 }
  0xc9   : > { %540 = vmatprep.mubr.f32.mxu0 %v265_v26  ;;  %696 = vmatmul.mubr.f32.gmra.mrb[24].mxu1 %v262_v25 }
  0xca   : > { %701 = vmatprep.mubr.f32.mxu1 %v265_v26 }
  0xcc   : > { %541 = vmatmul.mubr.f32.gmra.mrb[26].mxu0 %v264_v27 }
  0xcd   : > { %702 = vmatmul.mubr.f32.gmra.mrb[26].mxu1 %v264_v27  ;;  %546 = vmatprep.mubr.f32.mxu0 %v267_v28 }
  0xce   : > { %707 = vmatprep.mubr.f32.mxu1 %v267_v28 }
  0xd0   : > { %547 = vmatmul.mubr.f32.gmra.mrb[28].mxu0 %v266_v29 }
  0xd1   : > { %708 = vmatmul.mubr.f32.gmra.mrb[28].mxu1 %v266_v29  ;;  %552 = vmatprep.mubr.f32.mxu0 %v269_v30 }
  0xd2   : > { %713 = vmatprep.mubr.f32.mxu1 %v269_v30 }
  0xd4   : > { %553 = vmatmul.mubr.f32.gmra.mrb[30].mxu0 %v268_v31 }
  0xd5   : > { %714 = vmatmul.mubr.f32.gmra.mrb[30].mxu1 %v268_v31 }
 0x16b   : > { %v2494_v32 = vpop.f32.mrb[0].mxu0 }
 0x16c   : > { %v2496_v33 = vpop.f32.mrb[0].mxu1  ;;  %722 = vadd.xlane.f32.xlu0 %v2494_v32  ;;  %v2499_v34 = vpop.f32.mrb[1].mxu0  ;;  %v770_v48 = vmul.f32 %v2494_v32, %v2494_v32 }
 0x16d   : > { %v2501_v35 = vpop.f32.mrb[1].mxu1  ;;  %v1294_v54 = vmul.f32 %v2496_v33, %v2496_v33  ;;  %v1038_v60 = vmul.f32 %v2499_v34, %v2499_v34 }
 0x16e   : > { %v1551_v2 = vmul.f32 %v2501_v35, %v2501_v35 }
 0x16f   : > { %v2503_v36 = vpop.f32.mrb[2].mxu0 }
 0x170   : > { %v2505_v37 = vpop.f32.mrb[2].mxu1  ;;  %1246 = vadd.xlane.f32.xlu0 %v2496_v33  ;;  %v2508_v38 = vpop.f32.mrb[3].mxu0  ;;  %v771_v49 = vmul.f32 %v2503_v36, %v2503_v36 }
 0x171   : > { %1248 = vadd.xlane.f32.xlu1 %v2505_v37  ;;  %v2511_v39 = vpop.f32.mrb[3].mxu1  ;;  %v1295_v55 = vmul.f32 %v2505_v37, %v2505_v37  ;;  %v1039_v61 = vmul.f32 %v2508_v38, %v2508_v38 }
 0x172   : > { %v1552_v3 = vmul.f32 %v2511_v39, %v2511_v39 }
 0x173   : > { %v2513_v40 = vpop.f32.mrb[4].mxu0 }
 0x174   : > { %990 = vadd.xlane.f32.xlu0 %v2499_v34  ;;  %v2516_v41 = vpop.f32.mrb[5].mxu0  ;;  %v2518_v42 = vpop.f32.mrb[4].mxu1  ;;  %v772_v24 = vmul.f32 %v2513_v40, %v2513_v40 }
 0x175   : > { %992 = vadd.xlane.f32.xlu1 %v2508_v38  ;;  %v2521_v43 = vpop.f32.mrb[5].mxu1  ;;  %v1296_v25 = vmul.f32 %v2518_v42, %v2518_v42  ;;  %v1040_v27 = vmul.f32 %v2516_v41, %v2516_v41 }
 0x176   : > { %v1553_v29 = vmul.f32 %v2521_v43, %v2521_v43 }
 0x177   : > { %v2523_v44 = vpop.f32.mrb[6].mxu0 }
 0x178   : > { %1503 = vadd.xlane.f32.xlu0 %v2501_v35  ;;  %v2526_v45 = vpop.f32.mrb[7].mxu0  ;;  %v2528_v46 = vpop.f32.mrb[6].mxu1  ;;  %v773_v26 = vmul.f32 %v2523_v44, %v2523_v44 }
 0x179   : > { %1505 = vadd.xlane.f32.xlu1 %v2511_v39  ;;  %v2531_v47 = vpop.f32.mrb[7].mxu1  ;;  %v1297_v28 = vmul.f32 %v2528_v46, %v2528_v46  ;;  %v1041_v30 = vmul.f32 %v2526_v45, %v2526_v45 }
 0x17a   : > { %v1554_v31 = vmul.f32 %v2531_v47, %v2531_v47 }
 0x17b   : > { %v2537_v50 = vpop.f32.mrb[8].mxu0 }
 0x17c   : > { %786 = vadd.xlane.f32.xlu0 %v770_v48  ;;  %v2539_v51 = vpop.f32.mrb[9].mxu0  ;;  %v2541_v52 = vpop.f32.mrb[8].mxu1 }
 0x17d   : > { %3473 = vst [vmem:[#allocation8_spill] sm:$0xff] %v2539_v51  ;;  %3474 = vst [vmem:[#allocation9_spill] sm:$0xff] %v2541_v52  ;;  %788 = vadd.xlane.f32.xlu1 %v771_v49  ;;  %v2543_v53 = vpop.f32.mrb[9].mxu1 }
 0x17e   : > { %3475 = vst [vmem:[#allocation10_spill] sm:$0xff] %v2543_v53 }
 0x17f   : > { %v2549_v56 = vpop.f32.mrb[10].mxu0 }
 0x180   : > { %3476 = vst [vmem:[#allocation11_spill] sm:$0xff] %v2549_v56  ;;  %1310 = vadd.xlane.f32.xlu0 %v1294_v54  ;;  %v2551_v57 = vpop.f32.mrb[11].mxu0  ;;  %v2553_v58 = vpop.f32.mrb[10].mxu1 }
 0x181   : > { %3477 = vst [vmem:[#allocation12_spill] sm:$0xff] %v2551_v57  ;;  %3478 = vst [vmem:[#allocation13_spill] sm:$0xff] %v2553_v58  ;;  %1312 = vadd.xlane.f32.xlu1 %v1295_v55  ;;  %v2555_v59 = vpop.f32.mrb[11].mxu1 }
 0x182   : > { %3479 = vst [vmem:[#allocation14_spill] sm:$0xff] %v2555_v59 }
 0x183   : > { %v2561_v62 = vpop.f32.mrb[12].mxu0 }
 0x184   : > { %3480 = vst [vmem:[#allocation15_spill] sm:$0xff] %v2561_v62  ;;  %1054 = vadd.xlane.f32.xlu0 %v1038_v60  ;;  %v2563_v63 = vpop.f32.mrb[13].mxu0  ;;  %v2565_v0 = vpop.f32.mrb[12].mxu1 }
 0x185   : > { %3481 = vst [vmem:[#allocation16_spill] sm:$0xff] %v2563_v63  ;;  %3482 = vst [vmem:[#allocation17_spill] sm:$0xff] %v2565_v0  ;;  %1056 = vadd.xlane.f32.xlu1 %v1039_v61  ;;  %v2567_v1 = vpop.f32.mrb[13].mxu1 }
 0x186   : > { %3483 = vst [vmem:[#allocation18_spill] sm:$0xff] %v2567_v1 }
 0x187   : > { %v2573_v4 = vpop.f32.mrb[14].mxu0 }
 0x188   : > { %3484 = vst [vmem:[#allocation19_spill] sm:$0xff] %v2573_v4  ;;  %1567 = vadd.xlane.f32.xlu0 %v1551_v2  ;;  %v2575_v5 = vpop.f32.mrb[15].mxu0  ;;  %v2577_v6 = vpop.f32.mrb[14].mxu1 }
 0x189   : > { %3485 = vst [vmem:[#allocation20_spill] sm:$0xff] %v2575_v5  ;;  %3486 = vst [vmem:[#allocation21_spill] sm:$0xff] %v2577_v6  ;;  %1569 = vadd.xlane.f32.xlu1 %v1552_v3  ;;  %v2579_v7 = vpop.f32.mrb[15].mxu1 }
 0x18a   : > { %3487 = vst [vmem:[#allocation22_spill] sm:$0xff] %v2579_v7 }
 0x18b   : > { %v2581_v8 = vpop.f32.mrb[16].mxu0 }
 0x18c   : > { %3488 = vst [vmem:[#allocation23_spill] sm:$0xff] %v2581_v8  ;;  %724 = vadd.xlane.f32.xlu0 %v2503_v36  ;;  %v2584_v9 = vpop.f32.mrb[17].mxu0  ;;  %v2586_v10 = vpop.f32.mrb[16].mxu1 }
 0x18d   : > { %3489 = vst [vmem:[#allocation24_spill] sm:$0xff] %v2584_v9  ;;  %3490 = vst [vmem:[#allocation25_spill] sm:$0xff] %v2586_v10  ;;  %726 = vadd.xlane.f32.xlu1 %v2513_v40  ;;  %v2589_v11 = vpop.f32.mrb[17].mxu1 }
 0x18e   : > { %3491 = vst [vmem:[#allocation26_spill] sm:$0xff] %v2589_v11 }
 0x18f   : > { %v2591_v12 = vpop.f32.mrb[18].mxu0 }
 0x190   : > { %3492 = vst [vmem:[#allocation27_spill] sm:$0xff] %v2591_v12  ;;  %1250 = vadd.xlane.f32.xlu0 %v2518_v42  ;;  %v2594_v13 = vpop.f32.mrb[19].mxu0  ;;  %v2596_v14 = vpop.f32.mrb[18].mxu1 }
 0x191   : > { %3493 = vst [vmem:[#allocation28_spill] sm:$0xff] %v2594_v13  ;;  %3494 = vst [vmem:[#allocation29_spill] sm:$0xff] %v2596_v14  ;;  %728 = vadd.xlane.f32.xlu1 %v2523_v44  ;;  %v2599_v15 = vpop.f32.mrb[19].mxu1 }
 0x192   : > { %3495 = vst [vmem:[#allocation30_spill] sm:$0xff] %v2599_v15 }
 0x193   : > { %v2601_v16 = vpop.f32.mrb[20].mxu0 }
 0x194   : > { %994 = vadd.xlane.f32.xlu0 %v2516_v41  ;;  %v2604_v17 = vpop.f32.mrb[21].mxu0  ;;  %v2606_v18 = vpop.f32.mrb[20].mxu1 }
 0x195   : > { %1252 = vadd.xlane.f32.xlu1 %v2528_v46  ;;  %v2609_v19 = vpop.f32.mrb[21].mxu1 }
 0x197   : > { %v2611_v20 = vpop.f32.mrb[22].mxu0 }
 0x198   : > { %1507 = vadd.xlane.f32.xlu0 %v2521_v43  ;;  %v2614_v21 = vpop.f32.mrb[23].mxu0  ;;  %v2616_v22 = vpop.f32.mrb[22].mxu1 }
 0x199   : > { %996 = vadd.xlane.f32.xlu1 %v2526_v45  ;;  %v2619_v23 = vpop.f32.mrb[23].mxu1 }
 0x19b   : > { %v2638_v48 = vpop.f32.mrb[24].mxu0 }
 0x19c   : > { %790 = vadd.xlane.f32.xlu0 %v772_v24  ;;  %v2641_v49 = vpop.f32.mrb[25].mxu0  ;;  %v2645_v55 = vpop.f32.mrb[24].mxu1  ;;  %v774_v24 = vmul.f32 %v2537_v50, %v2537_v50 }
 0x19d   : > { %1509 = vadd.xlane.f32.xlu1 %v2531_v47  ;;  %v2650_v61 = vpop.f32.mrb[25].mxu1 }
 0x19f   : > { %v2643_v54 = vpop.f32.mrb[26].mxu0 }
 0x1a0   : > { %1314 = vadd.xlane.f32.xlu0 %v1296_v25  ;;  %v2648_v60 = vpop.f32.mrb[27].mxu0  ;;  %v2653_v2 = vpop.f32.mrb[26].mxu1  ;;  %v1298_v25 = vmul.f32 %v2541_v52, %v2541_v52 }
 0x1a1   : > { %792 = vadd.xlane.f32.xlu1 %v773_v26  ;;  %v2656_v3 = vpop.f32.mrb[27].mxu1  ;;  %v775_v26 = vmul.f32 %v2549_v56, %v2549_v56 }
 0x1a4   : > { %1058 = vadd.xlane.f32.xlu0 %v1040_v27  ;;  %v1042_v27 = vmul.f32 %v2539_v51, %v2539_v51 }
 0x1a5   : > { %1316 = vadd.xlane.f32.xlu1 %v1297_v28  ;;  %v1299_v28 = vmul.f32 %v2553_v58, %v2553_v58 }
 0x1a8   : > { %1571 = vadd.xlane.f32.xlu0 %v1553_v29  ;;  %v1555_v29 = vmul.f32 %v2543_v53, %v2543_v53 }
 0x1a9   : > { %1060 = vadd.xlane.f32.xlu1 %v1041_v30  ;;  %v1043_v30 = vmul.f32 %v2551_v57, %v2551_v57 }
 0x1ac   : > { %730 = vadd.xlane.f32.xlu0 %v2537_v50 }
 0x1ad   : > { %1573 = vadd.xlane.f32.xlu1 %v1554_v31  ;;  %v1556_v31 = vmul.f32 %v2555_v59, %v2555_v59 }
 0x1b0   : > { %1254 = vadd.xlane.f32.xlu0 %v2541_v52 }
 0x1b1   : > { %732 = vadd.xlane.f32.xlu1 %v2549_v56 }
 0x1b4   : > { %998 = vadd.xlane.f32.xlu0 %v2539_v51  ;;  %v1301_v51 = vmul.f32 %v2577_v6, %v2577_v6 }
 0x1b5   : > { %1256 = vadd.xlane.f32.xlu1 %v2553_v58  ;;  %v1044_v58 = vmul.f32 %v2563_v63, %v2563_v63 }
 0x1b8   : > { %1511 = vadd.xlane.f32.xlu0 %v2543_v53  ;;  %v777_v53 = vmul.f32 %v2573_v4, %v2573_v4 }
 0x1b9   : > { %1000 = vadd.xlane.f32.xlu1 %v2551_v57  ;;  %v1300_v57 = vmul.f32 %v2565_v0, %v2565_v0 }
 0x1bc   : > { %794 = vadd.xlane.f32.xlu0 %v774_v24  ;;  %v2678_v24 = vpop.f32.mrb[28].mxu0 }
 0x1bd   : > { %1513 = vadd.xlane.f32.xlu1 %v2555_v59 }
 0x1c0   : > { %1318 = vadd.xlane.f32.xlu0 %v1298_v25  ;;  %v2681_v25 = vpop.f32.mrb[29].mxu0 }
 0x1c1   : > { %796 = vadd.xlane.f32.xlu1 %v775_v26  ;;  %v2683_v26 = vpop.f32.mrb[30].mxu0 }
 0x1c4   : > { %1062 = vadd.xlane.f32.xlu0 %v1042_v27  ;;  %v2685_v27 = vpop.f32.mrb[28].mxu1 }
 0x1c5   : > { %1320 = vadd.xlane.f32.xlu1 %v1299_v28  ;;  %v2688_v28 = vpop.f32.mrb[31].mxu0 }
 0x1c8   : > { %1575 = vadd.xlane.f32.xlu0 %v1555_v29  ;;  %v2690_v29 = vpop.f32.mrb[29].mxu1 }
 0x1c9   : > { %1064 = vadd.xlane.f32.xlu1 %v1043_v30  ;;  %v2693_v30 = vpop.f32.mrb[30].mxu1 }
 0x1ca   : > { %v2696_v59 = vpop.f32.mrb[31].mxu1 }
 0x1cb   : > { %3496 = vst [vmem:[#allocation31_spill] sm:$0xff] %v2696_v59 }
 0x1cc   : > { %734 = vadd.xlane.f32.xlu0 %v2561_v62 }
 0x1cd   : > { %1577 = vadd.xlane.f32.xlu1 %v1556_v31  ;;  %v776_v31 = vmul.f32 %v2561_v62, %v2561_v62  ;;  %v1045_v62 = vmul.f32 %v2575_v5, %v2575_v5 }
 0x1d0   : > { %1258 = vadd.xlane.f32.xlu0 %v2565_v0 }
 0x1d1   : > { %736 = vadd.xlane.f32.xlu1 %v2573_v4 }
 0x1d4   : > { %1002 = vadd.xlane.f32.xlu0 %v2563_v63 }
 0x1d5   : > { %1260 = vadd.xlane.f32.xlu1 %v2577_v6 }
 0x1d8   : > { %1515 = vadd.xlane.f32.xlu0 %v2567_v1 }
 0x1d9   : > { %1004 = vadd.xlane.f32.xlu1 %v2575_v5 }
 0x1dc   : > { %798 = vadd.xlane.f32.xlu0 %v776_v31  ;;  %v1557_v31 = vmul.f32 %v2567_v1, %v2567_v1  ;;  %v1046_v1 = vmul.f32 %v2584_v9, %v2584_v9 }
 0x1dd   : > { %1517 = vadd.xlane.f32.xlu1 %v2579_v7 }
 0x1e0   : > { %1322 = vadd.xlane.f32.xlu0 %v1300_v57  ;;  %v1558_v57 = vmul.f32 %v2579_v7, %v2579_v7 }
 0x1e1   : > { %800 = vadd.xlane.f32.xlu1 %v777_v53  ;;  %v778_v53 = vmul.f32 %v2581_v8, %v2581_v8 }
 0x1e4   : > { %1066 = vadd.xlane.f32.xlu0 %v1044_v58 }
 0x1e5   : > { %1324 = vadd.xlane.f32.xlu1 %v1301_v51 }
 0x1e8   : > { %1579 = vadd.xlane.f32.xlu0 %v1557_v31  ;;  %v1302_v31 = vmul.f32 %v2586_v10, %v2586_v10 }
 0x1e9   : > { %1068 = vadd.xlane.f32.xlu1 %v1045_v62 }
 0x1ec   : > { %738 = vadd.xlane.f32.xlu0 %v2581_v8 }
 0x1ed   : > { %1581 = vadd.xlane.f32.xlu1 %v1558_v57  ;;  %v779_v57 = vmul.f32 %v2591_v12, %v2591_v12 }
 0x1f0   : > { %1262 = vadd.xlane.f32.xlu0 %v2586_v10  ;;  %v1559_v10 = vmul.f32 %v2589_v11, %v2589_v11 }
 0x1f1   : > { %740 = vadd.xlane.f32.xlu1 %v2591_v12  ;;  %v1047_v12 = vmul.f32 %v2594_v13, %v2594_v13 }
 0x1f4   : > { %1006 = vadd.xlane.f32.xlu0 %v2584_v9 }
 0x1f5   : > { %1264 = vadd.xlane.f32.xlu1 %v2596_v14 }
 0x1f8   : > { %1519 = vadd.xlane.f32.xlu0 %v2589_v11  ;;  %v1560_v11 = vmul.f32 %v2599_v15, %v2599_v15 }
 0x1f9   : > { %1008 = vadd.xlane.f32.xlu1 %v2594_v13  ;;  %v723_v51 = vpop.xlane.xlu0 %722 }
 0x1fc   : > { %802 = vadd.xlane.f32.xlu0 %v778_v53  ;;  %v1303_v53 = vmul.f32 %v2596_v14, %v2596_v14 }
 0x1fd   : > { %1521 = vadd.xlane.f32.xlu1 %v2599_v15  ;;  %v1247_v58 = vpop.xlane.xlu0 %1246 }
 0x1fe   : > { %v1249_v62 = vpop.xlane.xlu1 %1248  ;;  %v2744_v63 = vmul.f32 0.0078125, %v1247_v58 }
 0x1ff   : > { %v2748_v14 = vmul.f32 0.0078125, %v1249_v62 }
 0x200   : > { %1326 = vadd.xlane.f32.xlu0 %v1302_v31  ;;  %v2740_v31 = vmul.f32 0.0078125, %v723_v51 }
 0x201   : > { %804 = vadd.xlane.f32.xlu1 %v779_v57  ;;  %v991_v7 = vpop.xlane.xlu0 %990  ;;  %v1359_v62 = vmul.f32 %v2748_v14, %v2748_v14 }
 0x202   : > { %v993_v5 = vpop.xlane.xlu1 %992  ;;  %v834_v9 = vmul.f32 %v2740_v31, %v2740_v31  ;;  %v2755_v51 = vmul.f32 0.0078125, %v991_v7 }
 0x203   : > { %v2759_v0 = vmul.f32 0.0078125, %v993_v5 }
 0x204   : > { %1070 = vadd.xlane.f32.xlu0 %v1046_v1 }
 0x205   : > { %1328 = vadd.xlane.f32.xlu1 %v1303_v53  ;;  %v1504_v8 = vpop.xlane.xlu0 %1503 }
 0x206   : > { %v1506_v6 = vpop.xlane.xlu1 %1505 }
 0x207   : > { %v2771_v59 = vmul.f32 0.0078125, %v1506_v6 }
 0x208   : > { %1583 = vadd.xlane.f32.xlu0 %v1559_v10 }
 0x209   : > { %1072 = vadd.xlane.f32.xlu1 %v1047_v12  ;;  %v787_v57 = vpop.xlane.xlu0 %786  ;;  %v1358_v12 = vmul.f32 %v2744_v63, %v2744_v63  ;;  %v1616_v6 = vmul.f32 %v2771_v59, %v2771_v59 }
 0x20a   : > { %v818_v1 = vmul.f32 0.0078125, %v787_v57  ;;  %v2746_v53 = vpop.xlane.xlu1 %788 }
 0x20c   : > { %v850_v13 = vsub.f32 %v818_v1, %v834_v9  ;;  %742 = vadd.xlane.f32.xlu0 %v2601_v16  ;;  %v2767_v1 = vmul.f32 0.0078125, %v1504_v8 }
 0x20d   : > { %1585 = vadd.xlane.f32.xlu1 %v1560_v11  ;;  %v1311_v10 = vpop.xlane.xlu0 %1310 }
 0x20e   : > { %v866_v58 = vadd.f32 1e-05, %v850_v13  ;;  %v1342_v57 = vmul.f32 0.0078125, %v1311_v10  ;;  %v1313_v4 = vpop.xlane.xlu1 %1312  ;;  %v1102_v13 = vmul.f32 %v2755_v51, %v2755_v51 }
 0x20f   : > { %v1343_v56 = vmul.f32 0.0078125, %v1313_v4  ;;  %v1103_v4 = vmul.f32 %v2759_v0, %v2759_v0 }
 0x210   : > { %2074 = vrsqrt.f32 %v866_v58  ;;  %v1374_v9 = vsub.f32 %v1342_v57, %v1358_v12  ;;  %1266 = vadd.xlane.f32.xlu0 %v2606_v18 }
 0x211   : > { %v1375_v11 = vsub.f32 %v1343_v56, %v1359_v62  ;;  %744 = vadd.xlane.f32.xlu1 %v2611_v20  ;;  %v1055_v7 = vpop.xlane.xlu0 %1054  ;;  %v1615_v62 = vmul.f32 %v2767_v1, %v2767_v1 }
 0x212   : > { %v1390_v10 = vadd.f32 1e-05, %v1374_v9  ;;  %v1086_v15 = vmul.f32 0.0078125, %v1055_v7  ;;  %v1057_v5 = vpop.xlane.xlu1 %1056 }
 0x213   : > { %v1391_v12 = vadd.f32 1e-05, %v1375_v11  ;;  %v1087_v58 = vmul.f32 0.0078125, %v1057_v5 }
 0x214   : > { %2076 = vrsqrt.f32 %v1390_v10  ;;  %v1118_v56 = vsub.f32 %v1086_v15, %v1102_v13  ;;  %1010 = vadd.xlane.f32.xlu0 %v2604_v17  ;;  %v898_v10 = vsub.f32 %v2494_v32, %v2740_v31 }
 0x215   : > { %2078 = vrsqrt.f32 %v1391_v12  ;;  %v1119_v57 = vsub.f32 %v1087_v58, %v1103_v4  ;;  %1268 = vadd.xlane.f32.xlu1 %v2616_v22  ;;  %v1568_v8 = vpop.xlane.xlu0 %1567  ;;  %v2789_v58 = vld [vmem:[%s3434_s2] ss:$0 sm:$0xff] }
 0x216   : > { %v1134_v9 = vadd.f32 1e-05, %v1118_v56  ;;  %v1599_v7 = vmul.f32 0.0078125, %v1568_v8  ;;  %v1570_v52 = vpop.xlane.xlu1 %1569  ;;  %v780_v8 = vmul.f32 %v2601_v16, %v2601_v16 }
 0x217   : > { %v1135_v15 = vadd.f32 1e-05, %v1119_v57  ;;  %v1600_v11 = vmul.f32 0.0078125, %v1570_v52 }
 0x218   : > { %2080 = vrsqrt.f32 %v1134_v9  ;;  %v1631_v13 = vsub.f32 %v1599_v7, %v1615_v62  ;;  %1523 = vadd.xlane.f32.xlu0 %v2609_v19  ;;  %v2799_v62 = vld [vmem:[%s3435_s3] ss:$0 sm:$0xff]  ;;  %v819_v9 = vmul.f32 0.0078125, %v2746_v53 }
 0x219   : > { %2082 = vrsqrt.f32 %v1135_v15  ;;  %v1632_v5 = vsub.f32 %v1600_v11, %v1616_v6  ;;  %1012 = vadd.xlane.f32.xlu1 %v2614_v21  ;;  %v725_v4 = vpop.xlane.xlu0 %724  ;;  %v1422_v6 = vsub.f32 %v2496_v33, %v2744_v63  ;;  %v1304_v33 = vmul.f32 %v2606_v18, %v2606_v18 }
 0x21a   : > { %v2075_v12 = vpop.eup %2074  ;;  %v1647_v56 = vadd.f32 1e-05, %v1631_v13  ;;  %v2791_v52 = vmul.f32 0.0078125, %v725_v4  ;;  %v727_v57 = vpop.xlane.xlu1 %726 }
 0x21b   : > { %v914_v32 = vmul.f32 %v2075_v12, %v898_v10  ;;  %v1648_v31 = vadd.f32 1e-05, %v1632_v5  ;;  %v1423_v10 = vsub.f32 %v2505_v37, %v2748_v14  ;;  %v1166_v14 = vsub.f32 %v2499_v34, %v2755_v51 }
 0x21c   : > { %2084 = vrsqrt.f32 %v1647_v56  ;;  %v835_v7 = vmul.f32 %v2791_v52, %v2791_v52  ;;  %806 = vadd.xlane.f32.xlu0 %v780_v8  ;;  %v781_v56 = vmul.f32 %v2611_v20, %v2611_v20 }
 0x21d   : > { %v936_v15 = vmul.f32 %v2789_v58, %v914_v32  ;;  %2086 = vrsqrt.f32 %v1648_v31  ;;  %1525 = vadd.xlane.f32.xlu1 %v2619_v23  ;;  %v1251_v11 = vpop.xlane.xlu0 %1250 }
 0x21e   : > { %v2077_v13 = vpop.eup %2076  ;;  %v851_v53 = vsub.f32 %v819_v9, %v835_v7  ;;  %v729_v5 = vpop.xlane.xlu1 %728  ;;  %v1167_v7 = vsub.f32 %v2508_v38, %v2759_v0  ;;  %v1679_v38 = vsub.f32 %v2501_v35, %v2767_v1  ;;  %v1561_v35 = vmul.f32 %v2609_v19, %v2609_v19 }
 0x21f   : > { %v2079_v63 = vpop.eup %2078  ;;  %v958_v4 = vadd.f32 %v2799_v62, %v936_v15  ;;  %v1438_v12 = vmul.f32 %v2077_v13, %v1422_v6  ;;  %v1048_v13 = vmul.f32 %v2604_v17, %v2604_v17 }
 0x220   : > { %v1439_v8 = vmul.f32 %v2079_v63, %v1423_v10  ;;  %v867_v37 = vadd.f32 1e-05, %v851_v53  ;;  %1330 = vadd.xlane.f32.xlu0 %v1304_v33  ;;  %v1305_v53 = vmul.f32 %v2616_v22, %v2616_v22 }
 0x221   : > { %974 = vst [vmem:[%s2813_s28] sm:$0xff] %v958_v4  ;;  %v1454_v32 = vmul.f32 %v2789_v58, %v1438_v12  ;;  %808 = vadd.xlane.f32.xlu1 %v781_v56  ;;  %v995_v31 = vpop.xlane.xlu0 %994  ;;  %v1680_v56 = vsub.f32 %v2511_v39, %v2771_v59 }
 0x222   : > { %v2081_v9 = vpop.eup %2080  ;;  %v1455_v6 = vmul.f32 %v2789_v58, %v1439_v8  ;;  %2088 = vrsqrt.f32 %v867_v37  ;;  %v1253_v15 = vpop.xlane.xlu1 %1252  ;;  %v2841_v37 = vmul.f32 0.0078125, %v727_v57 }
 0x223   : > { %v2083_v10 = vpop.eup %2082  ;;  %v1470_v34 = vadd.f32 %v2799_v62, %v1454_v32  ;;  %v1182_v51 = vmul.f32 %v2081_v9, %v1166_v14 }
 0x224   : > { %v1471_v33 = vadd.f32 %v2799_v62, %v1455_v6  ;;  %v1183_v63 = vmul.f32 %v2083_v10, %v1167_v7  ;;  %1074 = vadd.xlane.f32.xlu0 %v1048_v13  ;;  %v1049_v7 = vmul.f32 %v2614_v21, %v2614_v21  ;;  %v836_v10 = vmul.f32 %v2841_v37, %v2841_v37 }
 0x225   : > { %1855 = vst [vmem:[%s2813_s28 + $0x10] sm:$0xff] %v1470_v34  ;;  %v1198_v0 = vmul.f32 %v2789_v58, %v1182_v51  ;;  %1332 = vadd.xlane.f32.xlu1 %v1305_v53  ;;  %v1508_v4 = vpop.xlane.xlu0 %1507  ;;  %v2855_v34 = vmul.f32 0.0078125, %v1251_v11 }
 0x226   : > { %v2085_v12 = vpop.eup %2084  ;;  %1856 = vst [vmem:[%s2813_s28 + $0x30] sm:$0xff] %v1471_v33  ;;  %v1199_v8 = vmul.f32 %v2789_v58, %v1183_v63  ;;  %v997_v14 = vpop.xlane.xlu1 %996  ;;  %v899_v63 = vsub.f32 %v2503_v36, %v2791_v52  ;;  %v2870_v36 = vmul.f32 0.0078125, %v995_v31 }
 0x227   : > { %v2087_v1 = vpop.eup %2086  ;;  %v1214_v32 = vadd.f32 %v2799_v62, %v1198_v0  ;;  %v1695_v9 = vmul.f32 %v2085_v12, %v1679_v38  ;;  %v2860_v38 = vmul.f32 0.0078125, %v729_v5  ;;  %v1562_v0 = vmul.f32 %v2619_v23, %v2619_v23 }
 0x228   : > { %v1215_v6 = vadd.f32 %v2799_v62, %v1199_v8  ;;  %v1696_v39 = vmul.f32 %v2087_v1, %v1680_v56  ;;  %1587 = vadd.xlane.f32.xlu0 %v1561_v35  ;;  %v1360_v1 = vmul.f32 %v2855_v34, %v2855_v34 }
 0x229   : > { %1230 = vst [vmem:[%s2813_s28 + $0x8] sm:$0xff] %v1214_v32  ;;  %v1711_v59 = vmul.f32 %v2789_v58, %v1695_v9  ;;  %1076 = vadd.xlane.f32.xlu1 %v1049_v7  ;;  %v791_v57 = vpop.xlane.xlu0 %790  ;;  %v837_v7 = vmul.f32 %v2860_v38, %v2860_v38 }
 0x22a   : > { %1231 = vst [vmem:[%s2813_s28 + $0x28] sm:$0xff] %v1215_v6  ;;  %v1712_v13 = vmul.f32 %v2789_v58, %v1696_v39  ;;  %v820_v51 = vmul.f32 0.0078125, %v791_v57  ;;  %v1510_v53 = vpop.xlane.xlu1 %1509  ;;  %v2875_v6 = vmul.f32 0.0078125, %v1253_v15 }
 0x22b   : > { %v1727_v33 = vadd.f32 %v2799_v62, %v1711_v59 }
 0x22c   : > { %v2089_v12 = vpop.eup %2088  ;;  %v1728_v56 = vadd.f32 %v2799_v62, %v1712_v13  ;;  %v852_v8 = vsub.f32 %v820_v51, %v836_v10  ;;  %746 = vadd.xlane.f32.xlu0 %v2638_v48  ;;  %v1104_v10 = vmul.f32 %v2870_v36, %v2870_v36  ;;  %v2882_v51 = vmul.f32 0.0078125, %v1508_v4 }
 0x22d   : > { %1871 = vst [vmem:[%s2813_s28 + $0x18] sm:$0xff] %v1727_v33  ;;  %v915_v11 = vmul.f32 %v2089_v12, %v899_v63  ;;  %1589 = vadd.xlane.f32.xlu1 %v1562_v0  ;;  %v1315_v35 = vpop.xlane.xlu0 %1314  ;;  %v1361_v0 = vmul.f32 %v2875_v6, %v2875_v6  ;;  %v2887_v12 = vmul.f32 0.0078125, %v997_v14 }
 0x22e   : > { %1872 = vst [vmem:[%s2813_s28 + $0x38] sm:$0xff] %v1728_v56  ;;  %v868_v52 = vadd.f32 1e-05, %v852_v8  ;;  %v1344_v5 = vmul.f32 0.0078125, %v1315_v35  ;;  %v793_v32 = vpop.xlane.xlu1 %792 }
 0x22f   : > { %v937_v9 = vmul.f32 %v2789_v58, %v915_v11  ;;  %v821_v39 = vmul.f32 0.0078125, %v793_v32  ;;  %v1105_v14 = vmul.f32 %v2887_v12, %v2887_v12 }
 0x230   : > { %2090 = vrsqrt.f32 %v868_v52  ;;  %v1376_v59 = vsub.f32 %v1344_v5, %v1360_v1  ;;  %1270 = vadd.xlane.f32.xlu0 %v2645_v55  ;;  %v1617_v1 = vmul.f32 %v2882_v51, %v2882_v51 }
 0x231   : > { %v959_v57 = vadd.f32 %v2799_v62, %v937_v9  ;;  %v853_v31 = vsub.f32 %v821_v39, %v837_v7  ;;  %748 = vadd.xlane.f32.xlu1 %v2643_v54  ;;  %v1059_v13 = vpop.xlane.xlu0 %1058  ;;  %v2895_v9 = vmul.f32 0.0078125, %v1510_v53 }
 0x232   : > { %v1392_v33 = vadd.f32 1e-05, %v1376_v59  ;;  %v1088_v63 = vmul.f32 0.0078125, %v1059_v13  ;;  %v1317_v15 = vpop.xlane.xlu1 %1316 }
 0x233   : > { %975 = vst [vmem:[%s2813_s28 + $0x20] sm:$0xff] %v959_v57  ;;  %v869_v56 = vadd.f32 1e-05, %v853_v31  ;;  %v1345_v8 = vmul.f32 0.0078125, %v1317_v15  ;;  %v900_v57 = vsub.f32 %v2513_v40, %v2841_v37  ;;  %v1424_v40 = vsub.f32 %v2518_v42, %v2855_v34 }
 0x234   : > { %2092 = vrsqrt.f32 %v1392_v33  ;;  %v1120_v11 = vsub.f32 %v1088_v63, %v1104_v10  ;;  %1014 = vadd.xlane.f32.xlu0 %v2641_v49  ;;  %v782_v33 = vmul.f32 %v2638_v48, %v2638_v48  ;;  %v783_v34 = vmul.f32 %v2643_v54, %v2643_v54 }
 0x235   : > { %2094 = vrsqrt.f32 %v869_v56  ;;  %v1377_v35 = vsub.f32 %v1345_v8, %v1361_v0  ;;  %1272 = vadd.xlane.f32.xlu1 %v2653_v2  ;;  %v1572_v4 = vpop.xlane.xlu0 %1571  ;;  %v1618_v0 = vmul.f32 %v2895_v9, %v2895_v9 }
 0x236   : > { %v1136_v52 = vadd.f32 1e-05, %v1120_v11  ;;  %v1601_v5 = vmul.f32 0.0078125, %v1572_v4  ;;  %v1061_v32 = vpop.xlane.xlu1 %1060 }
 0x237   : > { %v1393_v7 = vadd.f32 1e-05, %v1377_v35  ;;  %v1089_v39 = vmul.f32 0.0078125, %v1061_v32 }
 0x238   : > { %2096 = vrsqrt.f32 %v1136_v52  ;;  %v1633_v59 = vsub.f32 %v1601_v5, %v1617_v1  ;;  %1527 = vadd.xlane.f32.xlu0 %v2650_v61  ;;  %v901_v1 = vsub.f32 %v2523_v44, %v2860_v38  ;;  %v1306_v52 = vmul.f32 %v2645_v55, %v2645_v55 }
 0x239   : > { %2098 = vrsqrt.f32 %v1393_v7  ;;  %v1121_v31 = vsub.f32 %v1089_v39, %v1105_v14  ;;  %1016 = vadd.xlane.f32.xlu1 %v2648_v60  ;;  %v731_v13 = vpop.xlane.xlu0 %730 }
 0x23a   : > { %v2091_v10 = vpop.eup %2090  ;;  %v1649_v53 = vadd.f32 1e-05, %v1633_v59  ;;  %v1574_v63 = vpop.xlane.xlu1 %1573  ;;  %v1168_v59 = vsub.f32 %v2516_v41, %v2870_v36 }
 0x23b   : > { %v916_v15 = vmul.f32 %v2091_v10, %v900_v57  ;;  %v1137_v56 = vadd.f32 1e-05, %v1121_v31  ;;  %v1602_v8 = vmul.f32 0.0078125, %v1574_v63  ;;  %v1425_v31 = vsub.f32 %v2528_v46, %v2875_v6 }
 0x23c   : > { %2100 = vrsqrt.f32 %v1649_v53  ;;  %810 = vadd.xlane.f32.xlu0 %v782_v33  ;;  %v1050_v10 = vmul.f32 %v2641_v49, %v2641_v49  ;;  %v1681_v46 = vsub.f32 %v2521_v43, %v2882_v51 }
 0x23d   : > { %v938_v37 = vmul.f32 %v2789_v58, %v916_v15  ;;  %2102 = vrsqrt.f32 %v1137_v56  ;;  %v1634_v11 = vsub.f32 %v1602_v8, %v1618_v0  ;;  %1529 = vadd.xlane.f32.xlu1 %v2656_v3  ;;  %v1255_v35 = vpop.xlane.xlu0 %1254  ;;  %v1307_v15 = vmul.f32 %v2653_v2, %v2653_v2 }
 0x23e   : > { %v2093_v4 = vpop.eup %2092  ;;  %v733_v5 = vpop.xlane.xlu1 %732 }
 0x23f   : > { %v2095_v32 = vpop.eup %2094  ;;  %v960_v14 = vadd.f32 %v2799_v62, %v938_v37  ;;  %v1440_v42 = vmul.f32 %v2093_v4, %v1424_v40  ;;  %v1650_v7 = vadd.f32 1e-05, %v1634_v11  ;;  %v1169_v37 = vsub.f32 %v2526_v45, %v2887_v12 }
 0x240   : > { %v917_v39 = vmul.f32 %v2095_v32, %v901_v1  ;;  %1334 = vadd.xlane.f32.xlu0 %v1306_v52  ;;  %v1563_v11 = vmul.f32 %v2650_v61, %v2650_v61  ;;  %v2939_v1 = vmul.f32 0.0078125, %v731_v13  ;;  %v1051_v52 = vmul.f32 %v2648_v60, %v2648_v60 }
 0x241   : > { %976 = vst [vmem:[%s2813_s28 + $0x40] sm:$0xff] %v960_v14  ;;  %v1456_v44 = vmul.f32 %v2789_v58, %v1440_v42  ;;  %2104 = vrsqrt.f32 %v1650_v7  ;;  %812 = vadd.xlane.f32.xlu1 %v783_v34  ;;  %v999_v38 = vpop.xlane.xlu0 %998  ;;  %v2947_v34 = vmul.f32 0.0078125, %v1255_v35  ;;  %v1682_v7 = vsub.f32 %v2531_v47, %v2895_v9 }
 0x242   : > { %v2097_v57 = vpop.eup %2096  ;;  %v939_v33 = vmul.f32 %v2789_v58, %v917_v39  ;;  %v1257_v53 = vpop.xlane.xlu1 %1256  ;;  %v1564_v35 = vmul.f32 %v2656_v3, %v2656_v3 }
 0x243   : > { %v2099_v63 = vpop.eup %2098  ;;  %v1472_v41 = vadd.f32 %v2799_v62, %v1456_v44  ;;  %v1184_v36 = vmul.f32 %v2097_v57, %v1168_v59  ;;  %v838_v59 = vmul.f32 %v2939_v1, %v2939_v1 }
 0x244   : > { %v961_v0 = vadd.f32 %v2799_v62, %v939_v33  ;;  %v1441_v56 = vmul.f32 %v2099_v63, %v1425_v31  ;;  %1078 = vadd.xlane.f32.xlu0 %v1050_v10  ;;  %v2958_v33 = vmul.f32 0.0078125, %v733_v5 }
 0x245   : > { %1857 = vst [vmem:[%s2813_s28 + $0x50] sm:$0xff] %v1472_v41  ;;  %v1200_v6 = vmul.f32 %v2789_v58, %v1184_v36  ;;  %1336 = vadd.xlane.f32.xlu1 %v1307_v15  ;;  %v1512_v8 = vpop.xlane.xlu0 %1511  ;;  %v1362_v41 = vmul.f32 %v2947_v34, %v2947_v34 }
 0x246   : > { %v2101_v40 = vpop.eup %2100  ;;  %977 = vst [vmem:[%s2813_s28 + $0x60] sm:$0xff] %v961_v0  ;;  %v1457_v4 = vmul.f32 %v2789_v58, %v1441_v56  ;;  %v1001_v43 = vpop.xlane.xlu1 %1000  ;;  %v2967_v0 = vmul.f32 0.0078125, %v999_v38 }
 0x247   : > { %v2103_v51 = vpop.eup %2102  ;;  %v1216_v32 = vadd.f32 %v2799_v62, %v1200_v6  ;;  %v1697_v14 = vmul.f32 %v2101_v40, %v1681_v46  ;;  %v839_v6 = vmul.f32 %v2958_v33, %v2958_v33  ;;  %v2971_v40 = vmul.f32 0.0078125, %v1257_v53 }
 0x248   : > { %v1473_v42 = vadd.f32 %v2799_v62, %v1457_v4  ;;  %v1185_v45 = vmul.f32 %v2103_v51, %v1169_v37  ;;  %1591 = vadd.xlane.f32.xlu0 %v1563_v11 }
 0x249   : > { %1232 = vst [vmem:[%s2813_s28 + $0x48] sm:$0xff] %v1216_v32  ;;  %v1713_v12 = vmul.f32 %v2789_v58, %v1697_v14  ;;  %1080 = vadd.xlane.f32.xlu1 %v1051_v52  ;;  %v795_v13 = vpop.xlane.xlu0 %794  ;;  %v1106_v52 = vmul.f32 %v2967_v0, %v2967_v0  ;;  %v2979_v32 = vmul.f32 0.0078125, %v1512_v8 }
 0x24a   : > { %1858 = vst [vmem:[%s2813_s28 + $0x70] sm:$0xff] %v1473_v42  ;;  %v1201_v39 = vmul.f32 %v2789_v58, %v1185_v45  ;;  %v822_v44 = vmul.f32 0.0078125, %v795_v13  ;;  %v1514_v57 = vpop.xlane.xlu1 %1513  ;;  %v1363_v45 = vmul.f32 %v2971_v40, %v2971_v40 }
 0x24b   : > { %v2105_v31 = vpop.eup %2104  ;;  %v1729_v10 = vadd.f32 %v2799_v62, %v1713_v12  ;;  %v2983_v12 = vmul.f32 0.0078125, %v1001_v43 }
 0x24c   : > { %v1217_v63 = vadd.f32 %v2799_v62, %v1201_v39  ;;  %v1698_v47 = vmul.f32 %v2105_v31, %v1682_v7  ;;  %v854_v9 = vsub.f32 %v822_v44, %v838_v59  ;;  %750 = vadd.xlane.f32.xlu0 %v2678_v24  ;;  %v1619_v44 = vmul.f32 %v2979_v32, %v2979_v32 }
 0x24d   : > { %1873 = vst [vmem:[%s2813_s28 + $0x58] sm:$0xff] %v1729_v10  ;;  %1593 = vadd.xlane.f32.xlu1 %v1564_v35  ;;  %v1319_v36 = vpop.xlane.xlu0 %1318  ;;  %v1107_v43 = vmul.f32 %v2983_v12, %v2983_v12 }
 0x24e   : > { %1233 = vst [vmem:[%s2813_s28 + $0x68] sm:$0xff] %v1217_v63  ;;  %v1714_v15 = vmul.f32 %v2789_v58, %v1698_v47  ;;  %v870_v5 = vadd.f32 1e-05, %v854_v9  ;;  %v1346_v56 = vmul.f32 0.0078125, %v1319_v36  ;;  %v797_v46 = vpop.xlane.xlu1 %796  ;;  %v2991_v63 = vmul.f32 0.0078125, %v1514_v57 }
 0x24f   : > { %v823_v37 = vmul.f32 0.0078125, %v797_v46  ;;  %v902_v36 = vsub.f32 %v2537_v50, %v2939_v1  ;;  %v784_v46 = vmul.f32 %v2678_v24, %v2678_v24  ;;  %v3497_v50 = vld [vmem:[#allocation9_spill] sm:$0xff] }
 0x250   : > { %v1730_v11 = vadd.f32 %v2799_v62, %v1714_v15  ;;  %2106 = vrsqrt.f32 %v870_v5  ;;  %v1378_v4 = vsub.f32 %v1346_v56, %v1362_v41  ;;  %1274 = vadd.xlane.f32.xlu0 %v2685_v27  ;;  %v1426_v1 = vsub.f32 %v3497_v50, %v2947_v34 }
 0x251   : > { %v855_v51 = vsub.f32 %v823_v37, %v839_v6  ;;  %752 = vadd.xlane.f32.xlu1 %v2683_v26  ;;  %v1063_v38 = vpop.xlane.xlu0 %1062 }
 0x252   : > { %1874 = vst [vmem:[%s2813_s28 + $0x78] sm:$0xff] %v1730_v11  ;;  %v1394_v14 = vadd.f32 1e-05, %v1378_v4  ;;  %v1090_v53 = vmul.f32 0.0078125, %v1063_v38  ;;  %v1321_v42 = vpop.xlane.xlu1 %1320  ;;  %v1620_v11 = vmul.f32 %v2991_v63, %v2991_v63 }
 0x253   : > { %v871_v13 = vadd.f32 1e-05, %v855_v51  ;;  %v1347_v7 = vmul.f32 0.0078125, %v1321_v42 }
 0x254   : > { %2108 = vrsqrt.f32 %v1394_v14  ;;  %v1122_v39 = vsub.f32 %v1090_v53, %v1106_v52  ;;  %1018 = vadd.xlane.f32.xlu0 %v2681_v25  ;;  %v3498_v14 = vld [vmem:[#allocation31_spill] sm:$0xff] }
 0x255   : > { %2110 = vrsqrt.f32 %v871_v13  ;;  %v1379_v59 = vsub.f32 %v1347_v7, %v1363_v45  ;;  %1276 = vadd.xlane.f32.xlu1 %v2693_v30  ;;  %v1576_v8 = vpop.xlane.xlu0 %1575  ;;  %v3499_v45 = vld [vmem:[#allocation11_spill] sm:$0xff]  ;;  %v1308_v7 = vmul.f32 %v2685_v27, %v2685_v27 }
 0x256   : > { %v1138_v31 = vadd.f32 1e-05, %v1122_v39  ;;  %v1603_v35 = vmul.f32 0.0078125, %v1576_v8  ;;  %v1065_v10 = vpop.xlane.xlu1 %1064  ;;  %v903_v13 = vsub.f32 %v3499_v45, %v2958_v33  ;;  %v1565_v45 = vmul.f32 %v2690_v29, %v2690_v29 }
 0x257   : > { %v1395_v47 = vadd.f32 1e-05, %v1379_v59  ;;  %v1091_v9 = vmul.f32 0.0078125, %v1065_v10  ;;  %v3500_v10 = vld [vmem:[#allocation8_spill] sm:$0xff] }
 0x258   : > { %2112 = vrsqrt.f32 %v1138_v31  ;;  %v1635_v41 = vsub.f32 %v1603_v35, %v1619_v44  ;;  %1531 = vadd.xlane.f32.xlu0 %v2690_v29  ;;  %v785_v44 = vmul.f32 %v2683_v26, %v2683_v26 }
 0x259   : > { %2114 = vrsqrt.f32 %v1395_v47  ;;  %v1123_v15 = vsub.f32 %v1091_v9, %v1107_v43  ;;  %1020 = vadd.xlane.f32.xlu1 %v2688_v28  ;;  %v735_v5 = vpop.xlane.xlu0 %734  ;;  %v1170_v43 = vsub.f32 %v3500_v10, %v2967_v0 }
 0x25a   : > { %v2107_v56 = vpop.eup %2106  ;;  %v1651_v57 = vadd.f32 1e-05, %v1635_v41  ;;  %v1578_v6 = vpop.xlane.xlu1 %1577  ;;  %v3501_v41 = vld [vmem:[#allocation13_spill] sm:$0xff] }
 0x25b   : > { %v918_v37 = vmul.f32 %v2107_v56, %v902_v36  ;;  %v1139_v4 = vadd.f32 1e-05, %v1123_v15  ;;  %v1604_v51 = vmul.f32 0.0078125, %v1578_v6  ;;  %v1427_v36 = vsub.f32 %v3501_v41, %v2971_v40  ;;  %v3502_v40 = vld [vmem:[#allocation10_spill] sm:$0xff] }
 0x25c   : > { %2116 = vrsqrt.f32 %v1651_v57  ;;  %814 = vadd.xlane.f32.xlu0 %v784_v46  ;;  %v1052_v15 = vmul.f32 %v2681_v25, %v2681_v25 }
 0x25d   : > { %v940_v38 = vmul.f32 %v2789_v58, %v918_v37  ;;  %2118 = vrsqrt.f32 %v1139_v4  ;;  %v1636_v52 = vsub.f32 %v1604_v51, %v1620_v11  ;;  %1533 = vadd.xlane.f32.xlu1 %v3498_v14  ;;  %v1259_v53 = vpop.xlane.xlu0 %1258  ;;  %v1309_v37 = vmul.f32 %v2693_v30, %v2693_v30 }
 0x25e   : > { %v2109_v42 = vpop.eup %2108  ;;  %v737_v39 = vpop.xlane.xlu1 %736  ;;  %v1683_v51 = vsub.f32 %v3502_v40, %v2979_v32  ;;  %v3043_v10 = vmul.f32 0.0078125, %v1259_v53  ;;  %v1566_v53 = vmul.f32 %v3498_v14, %v3498_v14 }
 0x25f   : > { %v2111_v59 = vpop.eup %2110  ;;  %v962_v8 = vadd.f32 %v2799_v62, %v940_v38  ;;  %v1442_v34 = vmul.f32 %v2109_v42, %v1426_v1  ;;  %v1652_v31 = vadd.f32 1e-05, %v1636_v52  ;;  %v3503_v52 = vld [vmem:[#allocation12_spill] sm:$0xff] }
 0x260   : > { %v919_v35 = vmul.f32 %v2111_v59, %v903_v13  ;;  %1338 = vadd.xlane.f32.xlu0 %v1308_v7  ;;  %v1171_v42 = vsub.f32 %v3503_v52, %v2983_v12  ;;  %v3035_v7 = vmul.f32 0.0078125, %v735_v5 }
 0x261   : > { %978 = vst [vmem:[%s2813_s28 + $0x80] sm:$0xff] %v962_v8  ;;  %v1458_v33 = vmul.f32 %v2789_v58, %v1442_v34  ;;  %2120 = vrsqrt.f32 %v1652_v31  ;;  %816 = vadd.xlane.f32.xlu1 %v785_v44  ;;  %v1003_v47 = vpop.xlane.xlu0 %1002  ;;  %v1053_v8 = vmul.f32 %v2688_v28, %v2688_v28 }
 0x262   : > { %v2113_v9 = vpop.eup %2112  ;;  %v941_v56 = vmul.f32 %v2789_v58, %v919_v35  ;;  %v1261_v46 = vpop.xlane.xlu1 %1260  ;;  %v840_v41 = vmul.f32 %v3035_v7, %v3035_v7 }
 0x263   : > { %v2115_v57 = vpop.eup %2114  ;;  %v1474_v0 = vadd.f32 %v2799_v62, %v1458_v33  ;;  %v1186_v6 = vmul.f32 %v2113_v9, %v1170_v43  ;;  %v3504_v43 = vld [vmem:[#allocation14_spill] sm:$0xff] }
 0x264   : > { %v963_v11 = vadd.f32 %v2799_v62, %v941_v56  ;;  %v1443_v4 = vmul.f32 %v2115_v57, %v1427_v36  ;;  %1082 = vadd.xlane.f32.xlu0 %v1052_v15  ;;  %v1684_v33 = vsub.f32 %v3504_v43, %v2991_v63 }
 0x265   : > { %1859 = vst [vmem:[%s2813_s28 + $0x90] sm:$0xff] %v1474_v0  ;;  %v1202_v50 = vmul.f32 %v2789_v58, %v1186_v6  ;;  %1340 = vadd.xlane.f32.xlu1 %v1309_v37  ;;  %v1516_v1 = vpop.xlane.xlu0 %1515  ;;  %v3054_v0 = vmul.f32 0.0078125, %v737_v39 }
 0x266   : > { %v2117_v38 = vpop.eup %2116  ;;  %979 = vst [vmem:[%s2813_s28 + $0xa0] sm:$0xff] %v963_v11  ;;  %v1459_v13 = vmul.f32 %v2789_v58, %v1443_v4  ;;  %v1005_v32 = vpop.xlane.xlu1 %1004  ;;  %v1364_v11 = vmul.f32 %v3043_v10, %v3043_v10 }
 0x267   : > { %v2119_v59 = vpop.eup %2118  ;;  %v1218_v34 = vadd.f32 %v2799_v62, %v1202_v50  ;;  %v1699_v44 = vmul.f32 %v2117_v38, %v1683_v51  ;;  %v3062_v51 = vmul.f32 0.0078125, %v1003_v47  ;;  %v841_v52 = vmul.f32 %v3054_v0, %v3054_v0 }
 0x268   : > { %v1475_v31 = vadd.f32 %v2799_v62, %v1459_v13  ;;  %v1187_v12 = vmul.f32 %v2119_v59, %v1171_v42  ;;  %1595 = vadd.xlane.f32.xlu0 %v1565_v45  ;;  %v3066_v42 = vmul.f32 0.0078125, %v1261_v46 }
 0x269   : > { %1234 = vst [vmem:[%s2813_s28 + $0x88] sm:$0xff] %v1218_v34  ;;  %v1715_v35 = vmul.f32 %v2789_v58, %v1699_v44  ;;  %1084 = vadd.xlane.f32.xlu1 %v1053_v8  ;;  %v799_v5 = vpop.xlane.xlu0 %798  ;;  %v1108_v47 = vmul.f32 %v3062_v51, %v3062_v51  ;;  %v3072_v44 = vmul.f32 0.0078125, %v1516_v1 }
 0x26a   : > { %1860 = vst [vmem:[%s2813_s28 + $0xb0] sm:$0xff] %v1475_v31  ;;  %v1203_v9 = vmul.f32 %v2789_v58, %v1187_v12  ;;  %v824_v36 = vmul.f32 0.0078125, %v799_v5  ;;  %v1518_v15 = vpop.xlane.xlu1 %1517  ;;  %v1365_v46 = vmul.f32 %v3066_v42, %v3066_v42  ;;  %v3076_v5 = vmul.f32 0.0078125, %v1005_v32 }
 0x26b   : > { %v2121_v56 = vpop.eup %2120  ;;  %v1731_v57 = vadd.f32 %v2799_v62, %v1715_v35 }
 0x26c   : > { %v1219_v6 = vadd.f32 %v2799_v62, %v1203_v9  ;;  %v1700_v63 = vmul.f32 %v2121_v56, %v1684_v33  ;;  %v856_v37 = vsub.f32 %v824_v36, %v840_v41  ;;  %v1621_v56 = vmul.f32 %v3072_v44, %v3072_v44 }
 0x26d   : > { %1875 = vst [vmem:[%s2813_s28 + $0x98] sm:$0xff] %v1731_v57  ;;  %1597 = vadd.xlane.f32.xlu1 %v1566_v53  ;;  %v1323_v4 = vpop.xlane.xlu0 %1322 }
 0x26e   : > { %1235 = vst [vmem:[%s2813_s28 + $0xa8] sm:$0xff] %v1219_v6  ;;  %v1716_v40 = vmul.f32 %v2789_v58, %v1700_v63  ;;  %v872_v50 = vadd.f32 1e-05, %v856_v37  ;;  %v1348_v38 = vmul.f32 0.0078125, %v1323_v4  ;;  %v801_v39 = vpop.xlane.xlu1 %800  ;;  %v1109_v6 = vmul.f32 %v3076_v5, %v3076_v5  ;;  %v3505_v4 = vld [vmem:[#allocation15_spill] sm:$0xff] }
 0x26f   : > { %v825_v45 = vmul.f32 0.0078125, %v801_v39  ;;  %v3082_v63 = vmul.f32 0.0078125, %v1518_v15 }
 0x270   : > { %v1732_v13 = vadd.f32 %v2799_v62, %v1716_v40  ;;  %2122 = vrsqrt.f32 %v872_v50  ;;  %v1380_v59 = vsub.f32 %v1348_v38, %v1364_v11  ;;  %v904_v40 = vsub.f32 %v3505_v4, %v3035_v7 }
 0x271   : > { %v857_v8 = vsub.f32 %v825_v45, %v841_v52  ;;  %v1067_v34 = vpop.xlane.xlu0 %1066 }
 0x272   : > { %1876 = vst [vmem:[%s2813_s28 + $0xb8] sm:$0xff] %v1732_v13  ;;  %v1396_v31 = vadd.f32 1e-05, %v1380_v59  ;;  %v1092_v12 = vmul.f32 0.0078125, %v1067_v34  ;;  %v1325_v35 = vpop.xlane.xlu1 %1324  ;;  %v1622_v59 = vmul.f32 %v3082_v63, %v3082_v63  ;;  %v3506_v34 = vld [vmem:[#allocation17_spill] sm:$0xff] }
 0x273   : > { %v873_v43 = vadd.f32 1e-05, %v857_v8  ;;  %v1349_v33 = vmul.f32 0.0078125, %v1325_v35 }
 0x274   : > { %2124 = vrsqrt.f32 %v1396_v31  ;;  %v1124_v9 = vsub.f32 %v1092_v12, %v1108_v47  ;;  %v1428_v47 = vsub.f32 %v3506_v34, %v3043_v10 }
 0x275   : > { %2126 = vrsqrt.f32 %v873_v43  ;;  %v1381_v41 = vsub.f32 %v1349_v33, %v1365_v46  ;;  %v1580_v36 = vpop.xlane.xlu0 %1579  ;;  %v3507_v46 = vld [vmem:[#allocation19_spill] sm:$0xff] }
 0x276   : > { %v1140_v1 = vadd.f32 1e-05, %v1124_v9  ;;  %v1605_v53 = vmul.f32 0.0078125, %v1580_v36  ;;  %v1069_v57 = vpop.xlane.xlu1 %1068  ;;  %v905_v43 = vsub.f32 %v3507_v46, %v3054_v0  ;;  %v3509_v0 = vld [vmem:[#allocation21_spill] sm:$0xff] }
 0x277   : > { %v1397_v32 = vadd.f32 1e-05, %v1381_v41  ;;  %v1093_v37 = vmul.f32 0.0078125, %v1069_v57 }
 0x278   : > { %2128 = vrsqrt.f32 %v1140_v1  ;;  %v1637_v11 = vsub.f32 %v1605_v53, %v1621_v56  ;;  %v3508_v53 = vld [vmem:[#allocation16_spill] sm:$0xff] }
 0x279   : > { %2130 = vrsqrt.f32 %v1397_v32  ;;  %v1125_v50 = vsub.f32 %v1093_v37, %v1109_v6  ;;  %v739_v38 = vpop.xlane.xlu0 %738  ;;  %v1172_v10 = vsub.f32 %v3508_v53, %v3062_v51  ;;  %v1429_v37 = vsub.f32 %v3509_v0, %v3066_v42  ;;  %v3511_v42 = vld [vmem:[#allocation20_spill] sm:$0xff] }
 0x27a   : > { %v2123_v39 = vpop.eup %2122  ;;  %v1653_v52 = vadd.f32 1e-05, %v1637_v11  ;;  %v1582_v45 = vpop.xlane.xlu1 %1581  ;;  %v1173_v34 = vsub.f32 %v3511_v42, %v3076_v5 }
 0x27b   : > { %v920_v13 = vmul.f32 %v2123_v39, %v904_v40  ;;  %v1141_v8 = vadd.f32 1e-05, %v1125_v50  ;;  %v1606_v15 = vmul.f32 0.0078125, %v1582_v45  ;;  %v3510_v45 = vld [vmem:[#allocation18_spill] sm:$0xff] }
 0x27c   : > { %2132 = vrsqrt.f32 %v1653_v52 }
 0x27d   : > { %v942_v31 = vmul.f32 %v2789_v58, %v920_v13  ;;  %2134 = vrsqrt.f32 %v1141_v8  ;;  %v1638_v7 = vsub.f32 %v1606_v15, %v1622_v59  ;;  %v1263_v12 = vpop.xlane.xlu0 %1262  ;;  %v1685_v13 = vsub.f32 %v3510_v45, %v3072_v44 }
 0x27e   : > { %v2125_v35 = vpop.eup %2124  ;;  %v741_v33 = vpop.xlane.xlu1 %740 }
 0x27f   : > { %v2127_v9 = vpop.eup %2126  ;;  %v964_v41 = vadd.f32 %v2799_v62, %v942_v31  ;;  %v1444_v36 = vmul.f32 %v2125_v35, %v1428_v47  ;;  %v1654_v56 = vadd.f32 1e-05, %v1638_v7  ;;  %v3111_v31 = vmul.f32 0.0078125, %v739_v38 }
 0x280   : > { %v921_v1 = vmul.f32 %v2127_v9, %v905_v43 }
 0x281   : > { %980 = vst [vmem:[%s2813_s28 + $0xc0] sm:$0xff] %v964_v41  ;;  %v1460_v57 = vmul.f32 %v2789_v58, %v1444_v36  ;;  %2136 = vrsqrt.f32 %v1654_v56  ;;  %v1007_v6 = vpop.xlane.xlu0 %1006  ;;  %v3117_v36 = vmul.f32 0.0078125, %v1263_v12  ;;  %v3512_v56 = vld [vmem:[#allocation22_spill] sm:$0xff]  ;;  %v842_v53 = vmul.f32 %v3111_v31, %v3111_v31 }
 0x282   : > { %v2129_v32 = vpop.eup %2128  ;;  %v943_v11 = vmul.f32 %v2789_v58, %v921_v1  ;;  %v1265_v4 = vpop.xlane.xlu1 %1264  ;;  %v1686_v38 = vsub.f32 %v3512_v56, %v3082_v63 }
 0x283   : > { %v2131_v40 = vpop.eup %2130  ;;  %v1476_v50 = vadd.f32 %v2799_v62, %v1460_v57  ;;  %v1188_v39 = vmul.f32 %v2129_v32, %v1172_v10  ;;  %v1366_v63 = vmul.f32 %v3117_v36, %v3117_v36 }
 0x284   : > { %v965_v52 = vadd.f32 %v2799_v62, %v943_v11  ;;  %v1445_v51 = vmul.f32 %v2131_v40, %v1429_v37  ;;  %v3126_v37 = vmul.f32 0.0078125, %v741_v33 }
 0x285   : > { %1861 = vst [vmem:[%s2813_s28 + $0xd0] sm:$0xff] %v1476_v50  ;;  %v1204_v59 = vmul.f32 %v2789_v58, %v1188_v39  ;;  %v1520_v8 = vpop.xlane.xlu0 %1519 }
 0x286   : > { %v2133_v15 = vpop.eup %2132  ;;  %981 = vst [vmem:[%s2813_s28 + $0xe0] sm:$0xff] %v965_v52  ;;  %v1461_v47 = vmul.f32 %v2789_v58, %v1445_v51  ;;  %v1009_v7 = vpop.xlane.xlu1 %1008  ;;  %v3134_v52 = vmul.f32 0.0078125, %v1007_v6  ;;  %v843_v33 = vmul.f32 %v3126_v37, %v3126_v37  ;;  %v3144_v6 = vmul.f32 0.0078125, %v1520_v8 }
 0x287   : > { %v2135_v35 = vpop.eup %2134  ;;  %v1220_v46 = vadd.f32 %v2799_v62, %v1204_v59  ;;  %v1701_v43 = vmul.f32 %v2133_v15, %v1685_v13  ;;  %v3138_v59 = vmul.f32 0.0078125, %v1265_v4 }
 0x288   : > { %v1477_v44 = vadd.f32 %v2799_v62, %v1461_v47  ;;  %v1189_v9 = vmul.f32 %v2135_v35, %v1173_v34 }
 0x289   : > { %1236 = vst [vmem:[%s2813_s28 + $0xc8] sm:$0xff] %v1220_v46  ;;  %v1717_v41 = vmul.f32 %v2789_v58, %v1701_v43  ;;  %v803_v5 = vpop.xlane.xlu0 %802  ;;  %v1367_v4 = vmul.f32 %v3138_v59, %v3138_v59 }
 0x28a   : > { %1862 = vst [vmem:[%s2813_s28 + $0xf0] sm:$0xff] %v1477_v44  ;;  %v1205_v1 = vmul.f32 %v2789_v58, %v1189_v9  ;;  %v826_v10 = vmul.f32 0.0078125, %v803_v5  ;;  %v1522_v57 = vpop.xlane.xlu1 %1521  ;;  %v3148_v9 = vmul.f32 0.0078125, %v1009_v7 }
 0x28b   : > { %v2137_v32 = vpop.eup %2136  ;;  %v1733_v0 = vadd.f32 %v2799_v62, %v1717_v41 }
 0x28c   : > { %v1221_v12 = vadd.f32 %v2799_v62, %v1205_v1  ;;  %v1702_v11 = vmul.f32 %v2137_v32, %v1686_v38  ;;  %v858_v40 = vsub.f32 %v826_v10, %v842_v53  ;;  %v1623_v1 = vmul.f32 %v3144_v6, %v3144_v6 }
 0x28d   : > { %1877 = vst [vmem:[%s2813_s28 + $0xd8] sm:$0xff] %v1733_v0  ;;  %v1327_v50 = vpop.xlane.xlu0 %1326  ;;  %v1111_v32 = vmul.f32 %v3148_v9, %v3148_v9  ;;  %v3154_v0 = vmul.f32 0.0078125, %v1522_v57 }
 0x28e   : > { %1237 = vst [vmem:[%s2813_s28 + $0xe8] sm:$0xff] %v1221_v12  ;;  %v1718_v39 = vmul.f32 %v2789_v58, %v1702_v11  ;;  %v874_v51 = vadd.f32 1e-05, %v858_v40  ;;  %v1350_v45 = vmul.f32 0.0078125, %v1327_v50  ;;  %v805_v13 = vpop.xlane.xlu1 %804  ;;  %v1110_v58 = vmul.f32 %v3134_v52, %v3134_v52  ;;  %v3513_v40 = vld [vmem:[#allocation23_spill] sm:$0xff] }
 0x28f   : > { %v827_v15 = vmul.f32 0.0078125, %v805_v13 }
 0x290   : > { %v1734_v42 = vadd.f32 %v2799_v62, %v1718_v39  ;;  %2138 = vrsqrt.f32 %v874_v51  ;;  %v1382_v34 = vsub.f32 %v1350_v45, %v1366_v63  ;;  %v906_v63 = vsub.f32 %v3513_v40, %v3111_v31  ;;  %v3165_v31 = vld [vmem:[%s3434_s2] ss:$0 sm:$0xff] }
 0x291   : > { %v859_v47 = vsub.f32 %v827_v15, %v843_v33  ;;  %v1071_v35 = vpop.xlane.xlu0 %1070  ;;  %v1624_v15 = vmul.f32 %v3154_v0, %v3154_v0 }
 0x292   : > { %1878 = vst [vmem:[%s2813_s28 + $0xf8] sm:$0xff] %v1734_v42  ;;  %v1398_v46 = vadd.f32 1e-05, %v1382_v34  ;;  %v1094_v43 = vmul.f32 0.0078125, %v1071_v35  ;;  %v1329_v44 = vpop.xlane.xlu1 %1328  ;;  %v3514_v34 = vld [vmem:[#allocation25_spill] sm:$0xff] }
 0x293   : > { %v875_v41 = vadd.f32 1e-05, %v859_v47  ;;  %v1351_v62 = vmul.f32 0.0078125, %v1329_v44  ;;  %v1430_v47 = vsub.f32 %v3514_v34, %v3117_v36  ;;  %v3515_v44 = vld [vmem:[#allocation27_spill] sm:$0xff]  ;;  %v3173_v36 = vld [vmem:[%s3435_s3] ss:$0 sm:$0xff] }
 0x294   : > { %2140 = vrsqrt.f32 %v1398_v46  ;;  %v1126_v5 = vsub.f32 %v1094_v43, %v1110_v58 }
 0x295   : > { %2142 = vrsqrt.f32 %v875_v41  ;;  %v1383_v56 = vsub.f32 %v1351_v62, %v1367_v4  ;;  %v1584_v38 = vpop.xlane.xlu0 %1583  ;;  %v907_v4 = vsub.f32 %v3515_v44, %v3126_v37 }
 0x296   : > { %v1142_v8 = vadd.f32 1e-05, %v1126_v5  ;;  %v1607_v53 = vmul.f32 0.0078125, %v1584_v38  ;;  %v1073_v10 = vpop.xlane.xlu1 %1072 }
 0x297   : > { %v1399_v7 = vadd.f32 1e-05, %v1383_v56  ;;  %v1095_v12 = vmul.f32 0.0078125, %v1073_v10 }
 0x298   : > { %2144 = vrsqrt.f32 %v1142_v8  ;;  %v1639_v11 = vsub.f32 %v1607_v53, %v1623_v1  ;;  %v3516_v8 = vld [vmem:[#allocation24_spill] sm:$0xff] }
 0x299   : > { %2146 = vrsqrt.f32 %v1399_v7  ;;  %v1127_v50 = vsub.f32 %v1095_v12, %v1111_v32  ;;  %v743_v39 = vpop.xlane.xlu0 %742  ;;  %v1174_v53 = vsub.f32 %v3516_v8, %v3134_v52  ;;  %v3517_v7 = vld [vmem:[#allocation29_spill] sm:$0xff] }
 0x29a   : > { %v2139_v51 = vpop.eup %2138  ;;  %v1655_v45 = vadd.f32 1e-05, %v1639_v11  ;;  %v1586_v13 = vpop.xlane.xlu1 %1585  ;;  %v1431_v12 = vsub.f32 %v3517_v7, %v3138_v59  ;;  %v3519_v59 = vld [vmem:[#allocation28_spill] sm:$0xff] }
 0x29b   : > { %v922_v33 = vmul.f32 %v2139_v51, %v906_v63  ;;  %v1143_v42 = vadd.f32 1e-05, %v1127_v50  ;;  %v1608_v57 = vmul.f32 0.0078125, %v1586_v13  ;;  %v3518_v13 = vld [vmem:[#allocation26_spill] sm:$0xff]  ;;  %v1175_v34 = vsub.f32 %v3519_v59, %v3148_v9 }
 0x29c   : > { %2148 = vrsqrt.f32 %v1655_v45 }
 0x29d   : > { %v944_v35 = vmul.f32 %v3165_v31, %v922_v33  ;;  %2150 = vrsqrt.f32 %v1143_v42  ;;  %v1640_v58 = vsub.f32 %v1608_v57, %v1624_v15  ;;  %v1267_v46 = vpop.xlane.xlu0 %1266  ;;  %v1687_v33 = vsub.f32 %v3518_v13, %v3144_v6 }
 0x29e   : > { %v2141_v43 = vpop.eup %2140  ;;  %v745_v41 = vpop.xlane.xlu1 %744 }
 0x29f   : > { %v2143_v62 = vpop.eup %2142  ;;  %v966_v5 = vadd.f32 %v3173_v36, %v944_v35  ;;  %v1446_v56 = vmul.f32 %v2141_v43, %v1430_v47  ;;  %v1656_v38 = vadd.f32 1e-05, %v1640_v58  ;;  %v3193_v35 = vmul.f32 0.0078125, %v743_v39 }
 0x2a0   : > { %v923_v1 = vmul.f32 %v2143_v62, %v907_v4 }
 0x2a1   : > { %982 = vst [vmem:[%s2813_s28 + $0x100] sm:$0xff] %v966_v5  ;;  %v1462_v10 = vmul.f32 %v3165_v31, %v1446_v56  ;;  %2152 = vrsqrt.f32 %v1656_v38  ;;  %v1011_v37 = vpop.xlane.xlu0 %1010  ;;  %v3199_v56 = vmul.f32 0.0078125, %v1267_v46  ;;  %v3520_v38 = vld [vmem:[#allocation30_spill] sm:$0xff]  ;;  %v844_v8 = vmul.f32 %v3193_v35, %v3193_v35 }
 0x2a2   : > { %v2145_v32 = vpop.eup %2144  ;;  %v945_v11 = vmul.f32 %v3165_v31, %v923_v1  ;;  %v1269_v40 = vpop.xlane.xlu1 %1268  ;;  %v1688_v39 = vsub.f32 %v3520_v38, %v3154_v0 }
 0x2a3   : > { %v2147_v63 = vpop.eup %2146  ;;  %v1478_v50 = vadd.f32 %v3173_v36, %v1462_v10  ;;  %v1190_v51 = vmul.f32 %v2145_v32, %v1174_v53  ;;  %v1368_v0 = vmul.f32 %v3199_v56, %v3199_v56 }
 0x2a4   : > { %v967_v45 = vadd.f32 %v3173_v36, %v945_v11  ;;  %v1447_v52 = vmul.f32 %v2147_v63, %v1431_v12  ;;  %v3208_v12 = vmul.f32 0.0078125, %v745_v41 }
 0x2a5   : > { %1863 = vst [vmem:[%s2813_s28 + $0x110] sm:$0xff] %v1478_v50  ;;  %v1206_v15 = vmul.f32 %v3165_v31, %v1190_v51  ;;  %v1524_v42 = vpop.xlane.xlu0 %1523 }
 0x2a6   : > { %v2149_v57 = vpop.eup %2148  ;;  %983 = vst [vmem:[%s2813_s28 + $0x120] sm:$0xff] %v967_v45  ;;  %v1463_v47 = vmul.f32 %v3165_v31, %v1447_v52  ;;  %v1013_v58 = vpop.xlane.xlu1 %1012  ;;  %v3216_v45 = vmul.f32 0.0078125, %v1011_v37  ;;  %v845_v41 = vmul.f32 %v3208_v12, %v3208_v12 }
 0x2a7   : > { %v2151_v43 = vpop.eup %2150  ;;  %v1222_v44 = vadd.f32 %v3173_v36, %v1206_v15  ;;  %v1703_v4 = vmul.f32 %v2149_v57, %v1687_v33  ;;  %v3220_v15 = vmul.f32 0.0078125, %v1269_v40 }
 0x2a8   : > { %v1479_v6 = vadd.f32 %v3173_v36, %v1463_v47  ;;  %v1191_v62 = vmul.f32 %v2151_v43, %v1175_v34  ;;  %v1112_v37 = vmul.f32 %v3216_v45, %v3216_v45 }
 0x2a9   : > { %1238 = vst [vmem:[%s2813_s28 + $0x108] sm:$0xff] %v1222_v44  ;;  %v1719_v5 = vmul.f32 %v3165_v31, %v1703_v4  ;;  %v807_v9 = vpop.xlane.xlu0 %806  ;;  %v3226_v44 = vmul.f32 0.0078125, %v1524_v42  ;;  %v1369_v40 = vmul.f32 %v3220_v15, %v3220_v15 }
 0x2aa   : > { %1864 = vst [vmem:[%s2813_s28 + $0x130] sm:$0xff] %v1479_v6  ;;  %v1207_v1 = vmul.f32 %v3165_v31, %v1191_v62  ;;  %v828_v53 = vmul.f32 0.0078125, %v807_v9  ;;  %v1526_v10 = vpop.xlane.xlu1 %1525 }
 0x2ab   : > { %v2153_v32 = vpop.eup %2152  ;;  %v1735_v7 = vadd.f32 %v3173_v36, %v1719_v5  ;;  %v3230_v5 = vmul.f32 0.0078125, %v1013_v58 }
 0x2ac   : > { %v1223_v46 = vadd.f32 %v3173_v36, %v1207_v1  ;;  %v1704_v11 = vmul.f32 %v2153_v32, %v1688_v39  ;;  %v860_v63 = vsub.f32 %v828_v53, %v844_v8  ;;  %v1625_v53 = vmul.f32 %v3226_v44, %v3226_v44 }
 0x2ad   : > { %1879 = vst [vmem:[%s2813_s28 + $0x118] sm:$0xff] %v1735_v7  ;;  %v1331_v50 = vpop.xlane.xlu0 %1330 }
 0x2ae   : > { %1239 = vst [vmem:[%s2813_s28 + $0x128] sm:$0xff] %v1223_v46  ;;  %v1720_v51 = vmul.f32 %v3165_v31, %v1704_v11  ;;  %v876_v52 = vadd.f32 1e-05, %v860_v63  ;;  %v1352_v13 = vmul.f32 0.0078125, %v1331_v50  ;;  %v809_v33 = vpop.xlane.xlu1 %808  ;;  %v1113_v46 = vmul.f32 %v3230_v5, %v3230_v5 }
 0x2af   : > { %v829_v57 = vmul.f32 0.0078125, %v809_v33  ;;  %v3236_v11 = vmul.f32 0.0078125, %v1526_v10  ;;  %v908_v50 = vsub.f32 %v2601_v16, %v3193_v35 }
 0x2b0   : > { %v1736_v59 = vadd.f32 %v3173_v36, %v1720_v51  ;;  %2154 = vrsqrt.f32 %v876_v52  ;;  %v1384_v34 = vsub.f32 %v1352_v13, %v1368_v0 }
 0x2b1   : > { %v861_v47 = vsub.f32 %v829_v57, %v845_v41  ;;  %v1075_v43 = vpop.xlane.xlu0 %1074 }
 0x2b2   : > { %1880 = vst [vmem:[%s2813_s28 + $0x138] sm:$0xff] %v1736_v59  ;;  %v1400_v4 = vadd.f32 1e-05, %v1384_v34  ;;  %v1096_v6 = vmul.f32 0.0078125, %v1075_v43  ;;  %v1333_v62 = vpop.xlane.xlu1 %1332  ;;  %v1626_v59 = vmul.f32 %v3236_v11, %v3236_v11 }
 0x2b3   : > { %v877_v9 = vadd.f32 1e-05, %v861_v47  ;;  %v1353_v38 = vmul.f32 0.0078125, %v1333_v62  ;;  %v1432_v47 = vsub.f32 %v2606_v18, %v3199_v56  ;;  %v1176_v18 = vsub.f32 %v2604_v17, %v3216_v45 }
 0x2b4   : > { %2156 = vrsqrt.f32 %v1400_v4  ;;  %v1128_v39 = vsub.f32 %v1096_v6, %v1112_v37  ;;  %v909_v4 = vsub.f32 %v2611_v20, %v3208_v12  ;;  %v1433_v20 = vsub.f32 %v2616_v22, %v3220_v15 }
 0x2b5   : > { %2158 = vrsqrt.f32 %v877_v9  ;;  %v1385_v1 = vsub.f32 %v1353_v38, %v1369_v40  ;;  %v1588_v8 = vpop.xlane.xlu0 %1587  ;;  %v1689_v45 = vsub.f32 %v2609_v19, %v3226_v44  ;;  %v1177_v22 = vsub.f32 %v2614_v21, %v3230_v5 }
 0x2b6   : > { %v1144_v42 = vadd.f32 1e-05, %v1128_v39  ;;  %v1609_v32 = vmul.f32 0.0078125, %v1588_v8  ;;  %v1077_v7 = vpop.xlane.xlu1 %1076  ;;  %v1690_v5 = vsub.f32 %v2619_v23, %v3236_v11 }
 0x2b7   : > { %v1401_v58 = vadd.f32 1e-05, %v1385_v1  ;;  %v1097_v63 = vmul.f32 0.0078125, %v1077_v7 }
 0x2b8   : > { %2160 = vrsqrt.f32 %v1144_v42  ;;  %v1641_v0 = vsub.f32 %v1609_v32, %v1625_v53 }
 0x2b9   : > { %2162 = vrsqrt.f32 %v1401_v58  ;;  %v1129_v51 = vsub.f32 %v1097_v63, %v1113_v46  ;;  %v747_v52 = vpop.xlane.xlu0 %746 }
 0x2ba   : > { %v2155_v13 = vpop.eup %2154  ;;  %v1657_v33 = vadd.f32 1e-05, %v1641_v0  ;;  %v1590_v41 = vpop.xlane.xlu1 %1589 }
 0x2bb   : > { %v924_v57 = vmul.f32 %v2155_v13, %v908_v50  ;;  %v1145_v34 = vadd.f32 1e-05, %v1129_v51  ;;  %v1610_v10 = vmul.f32 0.0078125, %v1590_v41  ;;  %v3265_v50 = vmul.f32 0.0078125, %v747_v52 }
 0x2bc   : > { %2164 = vrsqrt.f32 %v1657_v33 }
 0x2bd   : > { %v946_v43 = vmul.f32 %v3165_v31, %v924_v57  ;;  %2166 = vrsqrt.f32 %v1145_v34  ;;  %v1642_v16 = vsub.f32 %v1610_v10, %v1626_v59  ;;  %v1271_v35 = vpop.xlane.xlu0 %1270  ;;  %v846_v34 = vmul.f32 %v3265_v50, %v3265_v50 }
 0x2be   : > { %v2157_v37 = vpop.eup %2156  ;;  %v749_v6 = vpop.xlane.xlu1 %748  ;;  %v3271_v59 = vmul.f32 0.0078125, %v1271_v35 }
 0x2bf   : > { %v2159_v62 = vpop.eup %2158  ;;  %v968_v40 = vadd.f32 %v3173_v36, %v946_v43  ;;  %v1448_v9 = vmul.f32 %v2157_v37, %v1432_v47  ;;  %v1658_v38 = vadd.f32 1e-05, %v1642_v16  ;;  %v3280_v37 = vmul.f32 0.0078125, %v749_v6 }
 0x2c0   : > { %v925_v39 = vmul.f32 %v2159_v62, %v909_v4  ;;  %v1370_v23 = vmul.f32 %v3271_v59, %v3271_v59 }
 0x2c1   : > { %984 = vst [vmem:[%s2813_s28 + $0x140] sm:$0xff] %v968_v40  ;;  %v1464_v56 = vmul.f32 %v3165_v31, %v1448_v9  ;;  %2168 = vrsqrt.f32 %v1658_v38  ;;  %v1015_v1 = vpop.xlane.xlu0 %1014  ;;  %v847_v6 = vmul.f32 %v3280_v37, %v3280_v37 }
 0x2c2   : > { %v2161_v8 = vpop.eup %2160  ;;  %v947_v12 = vmul.f32 %v3165_v31, %v925_v39  ;;  %v1273_v53 = vpop.xlane.xlu1 %1272  ;;  %v3288_v9 = vmul.f32 0.0078125, %v1015_v1 }
 0x2c3   : > { %v2163_v42 = vpop.eup %2162  ;;  %v1480_v32 = vadd.f32 %v3173_v36, %v1464_v56  ;;  %v1192_v7 = vmul.f32 %v2161_v8, %v1176_v18  ;;  %v3292_v56 = vmul.f32 0.0078125, %v1273_v53 }
 0x2c4   : > { %v969_v46 = vadd.f32 %v3173_v36, %v947_v12  ;;  %v1449_v17 = vmul.f32 %v2163_v42, %v1433_v20  ;;  %v1114_v1 = vmul.f32 %v3288_v9, %v3288_v9 }
 0x2c5   : > { %1865 = vst [vmem:[%s2813_s28 + $0x150] sm:$0xff] %v1480_v32  ;;  %v1208_v58 = vmul.f32 %v3165_v31, %v1192_v7  ;;  %v1528_v63 = vpop.xlane.xlu0 %1527  ;;  %v1371_v53 = vmul.f32 %v3292_v56, %v3292_v56 }
 0x2c6   : > { %v2165_v0 = vpop.eup %2164  ;;  %985 = vst [vmem:[%s2813_s28 + $0x160] sm:$0xff] %v969_v46  ;;  %v1465_v15 = vmul.f32 %v3165_v31, %v1449_v17  ;;  %v1017_v51 = vpop.xlane.xlu1 %1016  ;;  %v3298_v7 = vmul.f32 0.0078125, %v1528_v63 }
 0x2c7   : > { %v2167_v13 = vpop.eup %2166  ;;  %v1224_v33 = vadd.f32 %v3173_v36, %v1208_v58  ;;  %v1705_v41 = vmul.f32 %v2165_v0, %v1689_v45  ;;  %v3302_v58 = vmul.f32 0.0078125, %v1017_v51 }
 0x2c8   : > { %v1481_v19 = vadd.f32 %v3173_v36, %v1465_v15  ;;  %v1193_v44 = vmul.f32 %v2167_v13, %v1177_v22 }
 0x2c9   : > { %1240 = vst [vmem:[%s2813_s28 + $0x148] sm:$0xff] %v1224_v33  ;;  %v1721_v57 = vmul.f32 %v3165_v31, %v1705_v41  ;;  %v811_v21 = vpop.xlane.xlu0 %810  ;;  %v1627_v41 = vmul.f32 %v3298_v7, %v3298_v7 }
 0x2ca   : > { %1866 = vst [vmem:[%s2813_s28 + $0x170] sm:$0xff] %v1481_v19  ;;  %v1209_v52 = vmul.f32 %v3165_v31, %v1193_v44  ;;  %v830_v10 = vmul.f32 0.0078125, %v811_v21  ;;  %v1530_v47 = vpop.xlane.xlu1 %1529 }
 0x2cb   : > { %v2169_v43 = vpop.eup %2168  ;;  %v1737_v16 = vadd.f32 %v3173_v36, %v1721_v57  ;;  %v1115_v57 = vmul.f32 %v3302_v58, %v3302_v58  ;;  %v3308_v21 = vmul.f32 0.0078125, %v1530_v47 }
 0x2cc   : > { %v1225_v35 = vadd.f32 %v3173_v36, %v1209_v52  ;;  %v1706_v4 = vmul.f32 %v2169_v43, %v1690_v5  ;;  %v862_v62 = vsub.f32 %v830_v10, %v846_v34  ;;  %v910_v34 = vsub.f32 %v2638_v48, %v3265_v50 }
 0x2cd   : > { %1881 = vst [vmem:[%s2813_s28 + $0x158] sm:$0xff] %v1737_v16  ;;  %v1335_v11 = vpop.xlane.xlu0 %1334 }
 0x2ce   : > { %1241 = vst [vmem:[%s2813_s28 + $0x168] sm:$0xff] %v1225_v35  ;;  %v1722_v40 = vmul.f32 %v3165_v31, %v1706_v4  ;;  %v878_v38 = vadd.f32 1e-05, %v862_v62  ;;  %v1354_v39 = vmul.f32 0.0078125, %v1335_v11  ;;  %v813_v18 = vpop.xlane.xlu1 %812 }
 0x2cf   : > { %v831_v8 = vmul.f32 0.0078125, %v813_v18  ;;  %v911_v18 = vsub.f32 %v2643_v54, %v3280_v37  ;;  %v1435_v54 = vsub.f32 %v2653_v2, %v3292_v56  ;;  %v1179_v2 = vsub.f32 %v2648_v60, %v3302_v58 }
 0x2d0   : > { %v1738_v20 = vadd.f32 %v3173_v36, %v1722_v40  ;;  %2170 = vrsqrt.f32 %v878_v38  ;;  %v1386_v12 = vsub.f32 %v1354_v39, %v1370_v23  ;;  %v1628_v23 = vmul.f32 %v3308_v21, %v3308_v21 }
 0x2d1   : > { %v863_v42 = vsub.f32 %v831_v8, %v847_v6  ;;  %v1079_v32 = vpop.xlane.xlu0 %1078  ;;  %v1434_v40 = vsub.f32 %v2645_v55, %v3271_v59  ;;  %v1178_v55 = vsub.f32 %v2641_v49, %v3288_v9  ;;  %v1691_v9 = vsub.f32 %v2650_v61, %v3298_v7 }
 0x2d2   : > { %1882 = vst [vmem:[%s2813_s28 + $0x178] sm:$0xff] %v1738_v20  ;;  %v1402_v46 = vadd.f32 1e-05, %v1386_v12  ;;  %v1098_v17 = vmul.f32 0.0078125, %v1079_v32  ;;  %v1337_v45 = vpop.xlane.xlu1 %1336  ;;  %v1692_v58 = vsub.f32 %v2656_v3, %v3308_v21 }
 0x2d3   : > { %v879_v0 = vadd.f32 1e-05, %v863_v42  ;;  %v1355_v22 = vmul.f32 0.0078125, %v1337_v45 }
 0x2d4   : > { %2172 = vrsqrt.f32 %v1402_v46  ;;  %v1130_v15 = vsub.f32 %v1098_v17, %v1114_v1 }
 0x2d5   : > { %2174 = vrsqrt.f32 %v879_v0  ;;  %v1387_v13 = vsub.f32 %v1355_v22, %v1371_v53  ;;  %v1592_v33 = vpop.xlane.xlu0 %1591 }
 0x2d6   : > { %v1146_v63 = vadd.f32 1e-05, %v1130_v15  ;;  %v1611_v19 = vmul.f32 0.0078125, %v1592_v33  ;;  %v1081_v44 = vpop.xlane.xlu1 %1080 }
 0x2d7   : > { %v1403_v51 = vadd.f32 1e-05, %v1387_v13  ;;  %v1099_v5 = vmul.f32 0.0078125, %v1081_v44 }
 0x2d8   : > { %2176 = vrsqrt.f32 %v1146_v63  ;;  %v1643_v52 = vsub.f32 %v1611_v19, %v1627_v41 }
 0x2d9   : > { %2178 = vrsqrt.f32 %v1403_v51  ;;  %v1131_v10 = vsub.f32 %v1099_v5, %v1115_v57  ;;  %v751_v43 = vpop.xlane.xlu0 %750 }
 0x2da   : > { %v2171_v16 = vpop.eup %2170  ;;  %v1659_v35 = vadd.f32 1e-05, %v1643_v52  ;;  %v1594_v4 = vpop.xlane.xlu1 %1593  ;;  %v3337_v41 = vmul.f32 0.0078125, %v751_v43 }
 0x2db   : > { %v926_v62 = vmul.f32 %v2171_v16, %v910_v34  ;;  %v1147_v11 = vadd.f32 1e-05, %v1131_v10  ;;  %v1612_v47 = vmul.f32 0.0078125, %v1594_v4 }
 0x2dc   : > { %2180 = vrsqrt.f32 %v1659_v35  ;;  %v848_v34 = vmul.f32 %v3337_v41, %v3337_v41 }
 0x2dd   : > { %v948_v38 = vmul.f32 %v3165_v31, %v926_v62  ;;  %2182 = vrsqrt.f32 %v1147_v11  ;;  %v1644_v48 = vsub.f32 %v1612_v47, %v1628_v23  ;;  %v1275_v50 = vpop.xlane.xlu0 %1274 }
 0x2de   : > { %v2173_v39 = vpop.eup %2172  ;;  %v753_v6 = vpop.xlane.xlu1 %752  ;;  %v3343_v5 = vmul.f32 0.0078125, %v1275_v50 }
 0x2df   : > { %v2175_v8 = vpop.eup %2174  ;;  %v970_v20 = vadd.f32 %v3173_v36, %v948_v38  ;;  %v1450_v12 = vmul.f32 %v2173_v39, %v1434_v40  ;;  %v1660_v42 = vadd.f32 1e-05, %v1644_v48  ;;  %v3352_v4 = vmul.f32 0.0078125, %v753_v6 }
 0x2e0   : > { %v927_v32 = vmul.f32 %v2175_v8, %v911_v18  ;;  %v1372_v3 = vmul.f32 %v3343_v5, %v3343_v5 }
 0x2e1   : > { %986 = vst [vmem:[%s2813_s28 + $0x180] sm:$0xff] %v970_v20  ;;  %v1466_v59 = vmul.f32 %v3165_v31, %v1450_v12  ;;  %2184 = vrsqrt.f32 %v1660_v42  ;;  %v1019_v1 = vpop.xlane.xlu0 %1018  ;;  %v849_v39 = vmul.f32 %v3352_v4, %v3352_v4 }
 0x2e2   : > { %v2177_v46 = vpop.eup %2176  ;;  %v949_v37 = vmul.f32 %v3165_v31, %v927_v32  ;;  %v1277_v17 = vpop.xlane.xlu1 %1276  ;;  %v3360_v40 = vmul.f32 0.0078125, %v1019_v1 }
 0x2e3   : > { %v2179_v45 = vpop.eup %2178  ;;  %v1482_v53 = vadd.f32 %v3173_v36, %v1466_v59  ;;  %v1194_v0 = vmul.f32 %v2177_v46, %v1178_v55  ;;  %v3364_v18 = vmul.f32 0.0078125, %v1277_v17 }
 0x2e4   : > { %v971_v22 = vadd.f32 %v3173_v36, %v949_v37  ;;  %v1451_v49 = vmul.f32 %v2179_v45, %v1435_v54  ;;  %v1116_v32 = vmul.f32 %v3360_v40, %v3360_v40 }
 0x2e5   : > { %1867 = vst [vmem:[%s2813_s28 + $0x190] sm:$0xff] %v1482_v53  ;;  %v1210_v15 = vmul.f32 %v3165_v31, %v1194_v0  ;;  %v1532_v13 = vpop.xlane.xlu0 %1531  ;;  %v1373_v54 = vmul.f32 %v3364_v18, %v3364_v18 }
 0x2e6   : > { %v2181_v33 = vpop.eup %2180  ;;  %987 = vst [vmem:[%s2813_s28 + $0x1a0] sm:$0xff] %v971_v22  ;;  %v1467_v56 = vmul.f32 %v3165_v31, %v1451_v49  ;;  %v1021_v63 = vpop.xlane.xlu1 %1020  ;;  %v3370_v55 = vmul.f32 0.0078125, %v1532_v13 }
 0x2e7   : > { %v2183_v19 = vpop.eup %2182  ;;  %v1226_v44 = vadd.f32 %v3173_v36, %v1210_v15  ;;  %v1707_v57 = vmul.f32 %v2181_v33, %v1691_v9  ;;  %v3374_v37 = vmul.f32 0.0078125, %v1021_v63 }
 0x2e8   : > { %v1483_v61 = vadd.f32 %v3173_v36, %v1467_v56  ;;  %v1195_v7 = vmul.f32 %v2183_v19, %v1179_v2  ;;  %v1629_v49 = vmul.f32 %v3370_v55, %v3370_v55 }
 0x2e9   : > { %1242 = vst [vmem:[%s2813_s28 + $0x188] sm:$0xff] %v1226_v44  ;;  %v1723_v51 = vmul.f32 %v3165_v31, %v1707_v57  ;;  %v815_v60 = vpop.xlane.xlu0 %814  ;;  %v1117_v33 = vmul.f32 %v3374_v37, %v3374_v37  ;;  %v912_v44 = vsub.f32 %v2678_v24, %v3337_v41  ;;  %v913_v24 = vsub.f32 %v2683_v26, %v3352_v4 }
 0x2ea   : > { %1868 = vst [vmem:[%s2813_s28 + $0x1b0] sm:$0xff] %v1483_v61  ;;  %v1211_v52 = vmul.f32 %v3165_v31, %v1195_v7  ;;  %v832_v10 = vmul.f32 0.0078125, %v815_v60  ;;  %v1534_v43 = vpop.xlane.xlu1 %1533 }
 0x2eb   : > { %v2185_v16 = vpop.eup %2184  ;;  %v1739_v35 = vadd.f32 %v3173_v36, %v1723_v51  ;;  %v1550_v2 = vmul.f32 0.0078125, %v1534_v43 }
 0x2ec   : > { %v1227_v62 = vadd.f32 %v3173_v36, %v1211_v52  ;;  %v1708_v23 = vmul.f32 %v2185_v16, %v1692_v58  ;;  %v864_v11 = vsub.f32 %v832_v10, %v848_v34  ;;  %v1436_v10 = vsub.f32 %v2685_v27, %v3343_v5 }
 0x2ed   : > { %1883 = vst [vmem:[%s2813_s28 + $0x198] sm:$0xff] %v1739_v35  ;;  %v1339_v21 = vpop.xlane.xlu0 %1338  ;;  %v1630_v58 = vmul.f32 %v1550_v2, %v1550_v2 }
 0x2ee   : > { %1243 = vst [vmem:[%s2813_s28 + $0x1a8] sm:$0xff] %v1227_v62  ;;  %v1724_v47 = vmul.f32 %v3165_v31, %v1708_v23  ;;  %v880_v38 = vadd.f32 1e-05, %v864_v11  ;;  %v1356_v48 = vmul.f32 0.0078125, %v1339_v21  ;;  %v817_v50 = vpop.xlane.xlu1 %816  ;;  %v1180_v21 = vsub.f32 %v2681_v25, %v3360_v40 }
 0x2ef   : > { %v833_v6 = vmul.f32 0.0078125, %v817_v50  ;;  %v1693_v25 = vsub.f32 %v2690_v29, %v3370_v55  ;;  %v1694_v55 = vsub.f32 %v3498_v14, %v1550_v2 }
 0x2f0   : > { %v1740_v8 = vadd.f32 %v3173_v36, %v1724_v47  ;;  %2186 = vrsqrt.f32 %v880_v38  ;;  %v1388_v20 = vsub.f32 %v1356_v48, %v1372_v3  ;;  %v1437_v47 = vsub.f32 %v2693_v30, %v3364_v18 }
 0x2f1   : > { %v865_v12 = vsub.f32 %v833_v6, %v849_v39  ;;  %v1083_v42 = vpop.xlane.xlu0 %1082  ;;  %v1181_v30 = vsub.f32 %v2688_v28, %v3374_v37 }
 0x2f2   : > { %1884 = vst [vmem:[%s2813_s28 + $0x1b8] sm:$0xff] %v1740_v8  ;;  %v1404_v59 = vadd.f32 1e-05, %v1388_v20  ;;  %v1100_v1 = vmul.f32 0.0078125, %v1083_v42  ;;  %v1341_v46 = vpop.xlane.xlu1 %1340 }
 0x2f3   : > { %v881_v17 = vadd.f32 1e-05, %v865_v12  ;;  %v1357_v45 = vmul.f32 0.0078125, %v1341_v46 }
 0x2f4   : > { %2188 = vrsqrt.f32 %v1404_v59  ;;  %v1132_v53 = vsub.f32 %v1100_v1, %v1116_v32 }
 0x2f5   : > { %2190 = vrsqrt.f32 %v881_v17  ;;  %v1389_v0 = vsub.f32 %v1357_v45, %v1373_v54  ;;  %v1596_v22 = vpop.xlane.xlu0 %1595 }
 0x2f6   : > { %v1148_v9 = vadd.f32 1e-05, %v1132_v53  ;;  %v1613_v15 = vmul.f32 0.0078125, %v1596_v22  ;;  %v1085_v13 = vpop.xlane.xlu1 %1084 }
 0x2f7   : > { %v1405_v56 = vadd.f32 1e-05, %v1389_v0  ;;  %v1101_v63 = vmul.f32 0.0078125, %v1085_v13 }
 0x2f8   : > { %2192 = vrsqrt.f32 %v1148_v9  ;;  %v1645_v19 = vsub.f32 %v1613_v15, %v1629_v49 }
 0x2f9   : > { %2194 = vrsqrt.f32 %v1405_v56  ;;  %v1133_v57 = vsub.f32 %v1101_v63, %v1117_v33 }
 0x2fa   : > { %v2187_v61 = vpop.eup %2186  ;;  %v1661_v7 = vadd.f32 1e-05, %v1645_v19  ;;  %v1598_v51 = vpop.xlane.xlu1 %1597 }
 0x2fb   : > { %v928_v60 = vmul.f32 %v2187_v61, %v912_v44  ;;  %v1149_v52 = vadd.f32 1e-05, %v1133_v57  ;;  %v1614_v34 = vmul.f32 0.0078125, %v1598_v51 }
 0x2fc   : > { %2196 = vrsqrt.f32 %v1661_v7 }
 0x2fd   : > { %v950_v43 = vmul.f32 %v3165_v31, %v928_v60  ;;  %2198 = vrsqrt.f32 %v1149_v52  ;;  %v1646_v16 = vsub.f32 %v1614_v34, %v1630_v58 }
 0x2fe   : > { %v2189_v35 = vpop.eup %2188 }
 0x2ff   : > { %v2191_v41 = vpop.eup %2190  ;;  %v972_v62 = vadd.f32 %v3173_v36, %v950_v43  ;;  %v1452_v23 = vmul.f32 %v2189_v35, %v1436_v10  ;;  %v1662_v11 = vadd.f32 1e-05, %v1646_v16 }
 0x300   : > { %v929_v3 = vmul.f32 %v2191_v41, %v913_v24 }
 0x301   : > { %988 = vst [vmem:[%s2813_s28 + $0x1c0] sm:$0xff] %v972_v62  ;;  %v1468_v27 = vmul.f32 %v3165_v31, %v1452_v23  ;;  %2200 = vrsqrt.f32 %v1662_v11 }
 0x302   : > { %v2193_v5 = vpop.eup %2192  ;;  %v951_v26 = vmul.f32 %v3165_v31, %v929_v3 }
 0x303   : > { %v2195_v4 = vpop.eup %2194  ;;  %v1484_v38 = vadd.f32 %v3173_v36, %v1468_v27  ;;  %v1196_v48 = vmul.f32 %v2193_v5, %v1180_v21 }
 0x304   : > { %v973_v50 = vadd.f32 %v3173_v36, %v951_v26  ;;  %v1453_v39 = vmul.f32 %v2195_v4, %v1437_v47 }
 0x305   : > { %1869 = vst [vmem:[%s2813_s28 + $0x1d0] sm:$0xff] %v1484_v38  ;;  %v1212_v40 = vmul.f32 %v3165_v31, %v1196_v48 }
 0x306   : > { %v2197_v6 = vpop.eup %2196  ;;  %989 = vst [vmem:[%s2813_s28 + $0x1e0] sm:$0xff] %v973_v50  ;;  %v1469_v18 = vmul.f32 %v3165_v31, %v1453_v39 }
 0x307   : > { %v2199_v8 = vpop.eup %2198  ;;  %v1228_v20 = vadd.f32 %v3173_v36, %v1212_v40  ;;  %v1709_v12 = vmul.f32 %v2197_v6, %v1693_v25 }
 0x308   : > { %v1485_v42 = vadd.f32 %v3173_v36, %v1469_v18  ;;  %v1197_v29 = vmul.f32 %v2199_v8, %v1181_v30 }
 0x309   : > { %1244 = vst [vmem:[%s2813_s28 + $0x1c8] sm:$0xff] %v1228_v20  ;;  %v1725_v32 = vmul.f32 %v3165_v31, %v1709_v12 }
 0x30a   : > { %1870 = vst [vmem:[%s2813_s28 + $0x1f0] sm:$0xff] %v1485_v42  ;;  %v1213_v28 = vmul.f32 %v3165_v31, %v1197_v29 }
 0x30b   : > { %v2201_v59 = vpop.eup %2200  ;;  %v1741_v1 = vadd.f32 %v3173_v36, %v1725_v32 }
 0x30c   : > { %v1229_v46 = vadd.f32 %v3173_v36, %v1213_v28  ;;  %v1710_v54 = vmul.f32 %v2201_v59, %v1694_v55 }
 0x30d   : > { %1885 = vst [vmem:[%s2813_s28 + $0x1d8] sm:$0xff] %v1741_v1 }
 0x30e   : > { %1245 = vst [vmem:[%s2813_s28 + $0x1e8] sm:$0xff] %v1229_v46  ;;  %v1726_v37 = vmul.f32 %v3165_v31, %v1710_v54 }
 0x310   : > { %v1742_v17 = vadd.f32 %v3173_v36, %v1726_v37 }
 0x312   : > { %1886 = vst [vmem:[%s2813_s28 + $0x1f8] sm:$0xff] %v1742_v17 }
 0x313 PF: > { %s3521_s23 = smov %s2406_s15  ;;  %p15_p6 = scmp.ge.s32.totalorder %s2380_s26, 4  }
 0x314   : > { %s3522_s15 = smov %s2292_s16  ;;  %s3523_s16 = smov %s2296_s17 }
 0x315   : > { %s3524_s17 = smov %s3521_s23  ;;  %s3525_s18 = smov %s2380_s26 }
 0x316   :  { %17 = sbr.rel (!%p15_p6) target bundleno = 4 (0x4), region = 81 }
 0x31d   :  { %1783 = vsyncpa [#allocation3], 1 }
 0x31e   :  { %1785 = vsyncpa [#allocation3 + $0x1], 1 }
 0x31f   :  { %1786 = vsyncpa [#allocation5], 1 }

// kernel: patch_expand.1
= control target key start
LH: loop header
LB: loop body
LE: loop exit
PB: predicated region body
PF: predicated region fallthrough
CT: control target
= control target key end

     0   :  { %9 = vsyncpa [#allocation3], 0  ;;  %s3432_s0 = inlined_call_operand.hbm [shape: f32[256,256], index: 0, kind: input, shape index: {}]   ;;  %s3433_s1 = inlined_call_operand.hbm [shape: f32[256,512], index: 1, kind: input, shape index: {}]   ;;  %s3434_s2 = inlined_call_operand.vmem [shape: f32[1,128], index: 2, kind: input, shape index: {}]   ;;  %s3435_s3 = inlined_call_operand.vmem [shape: f32[1,128], index: 3, kind: input, shape index: {}]   ;;  %s3436_s4 = inlined_call_operand.vmem [shape: f32[32,2,8,256], index: 4, kind: output, shape index: {}]  }
   0x1   :  { %11 = vsyncpa [#allocation3 + $0x1], 0 }
   0x2   :  { %12 = vsyncpa [#allocation5], 0  ;;  %s2333_s15 = smov 0   ;;  %s2335_s16 = smov 0  }
   0x3   :  { %s2337_s17 = smov 0   ;;  %s2339_s18 = smov 0  }
   0x4 LB: > { %s1838_s19 = sadd.s32 4294967295, %s2300_s18   ;;  %p38_p0 = scmp.ne.s32.totalorder %s2292_s16, %s2288_s15  ;;  %s2300_s18 = sphi %s2339_s18, %s3525_s18   ;;  %s2296_s17 = sphi %s2337_s17, %s3524_s17   ;;  %s2292_s16 = sphi %s2335_s16, %s3523_s16   ;;  %s2288_s15 = sphi %s2333_s15, %s3522_s15  }
   0x5   : > { %p2355_p1 = scmp.eq.s32.totalorder %s1838_s19, 0  ;;  %p1840_p2 = scmp.ge.s32.totalorder %s2300_s18, 1 }
   0x6   : > { %p138_p3 = scmp.lt.s32.totalorder %s2300_s18, 3  ;;  %s2302_s23 = smov [#allocation4]  }
   0x7   : > { %s3465_s20 = scalar_select %p2355_p1, 1, 0 }
   0x8   : > { %p2363_p4 = por %p2355_p1, %p38_p0  ;;  %p2367_p5 = pnand %p1840_p2, %p138_p3 }
   0x9   : > { %s150_s24 = sshll.u32 %s2302_s23, 4  ;;  %s2380_s26 = sadd.s32 1, %s2300_s18   ;;  %s151_s24 = int_to_ptr.vmem [resolvable:$true] %s150_s24 }
   0xa   : > { %s3466_s21 = scalar_select %p2363_p4, 1, 0 }
   0xb   : > { %s3467_s22 = scalar_select %p2367_p5, 1, 0 }
   0xc   : > { %p2026_p6 = pneg %p2367_p5  ;;  %s25_s27 = sadd.s32 1, %s2296_s17 }
   0xd   : > { %s22_s28 = ssub.s32 %s2300_s18, %s2380_s26  ;;  %s2204_s5 = scalar_lea.hbm %s3433_s1, 16384 }
   0xe   : > { %p2375_p7 = pnand %p2026_p6, %p2355_p1  ;;  %p2205_p8 = scmp.ne.s32.totalorder %s3433_s1, %s2204_s5 }
   0xf   : > { %p2211_p12 = scmp.lt.u32.totalorder %s2204_s5, %s3433_s1 }
  0x10   : > { %p2206_p9 = pneg %p2375_p7 }
  0x12   : > { %p2207_p10 = pnand %p2206_p9, %p2205_p8 }
  0x14   : > { %p2208_p11 = pneg %p2207_p10 }
  0x16   : > { %p2213_p13 = pnand %p2211_p12, %p2208_p11 }
  0x18   : > { %2216 = shalt.err (!%p2213_p13)
}
  0x19   : > { %s2217_s10 = scalar_lea.vmem %s151_s24, 16384  ;;  %p2225_p6 = scmp.lt.s32.totalorder %s151_s24, %s151_s24 }
  0x1a   : > { %p2218_p0 = scmp.ne.s32.totalorder %s151_s24, %s2217_s10  ;;  %p2226_p1 = scmp.lt.s32.totalorder %s2217_s10, %s2217_s10 }
  0x1c   : > { %p2220_p2 = pnand %p2218_p0, %p2206_p9  ;;  %p2227_p4 = por %p2226_p1, %p2225_p6 }
  0x1e   : > { %p2221_p3 = pneg %p2220_p2 }
  0x20   : > { %p2228_p5 = pnand %p2227_p4, %p2221_p3 }
  0x22   : > { %2231 = shalt.err (!%p2228_p5)
}
  0x23   : > { %s2303_s11 = smov 512   ;;  %s2304_s12 = smov 32  }
  0x24   : > { %2029 = dma.hbm_to_vmem [thread:$0]  (!%p2375_p7), %s3433_s1, 16384, %s151_s24, [#allocation5], %s2303_s11, %s2303_s11, %s2304_s12  }
  0x25   : > { %p23_p8 = scmp.eq.s32.totalorder %s22_s28, 0  ;;  %p32_p9 = scmp.ne.s32.totalorder %s2296_s17, %s2292_s16 }
  0x26   : > { %p33_p1 = scmp.eq.s32.totalorder %s2300_s18, 0  ;;  %p2035_p4 = scmp.lt.s32.totalorder %s2300_s18, 2 }
  0x27   : > { %s2406_s15 = scalar_select %p23_p8, %s2296_s17, %s25_s27  }
  0x28   : > { %p34_p5 = por %p33_p1, %p32_p9  ;;  %s170_s23 = sand.u32 1, %s2296_s17  }
  0x29   : > { %s1843_s29 = sshll.u32 %s170_s23, 8  ;;  %s1890_s30 = sshll.u32 %s2300_s18, 12 }
  0x2a   : > { %s2413_s7 = scalar_lea.hbm %s3432_s0, %s1890_s30  ;;  %s174_s24 = scalar_lea.vmem [#allocation2], %s1843_s29 }
  0x2b   : > { %s182_s25 = sshll.u32 %s174_s24, 4  ;;  %p2417_p7 = pnand %p2035_p4, %p34_p5  ;;  %s2415_s25 = int_to_ptr.vmem [resolvable:$true] %s182_s25 }
  0x2c   : > { %s2421_s28 = scalar_lea.sflag [#allocation3], %s170_s23  ;;  %s2232_s8 = scalar_lea.hbm %s2413_s7, 4096 }
  0x2d   : > { %p2233_p10 = scmp.ne.s32.totalorder %s2413_s7, %s2232_s8  ;;  %p2234_p11 = pneg %p2417_p7 }
  0x2e   : > { %s2237_s11 = scalar_lea.hbm %s3432_s0, 8192  ;;  %p2238_p0 = scmp.lt.u32.totalorder %s2413_s7, %s3432_s0 }
  0x2f   : > { %p2235_p12 = pnand %p2234_p11, %p2233_p10  ;;  %p2239_p2 = scmp.lt.u32.totalorder %s2237_s11, %s2232_s8 }
  0x30   : > { %p2241_p6 = scmp.lt.u32.totalorder %s2232_s8, %s2413_s7 }
  0x31   : > { %p2236_p13 = pneg %p2235_p12  ;;  %p2240_p3 = por %p2239_p2, %p2238_p0 }
  0x33   : > { %p2242_p8 = por %p2241_p6, %p2240_p3 }
  0x35   : > { %p2243_p9 = pnand %p2242_p8, %p2236_p13 }
  0x37   : > { %2246 = shalt.err (!%p2243_p9)
}
  0x38   : > { %s2247_s14 = scalar_lea.vmem %s2415_s25, 4096  ;;  %s2305_s23 = smov [#allocation2]  }
  0x39   : > { %p2248_p1 = scmp.ne.s32.totalorder %s2415_s25, %s2247_s14  ;;  %s2252_s29 = sshll.u32 %s2305_s23, 4  ;;  %s2253_s29 = int_to_ptr.vmem [resolvable:$false] %s2252_s29 }
  0x3a   : > { %s2254_s30 = scalar_lea.vmem %s2253_s29, 8192  ;;  %p2255_p10 = scmp.lt.s32.totalorder %s2415_s25, %s2253_s29 }
  0x3b   : > { %p2250_p4 = pnand %p2248_p1, %p2234_p11  ;;  %p2256_p12 = scmp.lt.s32.totalorder %s2254_s30, %s2247_s14 }
  0x3d   : > { %p2251_p5 = pneg %p2250_p4  ;;  %p2257_p0 = por %p2256_p12, %p2255_p10 }
  0x3f   : > { %p2258_p2 = pnand %p2257_p0, %p2251_p5 }
  0x41   : > { %2261 = shalt.err (!%p2258_p2)
}
  0x42   : > { %s2306_s5 = smov 256   ;;  %s2307_s6 = smov 16  }
  0x43   : > { %2033 = dma.hbm_to_vmem [thread:$0]  (!%p2417_p7), %s2413_s7, 4096, %s2415_s25, %s2421_s28, %s2306_s5, %s2306_s5, %s2307_s6  }
  0x44   : > { %p3470_p11 = scmp.ne.s32.totalorder %s3467_s22, 0 }
  0x46   : > { %194 = sbr.rel (%p3470_p11) target bundleno = 787 (0x313), region = 36 }
  0x4d   : > { %s196_s24 = sand.u32 1, %s2292_s16   ;;  %p3471_p13 = scmp.ne.s32.totalorder %s3466_s21, 0 }
  0x4e   : > { %s1848_s8 = sshll.u32 %s196_s24, 8  ;;  %s197_s9 = scalar_lea.sflag [#allocation3], %s196_s24 }
  0x4f   : > { %s2452_s10 = scalar_lea.vmem [#allocation2], %s1848_s8 }
  0x50   : > { %2279 = dma.done.wait (%p3471_p13), %s197_s9, 4096  }
  0x51   : > { %2281 = vsyncadd (%p3471_p13), %s197_s9, 4294963200  ;;  %p3472_p3 = scmp.ne.s32.totalorder %s3465_s20, 0 }
  0x53   : > { %2283 = dma.done.wait (%p3472_p3), [#allocation5], 16384  }
  0x54   : > { %2285 = vsyncadd (%p3472_p3), [#allocation5], 4294950912  ;;  %v271_v0 = vld [vmem:[#allocation4 + $0x8] sm:$0xff]  ;;  %v273_v2 = vld [vmem:[#allocation4 + $0x18] sm:$0xff]  ;;  %s1850_s20 = sshll.u32 %s1838_s19, 4 }
  0x55   : > { %v275_v1 = vld [vmem:[#allocation4 + $0x28] sm:$0xff]  ;;  %v277_v4 = vld [vmem:[#allocation4 + $0x38] sm:$0xff]  ;;  %v270_v5 = vld [vmem:[#allocation4] sm:$0xff]  ;;  %p232_p7 = scmp.lt.s32.totalorder %s1850_s20, 31 }
  0x56   : > { %v1892_v3 = vpack.c.bf16 %v275_v1, %v271_v0  ;;  %v274_v6 = vld [vmem:[#allocation4 + $0x20] sm:$0xff]  ;;  %v1956_v7 = vpack.c.bf16 %v277_v4, %v273_v2  ;;  %v272_v9 = vld [vmem:[#allocation4 + $0x10] sm:$0xff]  ;;  %v279_v11 = vld [vmem:[#allocation4 + $0x48] sm:$0xff] }
  0x57   : > { %v1894_v8 = vpack.c.bf16 %v274_v6, %v270_v5  ;;  %v276_v10 = vld [vmem:[#allocation4 + $0x30] sm:$0xff]  ;;  %v283_v13 = vld [vmem:[#allocation4 + $0x68] sm:$0xff]  ;;  %v281_v14 = vld [vmem:[#allocation4 + $0x58] sm:$0xff]  ;;  %s3527_s20 = smov (!%p232_p7, %s1850_s20), 31 }
  0x58   : > { %1893 = vmatprep.subr.bf16.mxu0 %v1892_v3  ;;  %v1958_v12 = vpack.c.bf16 %v276_v10, %v272_v9  ;;  %v285_v15 = vld [vmem:[#allocation4 + $0x78] sm:$0xff]  ;;  %1957 = vmatprep.subr.bf16.mxu1 %v1956_v7  ;;  %v1896_v16 = vpack.c.bf16 %v283_v13, %v279_v11  ;;  %v278_v18 = vld [vmem:[#allocation4 + $0x40] sm:$0xff]  ;;  %v280_v20 = vld [vmem:[#allocation4 + $0x50] sm:$0xff]  ;;  %s1891_s21 = sshll.u32 %s3527_s20, 5 }
  0x59   : > { %1895 = vmatpush1.bf16.msra.mxu0 %v1894_v8  ;;  %v1960_v17 = vpack.c.bf16 %v285_v15, %v281_v14  ;;  %v282_v19 = vld [vmem:[#allocation4 + $0x60] sm:$0xff]  ;;  %v284_v22 = vld [vmem:[#allocation4 + $0x70] sm:$0xff]  ;;  %v287_v23 = vld [vmem:[#allocation4 + $0x88] sm:$0xff]  ;;  %s2813_s28 = scalar_lea.vmem %s3436_s4, %s1891_s21 }
  0x5a   : > { %1959 = vmatpush1.bf16.msra.mxu1 %v1958_v12  ;;  %v1898_v21 = vpack.c.bf16 %v282_v19, %v278_v18  ;;  %v291_v24 = vld [vmem:[#allocation4 + $0xa8] sm:$0xff]  ;;  %1897 = vmatprep.subr.bf16.mxu0 %v1896_v16  ;;  %v1962_v25 = vpack.c.bf16 %v284_v22, %v280_v20  ;;  %v289_v27 = vld [vmem:[#allocation4 + $0x98] sm:$0xff]  ;;  %v286_v29 = vld [vmem:[#allocation4 + $0x80] sm:$0xff] }
  0x5b   : > { %1961 = vmatprep.subr.bf16.mxu1 %v1960_v17  ;;  %v1900_v26 = vpack.c.bf16 %v291_v24, %v287_v23  ;;  %v293_v28 = vld [vmem:[#allocation4 + $0xb8] sm:$0xff]  ;;  %v290_v31 = vld [vmem:[#allocation4 + $0xa0] sm:$0xff]  ;;  %v288_v32 = vld [vmem:[#allocation4 + $0x90] sm:$0xff] }
  0x5c   : > { %v1964_v30 = vpack.c.bf16 %v293_v28, %v289_v27  ;;  %v292_v33 = vld [vmem:[#allocation4 + $0xb0] sm:$0xff]  ;;  %v1902_v34 = vpack.c.bf16 %v290_v31, %v286_v29  ;;  %v295_v35 = vld [vmem:[#allocation4 + $0xc8] sm:$0xff]  ;;  %v297_v37 = vld [vmem:[#allocation4 + $0xd8] sm:$0xff] }
  0x5d   : > { %1899 = vmatpush1.bf16.msra.mxu0 %v1898_v21  ;;  %v299_v36 = vld [vmem:[#allocation4 + $0xe8] sm:$0xff]  ;;  %v1966_v38 = vpack.c.bf16 %v292_v33, %v288_v32  ;;  %v301_v40 = vld [vmem:[#allocation4 + $0xf8] sm:$0xff]  ;;  %v294_v41 = vld [vmem:[#allocation4 + $0xc0] sm:$0xff] }
  0x5e   : > { %1963 = vmatpush1.bf16.msra.mxu1 %v1962_v25  ;;  %1901 = vmatprep.subr.bf16.mxu0 %v1900_v26  ;;  %v1904_v39 = vpack.c.bf16 %v299_v36, %v295_v35  ;;  %v298_v42 = vld [vmem:[#allocation4 + $0xe0] sm:$0xff]  ;;  %v1968_v43 = vpack.c.bf16 %v301_v40, %v297_v37  ;;  %v296_v44 = vld [vmem:[#allocation4 + $0xd0] sm:$0xff]  ;;  %v303_v46 = vld [vmem:[#allocation4 + $0x108] sm:$0xff] }
  0x5f   : > { %1965 = vmatprep.subr.bf16.mxu1 %v1964_v30  ;;  %v300_v45 = vld [vmem:[#allocation4 + $0xf0] sm:$0xff]  ;;  %v307_v47 = vld [vmem:[#allocation4 + $0x128] sm:$0xff]  ;;  %v305_v48 = vld [vmem:[#allocation4 + $0x118] sm:$0xff]  ;;  %v1906_v50 = vpack.c.bf16 %v298_v42, %v294_v41 }
  0x60   : > { %v309_v49 = vld [vmem:[#allocation4 + $0x138] sm:$0xff]  ;;  %v1970_v51 = vpack.c.bf16 %v300_v45, %v296_v44  ;;  %v1908_v52 = vpack.c.bf16 %v307_v47, %v303_v46  ;;  %v302_v53 = vld [vmem:[#allocation4 + $0x100] sm:$0xff]  ;;  %v304_v55 = vld [vmem:[#allocation4 + $0x110] sm:$0xff] }
  0x61   : > { %1903 = vmatpush1.bf16.msra.mxu0 %v1902_v34  ;;  %v306_v54 = vld [vmem:[#allocation4 + $0x120] sm:$0xff]  ;;  %v1972_v56 = vpack.c.bf16 %v309_v49, %v305_v48  ;;  %v308_v57 = vld [vmem:[#allocation4 + $0x130] sm:$0xff]  ;;  %v311_v58 = vld [vmem:[#allocation4 + $0x148] sm:$0xff] }
  0x62   : > { %1967 = vmatpush1.bf16.msra.mxu1 %v1966_v38  ;;  %1905 = vmatprep.subr.bf16.mxu0 %v1904_v39  ;;  %v315_v59 = vld [vmem:[#allocation4 + $0x168] sm:$0xff]  ;;  %v313_v60 = vld [vmem:[#allocation4 + $0x158] sm:$0xff]  ;;  %v1910_v62 = vpack.c.bf16 %v306_v54, %v302_v53  ;;  %v1974_v63 = vpack.c.bf16 %v308_v57, %v304_v55  ;;  %v310_v1 = vld [vmem:[#allocation4 + $0x140] sm:$0xff] }
  0x63   : > { %1969 = vmatprep.subr.bf16.mxu1 %v1968_v43  ;;  %v317_v61 = vld [vmem:[#allocation4 + $0x178] sm:$0xff]  ;;  %v1912_v0 = vpack.c.bf16 %v315_v59, %v311_v58  ;;  %v314_v2 = vld [vmem:[#allocation4 + $0x160] sm:$0xff]  ;;  %v312_v3 = vld [vmem:[#allocation4 + $0x150] sm:$0xff] }
  0x64   : > { %v1976_v4 = vpack.c.bf16 %v317_v61, %v313_v60  ;;  %v316_v5 = vld [vmem:[#allocation4 + $0x170] sm:$0xff]  ;;  %v319_v6 = vld [vmem:[#allocation4 + $0x188] sm:$0xff]  ;;  %v321_v8 = vld [vmem:[#allocation4 + $0x198] sm:$0xff]  ;;  %v1914_v10 = vpack.c.bf16 %v314_v2, %v310_v1 }
  0x65   : > { %1907 = vmatpush1.bf16.msra.mxu0 %v1906_v50  ;;  %v323_v7 = vld [vmem:[#allocation4 + $0x1a8] sm:$0xff]  ;;  %v325_v9 = vld [vmem:[#allocation4 + $0x1b8] sm:$0xff]  ;;  %v1978_v11 = vpack.c.bf16 %v316_v5, %v312_v3  ;;  %v318_v13 = vld [vmem:[#allocation4 + $0x180] sm:$0xff] }
  0x66   : > { %1971 = vmatpush1.bf16.msra.mxu1 %v1970_v51  ;;  %1909 = vmatprep.subr.bf16.mxu0 %v1908_v52  ;;  %v1916_v12 = vpack.c.bf16 %v323_v7, %v319_v6  ;;  %v322_v14 = vld [vmem:[#allocation4 + $0x1a0] sm:$0xff]  ;;  %v320_v15 = vld [vmem:[#allocation4 + $0x190] sm:$0xff]  ;;  %v1980_v16 = vpack.c.bf16 %v325_v9, %v321_v8  ;;  %v327_v18 = vld [vmem:[#allocation4 + $0x1c8] sm:$0xff] }
  0x67   : > { %1973 = vmatprep.subr.bf16.mxu1 %v1972_v56  ;;  %v324_v17 = vld [vmem:[#allocation4 + $0x1b0] sm:$0xff]  ;;  %v331_v19 = vld [vmem:[#allocation4 + $0x1e8] sm:$0xff]  ;;  %v329_v20 = vld [vmem:[#allocation4 + $0x1d8] sm:$0xff]  ;;  %v1918_v22 = vpack.c.bf16 %v322_v14, %v318_v13 }
  0x68   : > { %v333_v21 = vld [vmem:[#allocation4 + $0x1f8] sm:$0xff]  ;;  %v1982_v23 = vpack.c.bf16 %v324_v17, %v320_v15  ;;  %v1920_v24 = vpack.c.bf16 %v331_v19, %v327_v18  ;;  %v326_v25 = vld [vmem:[#allocation4 + $0x1c0] sm:$0xff]  ;;  %v328_v27 = vld [vmem:[#allocation4 + $0x1d0] sm:$0xff] }
  0x69   : > { %1911 = vmatpush1.bf16.msra.mxu0 %v1910_v62  ;;  %v330_v26 = vld [vmem:[#allocation4 + $0x1e0] sm:$0xff]  ;;  %v1984_v28 = vpack.c.bf16 %v333_v21, %v329_v20  ;;  %v332_v29 = vld [vmem:[#allocation4 + $0x1f0] sm:$0xff]  ;;  %v335_v30 = vld [vmem:[#allocation4 + $0x208] sm:$0xff] }
  0x6a   : > { %1975 = vmatpush1.bf16.msra.mxu1 %v1974_v63  ;;  %1913 = vmatprep.subr.bf16.mxu0 %v1912_v0  ;;  %v339_v31 = vld [vmem:[#allocation4 + $0x228] sm:$0xff]  ;;  %v337_v32 = vld [vmem:[#allocation4 + $0x218] sm:$0xff]  ;;  %v1922_v34 = vpack.c.bf16 %v330_v26, %v326_v25  ;;  %v1986_v35 = vpack.c.bf16 %v332_v29, %v328_v27  ;;  %v334_v37 = vld [vmem:[#allocation4 + $0x200] sm:$0xff] }
  0x6b   : > { %1977 = vmatprep.subr.bf16.mxu1 %v1976_v4  ;;  %v341_v33 = vld [vmem:[#allocation4 + $0x238] sm:$0xff]  ;;  %v1924_v36 = vpack.c.bf16 %v339_v31, %v335_v30  ;;  %v338_v38 = vld [vmem:[#allocation4 + $0x220] sm:$0xff]  ;;  %v336_v39 = vld [vmem:[#allocation4 + $0x210] sm:$0xff] }
  0x6c   : > { %v1988_v40 = vpack.c.bf16 %v341_v33, %v337_v32  ;;  %v340_v41 = vld [vmem:[#allocation4 + $0x230] sm:$0xff]  ;;  %v343_v42 = vld [vmem:[#allocation4 + $0x248] sm:$0xff]  ;;  %v345_v44 = vld [vmem:[#allocation4 + $0x258] sm:$0xff]  ;;  %v1926_v46 = vpack.c.bf16 %v338_v38, %v334_v37 }
  0x6d   : > { %1915 = vmatpush1.bf16.msra.mxu0 %v1914_v10  ;;  %v347_v43 = vld [vmem:[#allocation4 + $0x268] sm:$0xff]  ;;  %v349_v45 = vld [vmem:[#allocation4 + $0x278] sm:$0xff]  ;;  %v1990_v47 = vpack.c.bf16 %v340_v41, %v336_v39  ;;  %v342_v49 = vld [vmem:[#allocation4 + $0x240] sm:$0xff] }
  0x6e   : > { %1979 = vmatpush1.bf16.msra.mxu1 %v1978_v11  ;;  %1917 = vmatprep.subr.bf16.mxu0 %v1916_v12  ;;  %v1928_v48 = vpack.c.bf16 %v347_v43, %v343_v42  ;;  %v346_v50 = vld [vmem:[#allocation4 + $0x260] sm:$0xff]  ;;  %v344_v51 = vld [vmem:[#allocation4 + $0x250] sm:$0xff]  ;;  %v1992_v52 = vpack.c.bf16 %v349_v45, %v345_v44  ;;  %v351_v54 = vld [vmem:[#allocation4 + $0x288] sm:$0xff] }
  0x6f   : > { %1981 = vmatprep.subr.bf16.mxu1 %v1980_v16  ;;  %v348_v53 = vld [vmem:[#allocation4 + $0x270] sm:$0xff]  ;;  %v355_v55 = vld [vmem:[#allocation4 + $0x2a8] sm:$0xff]  ;;  %v353_v56 = vld [vmem:[#allocation4 + $0x298] sm:$0xff]  ;;  %v1930_v58 = vpack.c.bf16 %v346_v50, %v342_v49 }
  0x70   : > { %v357_v57 = vld [vmem:[#allocation4 + $0x2b8] sm:$0xff]  ;;  %v1994_v59 = vpack.c.bf16 %v348_v53, %v344_v51  ;;  %v1932_v60 = vpack.c.bf16 %v355_v55, %v351_v54  ;;  %v350_v61 = vld [vmem:[#allocation4 + $0x280] sm:$0xff]  ;;  %v352_v63 = vld [vmem:[#allocation4 + $0x290] sm:$0xff] }
  0x71   : > { %1919 = vmatpush1.bf16.msra.mxu0 %v1918_v22  ;;  %v354_v62 = vld [vmem:[#allocation4 + $0x2a0] sm:$0xff]  ;;  %v1996_v0 = vpack.c.bf16 %v357_v57, %v353_v56  ;;  %v356_v1 = vld [vmem:[#allocation4 + $0x2b0] sm:$0xff]  ;;  %v359_v2 = vld [vmem:[#allocation4 + $0x2c8] sm:$0xff] }
  0x72   : > { %1983 = vmatpush1.bf16.msra.mxu1 %v1982_v23  ;;  %1921 = vmatprep.subr.bf16.mxu0 %v1920_v24  ;;  %v363_v3 = vld [vmem:[#allocation4 + $0x2e8] sm:$0xff]  ;;  %v361_v4 = vld [vmem:[#allocation4 + $0x2d8] sm:$0xff]  ;;  %v1934_v6 = vpack.c.bf16 %v354_v62, %v350_v61  ;;  %v358_v7 = vld [vmem:[#allocation4 + $0x2c0] sm:$0xff]  ;;  %v1998_v8 = vpack.c.bf16 %v356_v1, %v352_v63 }
  0x73   : > { %1985 = vmatprep.subr.bf16.mxu1 %v1984_v28  ;;  %v365_v5 = vld [vmem:[#allocation4 + $0x2f8] sm:$0xff]  ;;  %v1936_v9 = vpack.c.bf16 %v363_v3, %v359_v2  ;;  %v362_v10 = vld [vmem:[#allocation4 + $0x2e0] sm:$0xff]  ;;  %v360_v11 = vld [vmem:[#allocation4 + $0x2d0] sm:$0xff] }
  0x74   : > { %v364_v12 = vld [vmem:[#allocation4 + $0x2f0] sm:$0xff]  ;;  %v2000_v13 = vpack.c.bf16 %v365_v5, %v361_v4  ;;  %v367_v14 = vld [vmem:[#allocation4 + $0x308] sm:$0xff]  ;;  %v369_v17 = vld [vmem:[#allocation4 + $0x318] sm:$0xff]  ;;  %v1938_v19 = vpack.c.bf16 %v362_v10, %v358_v7 }
  0x75   : > { %1923 = vmatpush1.bf16.msra.mxu0 %v1922_v34  ;;  %v371_v15 = vld [vmem:[#allocation4 + $0x328] sm:$0xff]  ;;  %v373_v18 = vld [vmem:[#allocation4 + $0x338] sm:$0xff]  ;;  %v2002_v20 = vpack.c.bf16 %v364_v12, %v360_v11  ;;  %v366_v22 = vld [vmem:[#allocation4 + $0x300] sm:$0xff] }
  0x76   : > { %1987 = vmatpush1.bf16.msra.mxu1 %v1986_v35  ;;  %1925 = vmatprep.subr.bf16.mxu0 %v1924_v36  ;;  %v239_v16 = vld [vmem:[%s2452_s10 + $0x8] sm:$0xff]  ;;  %v1940_v21 = vpack.c.bf16 %v371_v15, %v367_v14  ;;  %v370_v23 = vld [vmem:[#allocation4 + $0x320] sm:$0xff]  ;;  %v368_v24 = vld [vmem:[#allocation4 + $0x310] sm:$0xff]  ;;  %v2004_v25 = vpack.c.bf16 %v373_v18, %v369_v17 }
  0x77   : > { %1989 = vmatprep.subr.bf16.mxu1 %v1988_v40  ;;  %462 = vmatprep.mubr.f32.mxu0 %v239_v16  ;;  %v372_v26 = vld [vmem:[#allocation4 + $0x330] sm:$0xff]  ;;  %v375_v27 = vld [vmem:[#allocation4 + $0x348] sm:$0xff]  ;;  %v377_v29 = vld [vmem:[#allocation4 + $0x358] sm:$0xff]  ;;  %v1942_v31 = vpack.c.bf16 %v370_v23, %v366_v22 }
  0x78   : > { %623 = vmatprep.mubr.f32.mxu1 %v239_v16  ;;  %v379_v28 = vld [vmem:[#allocation4 + $0x368] sm:$0xff]  ;;  %v381_v30 = vld [vmem:[#allocation4 + $0x378] sm:$0xff]  ;;  %v2006_v32 = vpack.c.bf16 %v372_v26, %v368_v24  ;;  %v374_v34 = vld [vmem:[#allocation4 + $0x340] sm:$0xff] }
  0x79   : > { %1927 = vmatpush1.bf16.msra.mxu0 %v1926_v46  ;;  %v1944_v33 = vpack.c.bf16 %v379_v28, %v375_v27  ;;  %v378_v35 = vld [vmem:[#allocation4 + $0x360] sm:$0xff]  ;;  %v376_v36 = vld [vmem:[#allocation4 + $0x350] sm:$0xff]  ;;  %v2008_v37 = vpack.c.bf16 %v381_v30, %v377_v29  ;;  %v383_v39 = vld [vmem:[#allocation4 + $0x388] sm:$0xff] }
  0x7a   : > { %1991 = vmatpush1.bf16.msra.mxu1 %v1990_v47  ;;  %1929 = vmatprep.subr.bf16.mxu0 %v1928_v48  ;;  %v380_v38 = vld [vmem:[#allocation4 + $0x370] sm:$0xff]  ;;  %v387_v40 = vld [vmem:[#allocation4 + $0x3a8] sm:$0xff]  ;;  %v385_v41 = vld [vmem:[#allocation4 + $0x398] sm:$0xff]  ;;  %v1946_v43 = vpack.c.bf16 %v378_v35, %v374_v34 }
  0x7b   : > { %1993 = vmatprep.subr.bf16.mxu1 %v1992_v52  ;;  %v389_v42 = vld [vmem:[#allocation4 + $0x3b8] sm:$0xff]  ;;  %v2010_v44 = vpack.c.bf16 %v380_v38, %v376_v36  ;;  %v1948_v45 = vpack.c.bf16 %v387_v40, %v383_v39  ;;  %v382_v46 = vld [vmem:[#allocation4 + $0x380] sm:$0xff]  ;;  %v384_v48 = vld [vmem:[#allocation4 + $0x390] sm:$0xff] }
  0x7c   : > { %v386_v47 = vld [vmem:[#allocation4 + $0x3a0] sm:$0xff]  ;;  %v2012_v49 = vpack.c.bf16 %v389_v42, %v385_v41  ;;  %v388_v50 = vld [vmem:[#allocation4 + $0x3b0] sm:$0xff]  ;;  %v391_v51 = vld [vmem:[#allocation4 + $0x3c8] sm:$0xff] }
  0x7d   : > { %1931 = vmatpush1.bf16.msra.mxu0 %v1930_v58  ;;  %v395_v52 = vld [vmem:[#allocation4 + $0x3e8] sm:$0xff]  ;;  %v393_v53 = vld [vmem:[#allocation4 + $0x3d8] sm:$0xff]  ;;  %v1950_v55 = vpack.c.bf16 %v386_v47, %v382_v46  ;;  %v2014_v56 = vpack.c.bf16 %v388_v50, %v384_v48  ;;  %v390_v58 = vld [vmem:[#allocation4 + $0x3c0] sm:$0xff] }
  0x7e   : > { %1995 = vmatpush1.bf16.msra.mxu1 %v1994_v59  ;;  %1933 = vmatprep.subr.bf16.mxu0 %v1932_v60  ;;  %v397_v54 = vld [vmem:[#allocation4 + $0x3f8] sm:$0xff]  ;;  %v1952_v57 = vpack.c.bf16 %v395_v52, %v391_v51  ;;  %v394_v59 = vld [vmem:[#allocation4 + $0x3e0] sm:$0xff]  ;;  %v392_v61 = vld [vmem:[#allocation4 + $0x3d0] sm:$0xff] }
  0x7f   : > { %1997 = vmatprep.subr.bf16.mxu1 %v1996_v0  ;;  %v2016_v60 = vpack.c.bf16 %v397_v54, %v393_v53  ;;  %v396_v62 = vld [vmem:[#allocation4 + $0x3f0] sm:$0xff]  ;;  %v1954_v63 = vpack.c.bf16 %v394_v59, %v390_v58  ;;  %v238_v1 = vld [vmem:[%s2452_s10] sm:$0xff]  ;;  %v241_v2 = vld [vmem:[%s2452_s10 + $0x18] sm:$0xff] }
  0x80   : > { %v2018_v0 = vpack.c.bf16 %v396_v62, %v392_v61  ;;  %v240_v3 = vld [vmem:[%s2452_s10 + $0x10] sm:$0xff]  ;;  %v243_v4 = vld [vmem:[%s2452_s10 + $0x28] sm:$0xff]  ;;  %v242_v5 = vld [vmem:[%s2452_s10 + $0x20] sm:$0xff] }
  0x81   : > { %1935 = vmatpush1.bf16.msra.mxu0 %v1934_v6  ;;  %v245_v6 = vld [vmem:[%s2452_s10 + $0x38] sm:$0xff]  ;;  %v244_v7 = vld [vmem:[%s2452_s10 + $0x30] sm:$0xff]  ;;  %v251_v12 = vld [vmem:[%s2452_s10 + $0x68] sm:$0xff] }
  0x82   : > { %1999 = vmatpush1.bf16.msra.mxu1 %v1998_v8  ;;  %1937 = vmatprep.subr.bf16.mxu0 %v1936_v9  ;;  %v247_v8 = vld [vmem:[%s2452_s10 + $0x48] sm:$0xff]  ;;  %v246_v9 = vld [vmem:[%s2452_s10 + $0x40] sm:$0xff]  ;;  %v249_v10 = vld [vmem:[%s2452_s10 + $0x58] sm:$0xff] }
  0x83   : > { %2001 = vmatprep.subr.bf16.mxu1 %v2000_v13  ;;  %v248_v11 = vld [vmem:[%s2452_s10 + $0x50] sm:$0xff]  ;;  %v250_v13 = vld [vmem:[%s2452_s10 + $0x60] sm:$0xff]  ;;  %v253_v14 = vld [vmem:[%s2452_s10 + $0x78] sm:$0xff] }
  0x84   : > { %v252_v15 = vld [vmem:[%s2452_s10 + $0x70] sm:$0xff]  ;;  %v255_v16 = vld [vmem:[%s2452_s10 + $0x88] sm:$0xff]  ;;  %v254_v17 = vld [vmem:[%s2452_s10 + $0x80] sm:$0xff] }
  0x85   : > { %1939 = vmatpush1.bf16.msra.mxu0 %v1938_v19  ;;  %v257_v18 = vld [vmem:[%s2452_s10 + $0x98] sm:$0xff]  ;;  %v256_v19 = vld [vmem:[%s2452_s10 + $0x90] sm:$0xff]  ;;  %v263_v24 = vld [vmem:[%s2452_s10 + $0xc8] sm:$0xff] }
  0x86   : > { %2003 = vmatpush1.bf16.msra.mxu1 %v2002_v20  ;;  %1941 = vmatprep.subr.bf16.mxu0 %v1940_v21  ;;  %v259_v20 = vld [vmem:[%s2452_s10 + $0xa8] sm:$0xff]  ;;  %v258_v21 = vld [vmem:[%s2452_s10 + $0xa0] sm:$0xff]  ;;  %v261_v22 = vld [vmem:[%s2452_s10 + $0xb8] sm:$0xff] }
  0x87   : > { %2005 = vmatprep.subr.bf16.mxu1 %v2004_v25  ;;  %v260_v23 = vld [vmem:[%s2452_s10 + $0xb0] sm:$0xff]  ;;  %v262_v25 = vld [vmem:[%s2452_s10 + $0xc0] sm:$0xff]  ;;  %v265_v26 = vld [vmem:[%s2452_s10 + $0xd8] sm:$0xff] }
  0x88   : > { %v264_v27 = vld [vmem:[%s2452_s10 + $0xd0] sm:$0xff]  ;;  %v267_v28 = vld [vmem:[%s2452_s10 + $0xe8] sm:$0xff]  ;;  %v266_v29 = vld [vmem:[%s2452_s10 + $0xe0] sm:$0xff] }
  0x89   : > { %1943 = vmatpush1.bf16.msra.mxu0 %v1942_v31  ;;  %v269_v30 = vld [vmem:[%s2452_s10 + $0xf8] sm:$0xff]  ;;  %v268_v31 = vld [vmem:[%s2452_s10 + $0xf0] sm:$0xff] }
  0x8a   : > { %2007 = vmatpush1.bf16.msra.mxu1 %v2006_v32  ;;  %1945 = vmatprep.subr.bf16.mxu0 %v1944_v33 }
  0x8b   : > { %2009 = vmatprep.subr.bf16.mxu1 %v2008_v37 }
  0x8d   : > { %1947 = vmatpush1.bf16.msra.mxu0 %v1946_v43 }
  0x8e   : > { %2011 = vmatpush1.bf16.msra.mxu1 %v2010_v44  ;;  %1949 = vmatprep.subr.bf16.mxu0 %v1948_v45 }
  0x8f   : > { %2013 = vmatprep.subr.bf16.mxu1 %v2012_v49 }
  0x91   : > { %1951 = vmatpush1.bf16.msra.mxu0 %v1950_v55 }
  0x92   : > { %2015 = vmatpush1.bf16.msra.mxu1 %v2014_v56  ;;  %1953 = vmatprep.subr.bf16.mxu0 %v1952_v57 }
  0x93   : > { %2017 = vmatprep.subr.bf16.mxu1 %v2016_v60 }
  0x95   : > { %1955 = vmatpush1.bf16.msra.mxu0 %v1954_v63 }
  0x96   : > { %2019 = vmatpush1.bf16.msra.mxu1 %v2018_v0 }
  0x98   : > { %463 = vmatmul.mubr.f32.vlgmr.msra.gmra.mrb[0].mxu0 %v238_v1 }
  0x99   : > { %624 = vmatmul.mubr.f32.vlgmr.msra.gmra.mrb[0].mxu1 %v238_v1  ;;  %468 = vmatprep.mubr.f32.mxu0 %v241_v2 }
  0x9a   : > { %629 = vmatprep.mubr.f32.mxu1 %v241_v2 }
  0x9c   : > { %469 = vmatmul.mubr.f32.gmra.mrb[2].mxu0 %v240_v3 }
  0x9d   : > { %630 = vmatmul.mubr.f32.gmra.mrb[2].mxu1 %v240_v3  ;;  %474 = vmatprep.mubr.f32.mxu0 %v243_v4 }
  0x9e   : > { %635 = vmatprep.mubr.f32.mxu1 %v243_v4 }
  0xa0   : > { %475 = vmatmul.mubr.f32.gmra.mrb[4].mxu0 %v242_v5 }
  0xa1   : > { %480 = vmatprep.mubr.f32.mxu0 %v245_v6  ;;  %636 = vmatmul.mubr.f32.gmra.mrb[4].mxu1 %v242_v5 }
  0xa2   : > { %641 = vmatprep.mubr.f32.mxu1 %v245_v6 }
  0xa4   : > { %481 = vmatmul.mubr.f32.gmra.mrb[6].mxu0 %v244_v7 }
  0xa5   : > { %642 = vmatmul.mubr.f32.gmra.mrb[6].mxu1 %v244_v7  ;;  %486 = vmatprep.mubr.f32.mxu0 %v247_v8 }
  0xa6   : > { %647 = vmatprep.mubr.f32.mxu1 %v247_v8 }
  0xa8   : > { %487 = vmatmul.mubr.f32.gmra.mrb[8].mxu0 %v246_v9 }
  0xa9   : > { %492 = vmatprep.mubr.f32.mxu0 %v249_v10  ;;  %648 = vmatmul.mubr.f32.gmra.mrb[8].mxu1 %v246_v9 }
  0xaa   : > { %653 = vmatprep.mubr.f32.mxu1 %v249_v10 }
  0xac   : > { %493 = vmatmul.mubr.f32.gmra.mrb[10].mxu0 %v248_v11 }
  0xad   : > { %654 = vmatmul.mubr.f32.gmra.mrb[10].mxu1 %v248_v11  ;;  %498 = vmatprep.mubr.f32.mxu0 %v251_v12 }
  0xae   : > { %659 = vmatprep.mubr.f32.mxu1 %v251_v12 }
  0xb0   : > { %499 = vmatmul.mubr.f32.gmra.mrb[12].mxu0 %v250_v13 }
  0xb1   : > { %504 = vmatprep.mubr.f32.mxu0 %v253_v14  ;;  %660 = vmatmul.mubr.f32.gmra.mrb[12].mxu1 %v250_v13 }
  0xb2   : > { %665 = vmatprep.mubr.f32.mxu1 %v253_v14 }
  0xb4   : > { %505 = vmatmul.mubr.f32.gmra.mrb[14].mxu0 %v252_v15 }
  0xb5   : > { %666 = vmatmul.mubr.f32.gmra.mrb[14].mxu1 %v252_v15  ;;  %510 = vmatprep.mubr.f32.mxu0 %v255_v16 }
  0xb6   : > { %671 = vmatprep.mubr.f32.mxu1 %v255_v16 }
  0xb8   : > { %511 = vmatmul.mubr.f32.gmra.mrb[16].mxu0 %v254_v17 }
  0xb9   : > { %516 = vmatprep.mubr.f32.mxu0 %v257_v18  ;;  %672 = vmatmul.mubr.f32.gmra.mrb[16].mxu1 %v254_v17 }
  0xba   : > { %677 = vmatprep.mubr.f32.mxu1 %v257_v18 }
  0xbc   : > { %517 = vmatmul.mubr.f32.gmra.mrb[18].mxu0 %v256_v19 }
  0xbd   : > { %678 = vmatmul.mubr.f32.gmra.mrb[18].mxu1 %v256_v19  ;;  %522 = vmatprep.mubr.f32.mxu0 %v259_v20 }
  0xbe   : > { %683 = vmatprep.mubr.f32.mxu1 %v259_v20 }
  0xc0   : > { %523 = vmatmul.mubr.f32.gmra.mrb[20].mxu0 %v258_v21 }
  0xc1   : > { %528 = vmatprep.mubr.f32.mxu0 %v261_v22  ;;  %684 = vmatmul.mubr.f32.gmra.mrb[20].mxu1 %v258_v21 }
  0xc2   : > { %689 = vmatprep.mubr.f32.mxu1 %v261_v22 }
  0xc4   : > { %529 = vmatmul.mubr.f32.gmra.mrb[22].mxu0 %v260_v23 }
  0xc5   : > { %690 = vmatmul.mubr.f32.gmra.mrb[22].mxu1 %v260_v23  ;;  %534 = vmatprep.mubr.f32.mxu0 %v263_v24 }
  0xc6   : > { %695 = vmatprep.mubr.f32.mxu1 %v263_v24 }
  0xc8   : > { %535 = vmatmul.mubr.f32.gmra.mrb[24].mxu0 %v262_v25 }
  0xc9   : > { %540 = vmatprep.mubr.f32.mxu0 %v265_v26  ;;  %696 = vmatmul.mubr.f32.gmra.mrb[24].mxu1 %v262_v25 }
  0xca   : > { %701 = vmatprep.mubr.f32.mxu1 %v265_v26 }
  0xcc   : > { %541 = vmatmul.mubr.f32.gmra.mrb[26].mxu0 %v264_v27 }
  0xcd   : > { %702 = vmatmul.mubr.f32.gmra.mrb[26].mxu1 %v264_v27  ;;  %546 = vmatprep.mubr.f32.mxu0 %v267_v28 }
  0xce   : > { %707 = vmatprep.mubr.f32.mxu1 %v267_v28 }
  0xd0   : > { %547 = vmatmul.mubr.f32.gmra.mrb[28].mxu0 %v266_v29 }
  0xd1   : > { %708 = vmatmul.mubr.f32.gmra.mrb[28].mxu1 %v266_v29  ;;  %552 = vmatprep.mubr.f32.mxu0 %v269_v30 }
  0xd2   : > { %713 = vmatprep.mubr.f32.mxu1 %v269_v30 }
  0xd4   : > { %553 = vmatmul.mubr.f32.gmra.mrb[30].mxu0 %v268_v31 }
  0xd5   : > { %714 = vmatmul.mubr.f32.gmra.mrb[30].mxu1 %v268_v31 }
 0x16b   : > { %v2494_v32 = vpop.f32.mrb[0].mxu0 }
 0x16c   : > { %v2496_v33 = vpop.f32.mrb[0].mxu1  ;;  %722 = vadd.xlane.f32.xlu0 %v2494_v32  ;;  %v2499_v34 = vpop.f32.mrb[1].mxu0  ;;  %v770_v48 = vmul.f32 %v2494_v32, %v2494_v32 }
 0x16d   : > { %v2501_v35 = vpop.f32.mrb[1].mxu1  ;;  %v1294_v54 = vmul.f32 %v2496_v33, %v2496_v33  ;;  %v1038_v60 = vmul.f32 %v2499_v34, %v2499_v34 }
 0x16e   : > { %v1551_v2 = vmul.f32 %v2501_v35, %v2501_v35 }
 0x16f   : > { %v2503_v36 = vpop.f32.mrb[2].mxu0 }
 0x170   : > { %v2505_v37 = vpop.f32.mrb[2].mxu1  ;;  %1246 = vadd.xlane.f32.xlu0 %v2496_v33  ;;  %v2508_v38 = vpop.f32.mrb[3].mxu0  ;;  %v771_v49 = vmul.f32 %v2503_v36, %v2503_v36 }
 0x171   : > { %1248 = vadd.xlane.f32.xlu1 %v2505_v37  ;;  %v2511_v39 = vpop.f32.mrb[3].mxu1  ;;  %v1295_v55 = vmul.f32 %v2505_v37, %v2505_v37  ;;  %v1039_v61 = vmul.f32 %v2508_v38, %v2508_v38 }
 0x172   : > { %v1552_v3 = vmul.f32 %v2511_v39, %v2511_v39 }
 0x173   : > { %v2513_v40 = vpop.f32.mrb[4].mxu0 }
 0x174   : > { %990 = vadd.xlane.f32.xlu0 %v2499_v34  ;;  %v2516_v41 = vpop.f32.mrb[5].mxu0  ;;  %v2518_v42 = vpop.f32.mrb[4].mxu1  ;;  %v772_v24 = vmul.f32 %v2513_v40, %v2513_v40 }
 0x175   : > { %992 = vadd.xlane.f32.xlu1 %v2508_v38  ;;  %v2521_v43 = vpop.f32.mrb[5].mxu1  ;;  %v1296_v25 = vmul.f32 %v2518_v42, %v2518_v42  ;;  %v1040_v27 = vmul.f32 %v2516_v41, %v2516_v41 }
 0x176   : > { %v1553_v29 = vmul.f32 %v2521_v43, %v2521_v43 }
 0x177   : > { %v2523_v44 = vpop.f32.mrb[6].mxu0 }
 0x178   : > { %1503 = vadd.xlane.f32.xlu0 %v2501_v35  ;;  %v2526_v45 = vpop.f32.mrb[7].mxu0  ;;  %v2528_v46 = vpop.f32.mrb[6].mxu1  ;;  %v773_v26 = vmul.f32 %v2523_v44, %v2523_v44 }
 0x179   : > { %1505 = vadd.xlane.f32.xlu1 %v2511_v39  ;;  %v2531_v47 = vpop.f32.mrb[7].mxu1  ;;  %v1297_v28 = vmul.f32 %v2528_v46, %v2528_v46  ;;  %v1041_v30 = vmul.f32 %v2526_v45, %v2526_v45 }
 0x17a   : > { %v1554_v31 = vmul.f32 %v2531_v47, %v2531_v47 }
 0x17b   : > { %v2537_v50 = vpop.f32.mrb[8].mxu0 }
 0x17c   : > { %786 = vadd.xlane.f32.xlu0 %v770_v48  ;;  %v2539_v51 = vpop.f32.mrb[9].mxu0  ;;  %v2541_v52 = vpop.f32.mrb[8].mxu1 }
 0x17d   : > { %3473 = vst [vmem:[#allocation8_spill] sm:$0xff] %v2539_v51  ;;  %3474 = vst [vmem:[#allocation9_spill] sm:$0xff] %v2541_v52  ;;  %788 = vadd.xlane.f32.xlu1 %v771_v49  ;;  %v2543_v53 = vpop.f32.mrb[9].mxu1 }
 0x17e   : > { %3475 = vst [vmem:[#allocation10_spill] sm:$0xff] %v2543_v53 }
 0x17f   : > { %v2549_v56 = vpop.f32.mrb[10].mxu0 }
 0x180   : > { %3476 = vst [vmem:[#allocation11_spill] sm:$0xff] %v2549_v56  ;;  %1310 = vadd.xlane.f32.xlu0 %v1294_v54  ;;  %v2551_v57 = vpop.f32.mrb[11].mxu0  ;;  %v2553_v58 = vpop.f32.mrb[10].mxu1 }
 0x181   : > { %3477 = vst [vmem:[#allocation12_spill] sm:$0xff] %v2551_v57  ;;  %3478 = vst [vmem:[#allocation13_spill] sm:$0xff] %v2553_v58  ;;  %1312 = vadd.xlane.f32.xlu1 %v1295_v55  ;;  %v2555_v59 = vpop.f32.mrb[11].mxu1 }
 0x182   : > { %3479 = vst [vmem:[#allocation14_spill] sm:$0xff] %v2555_v59 }
 0x183   : > { %v2561_v62 = vpop.f32.mrb[12].mxu0 }
 0x184   : > { %3480 = vst [vmem:[#allocation15_spill] sm:$0xff] %v2561_v62  ;;  %1054 = vadd.xlane.f32.xlu0 %v1038_v60  ;;  %v2563_v63 = vpop.f32.mrb[13].mxu0  ;;  %v2565_v0 = vpop.f32.mrb[12].mxu1 }
 0x185   : > { %3481 = vst [vmem:[#allocation16_spill] sm:$0xff] %v2563_v63  ;;  %3482 = vst [vmem:[#allocation17_spill] sm:$0xff] %v2565_v0  ;;  %1056 = vadd.xlane.f32.xlu1 %v1039_v61  ;;  %v2567_v1 = vpop.f32.mrb[13].mxu1 }
 0x186   : > { %3483 = vst [vmem:[#allocation18_spill] sm:$0xff] %v2567_v1 }
 0x187   : > { %v2573_v4 = vpop.f32.mrb[14].mxu0 }
 0x188   : > { %3484 = vst [vmem:[#allocation19_spill] sm:$0xff] %v2573_v4  ;;  %1567 = vadd.xlane.f32.xlu0 %v1551_v2  ;;  %v2575_v5 = vpop.f32.mrb[15].mxu0  ;;  %v2577_v6 = vpop.f32.mrb[14].mxu1 }
 0x189   : > { %3485 = vst [vmem:[#allocation20_spill] sm:$0xff] %v2575_v5  ;;  %3486 = vst [vmem:[#allocation21_spill] sm:$0xff] %v2577_v6  ;;  %1569 = vadd.xlane.f32.xlu1 %v1552_v3  ;;  %v2579_v7 = vpop.f32.mrb[15].mxu1 }
 0x18a   : > { %3487 = vst [vmem:[#allocation22_spill] sm:$0xff] %v2579_v7 }
 0x18b   : > { %v2581_v8 = vpop.f32.mrb[16].mxu0 }
 0x18c   : > { %3488 = vst [vmem:[#allocation23_spill] sm:$0xff] %v2581_v8  ;;  %724 = vadd.xlane.f32.xlu0 %v2503_v36  ;;  %v2584_v9 = vpop.f32.mrb[17].mxu0  ;;  %v2586_v10 = vpop.f32.mrb[16].mxu1 }
 0x18d   : > { %3489 = vst [vmem:[#allocation24_spill] sm:$0xff] %v2584_v9  ;;  %3490 = vst [vmem:[#allocation25_spill] sm:$0xff] %v2586_v10  ;;  %726 = vadd.xlane.f32.xlu1 %v2513_v40  ;;  %v2589_v11 = vpop.f32.mrb[17].mxu1 }
 0x18e   : > { %3491 = vst [vmem:[#allocation26_spill] sm:$0xff] %v2589_v11 }
 0x18f   : > { %v2591_v12 = vpop.f32.mrb[18].mxu0 }
 0x190   : > { %3492 = vst [vmem:[#allocation27_spill] sm:$0xff] %v2591_v12  ;;  %1250 = vadd.xlane.f32.xlu0 %v2518_v42  ;;  %v2594_v13 = vpop.f32.mrb[19].mxu0  ;;  %v2596_v14 = vpop.f32.mrb[18].mxu1 }
 0x191   : > { %3493 = vst [vmem:[#allocation28_spill] sm:$0xff] %v2594_v13  ;;  %3494 = vst [vmem:[#allocation29_spill] sm:$0xff] %v2596_v14  ;;  %728 = vadd.xlane.f32.xlu1 %v2523_v44  ;;  %v2599_v15 = vpop.f32.mrb[19].mxu1 }
 0x192   : > { %3495 = vst [vmem:[#allocation30_spill] sm:$0xff] %v2599_v15 }
 0x193   : > { %v2601_v16 = vpop.f32.mrb[20].mxu0 }
 0x194   : > { %994 = vadd.xlane.f32.xlu0 %v2516_v41  ;;  %v2604_v17 = vpop.f32.mrb[21].mxu0  ;;  %v2606_v18 = vpop.f32.mrb[20].mxu1 }
 0x195   : > { %1252 = vadd.xlane.f32.xlu1 %v2528_v46  ;;  %v2609_v19 = vpop.f32.mrb[21].mxu1 }
 0x197   : > { %v2611_v20 = vpop.f32.mrb[22].mxu0 }
 0x198   : > { %1507 = vadd.xlane.f32.xlu0 %v2521_v43  ;;  %v2614_v21 = vpop.f32.mrb[23].mxu0  ;;  %v2616_v22 = vpop.f32.mrb[22].mxu1 }
 0x199   : > { %996 = vadd.xlane.f32.xlu1 %v2526_v45  ;;  %v2619_v23 = vpop.f32.mrb[23].mxu1 }
 0x19b   : > { %v2638_v48 = vpop.f32.mrb[24].mxu0 }
 0x19c   : > { %790 = vadd.xlane.f32.xlu0 %v772_v24  ;;  %v2641_v49 = vpop.f32.mrb[25].mxu0  ;;  %v2645_v55 = vpop.f32.mrb[24].mxu1  ;;  %v774_v24 = vmul.f32 %v2537_v50, %v2537_v50 }
 0x19d   : > { %1509 = vadd.xlane.f32.xlu1 %v2531_v47  ;;  %v2650_v61 = vpop.f32.mrb[25].mxu1 }
 0x19f   : > { %v2643_v54 = vpop.f32.mrb[26].mxu0 }
 0x1a0   : > { %1314 = vadd.xlane.f32.xlu0 %v1296_v25  ;;  %v2648_v60 = vpop.f32.mrb[27].mxu0  ;;  %v2653_v2 = vpop.f32.mrb[26].mxu1  ;;  %v1298_v25 = vmul.f32 %v2541_v52, %v2541_v52 }
 0x1a1   : > { %792 = vadd.xlane.f32.xlu1 %v773_v26  ;;  %v2656_v3 = vpop.f32.mrb[27].mxu1  ;;  %v775_v26 = vmul.f32 %v2549_v56, %v2549_v56 }
 0x1a4   : > { %1058 = vadd.xlane.f32.xlu0 %v1040_v27  ;;  %v1042_v27 = vmul.f32 %v2539_v51, %v2539_v51 }
 0x1a5   : > { %1316 = vadd.xlane.f32.xlu1 %v1297_v28  ;;  %v1299_v28 = vmul.f32 %v2553_v58, %v2553_v58 }
 0x1a8   : > { %1571 = vadd.xlane.f32.xlu0 %v1553_v29  ;;  %v1555_v29 = vmul.f32 %v2543_v53, %v2543_v53 }
 0x1a9   : > { %1060 = vadd.xlane.f32.xlu1 %v1041_v30  ;;  %v1043_v30 = vmul.f32 %v2551_v57, %v2551_v57 }
 0x1ac   : > { %730 = vadd.xlane.f32.xlu0 %v2537_v50 }
 0x1ad   : > { %1573 = vadd.xlane.f32.xlu1 %v1554_v31  ;;  %v1556_v31 = vmul.f32 %v2555_v59, %v2555_v59 }
 0x1b0   : > { %1254 = vadd.xlane.f32.xlu0 %v2541_v52 }
 0x1b1   : > { %732 = vadd.xlane.f32.xlu1 %v2549_v56 }
 0x1b4   : > { %998 = vadd.xlane.f32.xlu0 %v2539_v51  ;;  %v1301_v51 = vmul.f32 %v2577_v6, %v2577_v6 }
 0x1b5   : > { %1256 = vadd.xlane.f32.xlu1 %v2553_v58  ;;  %v1044_v58 = vmul.f32 %v2563_v63, %v2563_v63 }
 0x1b8   : > { %1511 = vadd.xlane.f32.xlu0 %v2543_v53  ;;  %v777_v53 = vmul.f32 %v2573_v4, %v2573_v4 }
 0x1b9   : > { %1000 = vadd.xlane.f32.xlu1 %v2551_v57  ;;  %v1300_v57 = vmul.f32 %v2565_v0, %v2565_v0 }
 0x1bc   : > { %794 = vadd.xlane.f32.xlu0 %v774_v24  ;;  %v2678_v24 = vpop.f32.mrb[28].mxu0 }
 0x1bd   : > { %1513 = vadd.xlane.f32.xlu1 %v2555_v59 }
 0x1c0   : > { %1318 = vadd.xlane.f32.xlu0 %v1298_v25  ;;  %v2681_v25 = vpop.f32.mrb[29].mxu0 }
 0x1c1   : > { %796 = vadd.xlane.f32.xlu1 %v775_v26  ;;  %v2683_v26 = vpop.f32.mrb[30].mxu0 }
 0x1c4   : > { %1062 = vadd.xlane.f32.xlu0 %v1042_v27  ;;  %v2685_v27 = vpop.f32.mrb[28].mxu1 }
 0x1c5   : > { %1320 = vadd.xlane.f32.xlu1 %v1299_v28  ;;  %v2688_v28 = vpop.f32.mrb[31].mxu0 }
 0x1c8   : > { %1575 = vadd.xlane.f32.xlu0 %v1555_v29  ;;  %v2690_v29 = vpop.f32.mrb[29].mxu1 }
 0x1c9   : > { %1064 = vadd.xlane.f32.xlu1 %v1043_v30  ;;  %v2693_v30 = vpop.f32.mrb[30].mxu1 }
 0x1ca   : > { %v2696_v59 = vpop.f32.mrb[31].mxu1 }
 0x1cb   : > { %3496 = vst [vmem:[#allocation31_spill] sm:$0xff] %v2696_v59 }
 0x1cc   : > { %734 = vadd.xlane.f32.xlu0 %v2561_v62 }
 0x1cd   : > { %1577 = vadd.xlane.f32.xlu1 %v1556_v31  ;;  %v776_v31 = vmul.f32 %v2561_v62, %v2561_v62  ;;  %v1045_v62 = vmul.f32 %v2575_v5, %v2575_v5 }
 0x1d0   : > { %1258 = vadd.xlane.f32.xlu0 %v2565_v0 }
 0x1d1   : > { %736 = vadd.xlane.f32.xlu1 %v2573_v4 }
 0x1d4   : > { %1002 = vadd.xlane.f32.xlu0 %v2563_v63 }
 0x1d5   : > { %1260 = vadd.xlane.f32.xlu1 %v2577_v6 }
 0x1d8   : > { %1515 = vadd.xlane.f32.xlu0 %v2567_v1 }
 0x1d9   : > { %1004 = vadd.xlane.f32.xlu1 %v2575_v5 }
 0x1dc   : > { %798 = vadd.xlane.f32.xlu0 %v776_v31  ;;  %v1557_v31 = vmul.f32 %v2567_v1, %v2567_v1  ;;  %v1046_v1 = vmul.f32 %v2584_v9, %v2584_v9 }
 0x1dd   : > { %1517 = vadd.xlane.f32.xlu1 %v2579_v7 }
 0x1e0   : > { %1322 = vadd.xlane.f32.xlu0 %v1300_v57  ;;  %v1558_v57 = vmul.f32 %v2579_v7, %v2579_v7 }
 0x1e1   : > { %800 = vadd.xlane.f32.xlu1 %v777_v53  ;;  %v778_v53 = vmul.f32 %v2581_v8, %v2581_v8 }
 0x1e4   : > { %1066 = vadd.xlane.f32.xlu0 %v1044_v58 }
 0x1e5   : > { %1324 = vadd.xlane.f32.xlu1 %v1301_v51 }
 0x1e8   : > { %1579 = vadd.xlane.f32.xlu0 %v1557_v31  ;;  %v1302_v31 = vmul.f32 %v2586_v10, %v2586_v10 }
 0x1e9   : > { %1068 = vadd.xlane.f32.xlu1 %v1045_v62 }
 0x1ec   : > { %738 = vadd.xlane.f32.xlu0 %v2581_v8 }
 0x1ed   : > { %1581 = vadd.xlane.f32.xlu1 %v1558_v57  ;;  %v779_v57 = vmul.f32 %v2591_v12, %v2591_v12 }
 0x1f0   : > { %1262 = vadd.xlane.f32.xlu0 %v2586_v10  ;;  %v1559_v10 = vmul.f32 %v2589_v11, %v2589_v11 }
 0x1f1   : > { %740 = vadd.xlane.f32.xlu1 %v2591_v12  ;;  %v1047_v12 = vmul.f32 %v2594_v13, %v2594_v13 }
 0x1f4   : > { %1006 = vadd.xlane.f32.xlu0 %v2584_v9 }
 0x1f5   : > { %1264 = vadd.xlane.f32.xlu1 %v2596_v14 }
 0x1f8   : > { %1519 = vadd.xlane.f32.xlu0 %v2589_v11  ;;  %v1560_v11 = vmul.f32 %v2599_v15, %v2599_v15 }
 0x1f9   : > { %1008 = vadd.xlane.f32.xlu1 %v2594_v13  ;;  %v723_v51 = vpop.xlane.xlu0 %722 }
 0x1fc   : > { %802 = vadd.xlane.f32.xlu0 %v778_v53  ;;  %v1303_v53 = vmul.f32 %v2596_v14, %v2596_v14 }
 0x1fd   : > { %1521 = vadd.xlane.f32.xlu1 %v2599_v15  ;;  %v1247_v58 = vpop.xlane.xlu0 %1246 }
 0x1fe   : > { %v1249_v62 = vpop.xlane.xlu1 %1248  ;;  %v2744_v63 = vmul.f32 0.0078125, %v1247_v58 }
 0x1ff   : > { %v2748_v14 = vmul.f32 0.0078125, %v1249_v62 }
 0x200   : > { %1326 = vadd.xlane.f32.xlu0 %v1302_v31  ;;  %v2740_v31 = vmul.f32 0.0078125, %v723_v51 }
 0x201   : > { %804 = vadd.xlane.f32.xlu1 %v779_v57  ;;  %v991_v7 = vpop.xlane.xlu0 %990  ;;  %v1359_v62 = vmul.f32 %v2748_v14, %v2748_v14 }
 0x202   : > { %v993_v5 = vpop.xlane.xlu1 %992  ;;  %v834_v9 = vmul.f32 %v2740_v31, %v2740_v31  ;;  %v2755_v51 = vmul.f32 0.0078125, %v991_v7 }
 0x203   : > { %v2759_v0 = vmul.f32 0.0078125, %v993_v5 }
 0x204   : > { %1070 = vadd.xlane.f32.xlu0 %v1046_v1 }
 0x205   : > { %1328 = vadd.xlane.f32.xlu1 %v1303_v53  ;;  %v1504_v8 = vpop.xlane.xlu0 %1503 }
 0x206   : > { %v1506_v6 = vpop.xlane.xlu1 %1505 }
 0x207   : > { %v2771_v59 = vmul.f32 0.0078125, %v1506_v6 }
 0x208   : > { %1583 = vadd.xlane.f32.xlu0 %v1559_v10 }
 0x209   : > { %1072 = vadd.xlane.f32.xlu1 %v1047_v12  ;;  %v787_v57 = vpop.xlane.xlu0 %786  ;;  %v1358_v12 = vmul.f32 %v2744_v63, %v2744_v63  ;;  %v1616_v6 = vmul.f32 %v2771_v59, %v2771_v59 }
 0x20a   : > { %v818_v1 = vmul.f32 0.0078125, %v787_v57  ;;  %v2746_v53 = vpop.xlane.xlu1 %788 }
 0x20c   : > { %v850_v13 = vsub.f32 %v818_v1, %v834_v9  ;;  %742 = vadd.xlane.f32.xlu0 %v2601_v16  ;;  %v2767_v1 = vmul.f32 0.0078125, %v1504_v8 }
 0x20d   : > { %1585 = vadd.xlane.f32.xlu1 %v1560_v11  ;;  %v1311_v10 = vpop.xlane.xlu0 %1310 }
 0x20e   : > { %v866_v58 = vadd.f32 1e-05, %v850_v13  ;;  %v1342_v57 = vmul.f32 0.0078125, %v1311_v10  ;;  %v1313_v4 = vpop.xlane.xlu1 %1312  ;;  %v1102_v13 = vmul.f32 %v2755_v51, %v2755_v51 }
 0x20f   : > { %v1343_v56 = vmul.f32 0.0078125, %v1313_v4  ;;  %v1103_v4 = vmul.f32 %v2759_v0, %v2759_v0 }
 0x210   : > { %2074 = vrsqrt.f32 %v866_v58  ;;  %v1374_v9 = vsub.f32 %v1342_v57, %v1358_v12  ;;  %1266 = vadd.xlane.f32.xlu0 %v2606_v18 }
 0x211   : > { %v1375_v11 = vsub.f32 %v1343_v56, %v1359_v62  ;;  %744 = vadd.xlane.f32.xlu1 %v2611_v20  ;;  %v1055_v7 = vpop.xlane.xlu0 %1054  ;;  %v1615_v62 = vmul.f32 %v2767_v1, %v2767_v1 }
 0x212   : > { %v1390_v10 = vadd.f32 1e-05, %v1374_v9  ;;  %v1086_v15 = vmul.f32 0.0078125, %v1055_v7  ;;  %v1057_v5 = vpop.xlane.xlu1 %1056 }
 0x213   : > { %v1391_v12 = vadd.f32 1e-05, %v1375_v11  ;;  %v1087_v58 = vmul.f32 0.0078125, %v1057_v5 }
 0x214   : > { %2076 = vrsqrt.f32 %v1390_v10  ;;  %v1118_v56 = vsub.f32 %v1086_v15, %v1102_v13  ;;  %1010 = vadd.xlane.f32.xlu0 %v2604_v17  ;;  %v898_v10 = vsub.f32 %v2494_v32, %v2740_v31 }
 0x215   : > { %2078 = vrsqrt.f32 %v1391_v12  ;;  %v1119_v57 = vsub.f32 %v1087_v58, %v1103_v4  ;;  %1268 = vadd.xlane.f32.xlu1 %v2616_v22  ;;  %v1568_v8 = vpop.xlane.xlu0 %1567  ;;  %v2789_v58 = vld [vmem:[%s3434_s2] ss:$0 sm:$0xff] }
 0x216   : > { %v1134_v9 = vadd.f32 1e-05, %v1118_v56  ;;  %v1599_v7 = vmul.f32 0.0078125, %v1568_v8  ;;  %v1570_v52 = vpop.xlane.xlu1 %1569  ;;  %v780_v8 = vmul.f32 %v2601_v16, %v2601_v16 }
 0x217   : > { %v1135_v15 = vadd.f32 1e-05, %v1119_v57  ;;  %v1600_v11 = vmul.f32 0.0078125, %v1570_v52 }
 0x218   : > { %2080 = vrsqrt.f32 %v1134_v9  ;;  %v1631_v13 = vsub.f32 %v1599_v7, %v1615_v62  ;;  %1523 = vadd.xlane.f32.xlu0 %v2609_v19  ;;  %v2799_v62 = vld [vmem:[%s3435_s3] ss:$0 sm:$0xff]  ;;  %v819_v9 = vmul.f32 0.0078125, %v2746_v53 }
 0x219   : > { %2082 = vrsqrt.f32 %v1135_v15  ;;  %v1632_v5 = vsub.f32 %v1600_v11, %v1616_v6  ;;  %1012 = vadd.xlane.f32.xlu1 %v2614_v21  ;;  %v725_v4 = vpop.xlane.xlu0 %724  ;;  %v1422_v6 = vsub.f32 %v2496_v33, %v2744_v63  ;;  %v1304_v33 = vmul.f32 %v2606_v18, %v2606_v18 }
 0x21a   : > { %v2075_v12 = vpop.eup %2074  ;;  %v1647_v56 = vadd.f32 1e-05, %v1631_v13  ;;  %v2791_v52 = vmul.f32 0.0078125, %v725_v4  ;;  %v727_v57 = vpop.xlane.xlu1 %726 }
 0x21b   : > { %v914_v32 = vmul.f32 %v2075_v12, %v898_v10  ;;  %v1648_v31 = vadd.f32 1e-05, %v1632_v5  ;;  %v1423_v10 = vsub.f32 %v2505_v37, %v2748_v14  ;;  %v1166_v14 = vsub.f32 %v2499_v34, %v2755_v51 }
 0x21c   : > { %2084 = vrsqrt.f32 %v1647_v56  ;;  %v835_v7 = vmul.f32 %v2791_v52, %v2791_v52  ;;  %806 = vadd.xlane.f32.xlu0 %v780_v8  ;;  %v781_v56 = vmul.f32 %v2611_v20, %v2611_v20 }
 0x21d   : > { %v936_v15 = vmul.f32 %v2789_v58, %v914_v32  ;;  %2086 = vrsqrt.f32 %v1648_v31  ;;  %1525 = vadd.xlane.f32.xlu1 %v2619_v23  ;;  %v1251_v11 = vpop.xlane.xlu0 %1250 }
 0x21e   : > { %v2077_v13 = vpop.eup %2076  ;;  %v851_v53 = vsub.f32 %v819_v9, %v835_v7  ;;  %v729_v5 = vpop.xlane.xlu1 %728  ;;  %v1167_v7 = vsub.f32 %v2508_v38, %v2759_v0  ;;  %v1679_v38 = vsub.f32 %v2501_v35, %v2767_v1  ;;  %v1561_v35 = vmul.f32 %v2609_v19, %v2609_v19 }
 0x21f   : > { %v2079_v63 = vpop.eup %2078  ;;  %v958_v4 = vadd.f32 %v2799_v62, %v936_v15  ;;  %v1438_v12 = vmul.f32 %v2077_v13, %v1422_v6  ;;  %v1048_v13 = vmul.f32 %v2604_v17, %v2604_v17 }
 0x220   : > { %v1439_v8 = vmul.f32 %v2079_v63, %v1423_v10  ;;  %v867_v37 = vadd.f32 1e-05, %v851_v53  ;;  %1330 = vadd.xlane.f32.xlu0 %v1304_v33  ;;  %v1305_v53 = vmul.f32 %v2616_v22, %v2616_v22 }
 0x221   : > { %974 = vst [vmem:[%s2813_s28] sm:$0xff] %v958_v4  ;;  %v1454_v32 = vmul.f32 %v2789_v58, %v1438_v12  ;;  %808 = vadd.xlane.f32.xlu1 %v781_v56  ;;  %v995_v31 = vpop.xlane.xlu0 %994  ;;  %v1680_v56 = vsub.f32 %v2511_v39, %v2771_v59 }
 0x222   : > { %v2081_v9 = vpop.eup %2080  ;;  %v1455_v6 = vmul.f32 %v2789_v58, %v1439_v8  ;;  %2088 = vrsqrt.f32 %v867_v37  ;;  %v1253_v15 = vpop.xlane.xlu1 %1252  ;;  %v2841_v37 = vmul.f32 0.0078125, %v727_v57 }
 0x223   : > { %v2083_v10 = vpop.eup %2082  ;;  %v1470_v34 = vadd.f32 %v2799_v62, %v1454_v32  ;;  %v1182_v51 = vmul.f32 %v2081_v9, %v1166_v14 }
 0x224   : > { %v1471_v33 = vadd.f32 %v2799_v62, %v1455_v6  ;;  %v1183_v63 = vmul.f32 %v2083_v10, %v1167_v7  ;;  %1074 = vadd.xlane.f32.xlu0 %v1048_v13  ;;  %v1049_v7 = vmul.f32 %v2614_v21, %v2614_v21  ;;  %v836_v10 = vmul.f32 %v2841_v37, %v2841_v37 }
 0x225   : > { %1855 = vst [vmem:[%s2813_s28 + $0x10] sm:$0xff] %v1470_v34  ;;  %v1198_v0 = vmul.f32 %v2789_v58, %v1182_v51  ;;  %1332 = vadd.xlane.f32.xlu1 %v1305_v53  ;;  %v1508_v4 = vpop.xlane.xlu0 %1507  ;;  %v2855_v34 = vmul.f32 0.0078125, %v1251_v11 }
 0x226   : > { %v2085_v12 = vpop.eup %2084  ;;  %1856 = vst [vmem:[%s2813_s28 + $0x30] sm:$0xff] %v1471_v33  ;;  %v1199_v8 = vmul.f32 %v2789_v58, %v1183_v63  ;;  %v997_v14 = vpop.xlane.xlu1 %996  ;;  %v899_v63 = vsub.f32 %v2503_v36, %v2791_v52  ;;  %v2870_v36 = vmul.f32 0.0078125, %v995_v31 }
 0x227   : > { %v2087_v1 = vpop.eup %2086  ;;  %v1214_v32 = vadd.f32 %v2799_v62, %v1198_v0  ;;  %v1695_v9 = vmul.f32 %v2085_v12, %v1679_v38  ;;  %v2860_v38 = vmul.f32 0.0078125, %v729_v5  ;;  %v1562_v0 = vmul.f32 %v2619_v23, %v2619_v23 }
 0x228   : > { %v1215_v6 = vadd.f32 %v2799_v62, %v1199_v8  ;;  %v1696_v39 = vmul.f32 %v2087_v1, %v1680_v56  ;;  %1587 = vadd.xlane.f32.xlu0 %v1561_v35  ;;  %v1360_v1 = vmul.f32 %v2855_v34, %v2855_v34 }
 0x229   : > { %1230 = vst [vmem:[%s2813_s28 + $0x8] sm:$0xff] %v1214_v32  ;;  %v1711_v59 = vmul.f32 %v2789_v58, %v1695_v9  ;;  %1076 = vadd.xlane.f32.xlu1 %v1049_v7  ;;  %v791_v57 = vpop.xlane.xlu0 %790  ;;  %v837_v7 = vmul.f32 %v2860_v38, %v2860_v38 }
 0x22a   : > { %1231 = vst [vmem:[%s2813_s28 + $0x28] sm:$0xff] %v1215_v6  ;;  %v1712_v13 = vmul.f32 %v2789_v58, %v1696_v39  ;;  %v820_v51 = vmul.f32 0.0078125, %v791_v57  ;;  %v1510_v53 = vpop.xlane.xlu1 %1509  ;;  %v2875_v6 = vmul.f32 0.0078125, %v1253_v15 }
 0x22b   : > { %v1727_v33 = vadd.f32 %v2799_v62, %v1711_v59 }
 0x22c   : > { %v2089_v12 = vpop.eup %2088  ;;  %v1728_v56 = vadd.f32 %v2799_v62, %v1712_v13  ;;  %v852_v8 = vsub.f32 %v820_v51, %v836_v10  ;;  %746 = vadd.xlane.f32.xlu0 %v2638_v48  ;;  %v1104_v10 = vmul.f32 %v2870_v36, %v2870_v36  ;;  %v2882_v51 = vmul.f32 0.0078125, %v1508_v4 }
 0x22d   : > { %1871 = vst [vmem:[%s2813_s28 + $0x18] sm:$0xff] %v1727_v33  ;;  %v915_v11 = vmul.f32 %v2089_v12, %v899_v63  ;;  %1589 = vadd.xlane.f32.xlu1 %v1562_v0  ;;  %v1315_v35 = vpop.xlane.xlu0 %1314  ;;  %v1361_v0 = vmul.f32 %v2875_v6, %v2875_v6  ;;  %v2887_v12 = vmul.f32 0.0078125, %v997_v14 }
 0x22e   : > { %1872 = vst [vmem:[%s2813_s28 + $0x38] sm:$0xff] %v1728_v56  ;;  %v868_v52 = vadd.f32 1e-05, %v852_v8  ;;  %v1344_v5 = vmul.f32 0.0078125, %v1315_v35  ;;  %v793_v32 = vpop.xlane.xlu1 %792 }
 0x22f   : > { %v937_v9 = vmul.f32 %v2789_v58, %v915_v11  ;;  %v821_v39 = vmul.f32 0.0078125, %v793_v32  ;;  %v1105_v14 = vmul.f32 %v2887_v12, %v2887_v12 }
 0x230   : > { %2090 = vrsqrt.f32 %v868_v52  ;;  %v1376_v59 = vsub.f32 %v1344_v5, %v1360_v1  ;;  %1270 = vadd.xlane.f32.xlu0 %v2645_v55  ;;  %v1617_v1 = vmul.f32 %v2882_v51, %v2882_v51 }
 0x231   : > { %v959_v57 = vadd.f32 %v2799_v62, %v937_v9  ;;  %v853_v31 = vsub.f32 %v821_v39, %v837_v7  ;;  %748 = vadd.xlane.f32.xlu1 %v2643_v54  ;;  %v1059_v13 = vpop.xlane.xlu0 %1058  ;;  %v2895_v9 = vmul.f32 0.0078125, %v1510_v53 }
 0x232   : > { %v1392_v33 = vadd.f32 1e-05, %v1376_v59  ;;  %v1088_v63 = vmul.f32 0.0078125, %v1059_v13  ;;  %v1317_v15 = vpop.xlane.xlu1 %1316 }
 0x233   : > { %975 = vst [vmem:[%s2813_s28 + $0x20] sm:$0xff] %v959_v57  ;;  %v869_v56 = vadd.f32 1e-05, %v853_v31  ;;  %v1345_v8 = vmul.f32 0.0078125, %v1317_v15  ;;  %v900_v57 = vsub.f32 %v2513_v40, %v2841_v37  ;;  %v1424_v40 = vsub.f32 %v2518_v42, %v2855_v34 }
 0x234   : > { %2092 = vrsqrt.f32 %v1392_v33  ;;  %v1120_v11 = vsub.f32 %v1088_v63, %v1104_v10  ;;  %1014 = vadd.xlane.f32.xlu0 %v2641_v49  ;;  %v782_v33 = vmul.f32 %v2638_v48, %v2638_v48  ;;  %v783_v34 = vmul.f32 %v2643_v54, %v2643_v54 }
 0x235   : > { %2094 = vrsqrt.f32 %v869_v56  ;;  %v1377_v35 = vsub.f32 %v1345_v8, %v1361_v0  ;;  %1272 = vadd.xlane.f32.xlu1 %v2653_v2  ;;  %v1572_v4 = vpop.xlane.xlu0 %1571  ;;  %v1618_v0 = vmul.f32 %v2895_v9, %v2895_v9 }
 0x236   : > { %v1136_v52 = vadd.f32 1e-05, %v1120_v11  ;;  %v1601_v5 = vmul.f32 0.0078125, %v1572_v4  ;;  %v1061_v32 = vpop.xlane.xlu1 %1060 }
 0x237   : > { %v1393_v7 = vadd.f32 1e-05, %v1377_v35  ;;  %v1089_v39 = vmul.f32 0.0078125, %v1061_v32 }
 0x238   : > { %2096 = vrsqrt.f32 %v1136_v52  ;;  %v1633_v59 = vsub.f32 %v1601_v5, %v1617_v1  ;;  %1527 = vadd.xlane.f32.xlu0 %v2650_v61  ;;  %v901_v1 = vsub.f32 %v2523_v44, %v2860_v38  ;;  %v1306_v52 = vmul.f32 %v2645_v55, %v2645_v55 }
 0x239   : > { %2098 = vrsqrt.f32 %v1393_v7  ;;  %v1121_v31 = vsub.f32 %v1089_v39, %v1105_v14  ;;  %1016 = vadd.xlane.f32.xlu1 %v2648_v60  ;;  %v731_v13 = vpop.xlane.xlu0 %730 }
 0x23a   : > { %v2091_v10 = vpop.eup %2090  ;;  %v1649_v53 = vadd.f32 1e-05, %v1633_v59  ;;  %v1574_v63 = vpop.xlane.xlu1 %1573  ;;  %v1168_v59 = vsub.f32 %v2516_v41, %v2870_v36 }
 0x23b   : > { %v916_v15 = vmul.f32 %v2091_v10, %v900_v57  ;;  %v1137_v56 = vadd.f32 1e-05, %v1121_v31  ;;  %v1602_v8 = vmul.f32 0.0078125, %v1574_v63  ;;  %v1425_v31 = vsub.f32 %v2528_v46, %v2875_v6 }
 0x23c   : > { %2100 = vrsqrt.f32 %v1649_v53  ;;  %810 = vadd.xlane.f32.xlu0 %v782_v33  ;;  %v1050_v10 = vmul.f32 %v2641_v49, %v2641_v49  ;;  %v1681_v46 = vsub.f32 %v2521_v43, %v2882_v51 }
 0x23d   : > { %v938_v37 = vmul.f32 %v2789_v58, %v916_v15  ;;  %2102 = vrsqrt.f32 %v1137_v56  ;;  %v1634_v11 = vsub.f32 %v1602_v8, %v1618_v0  ;;  %1529 = vadd.xlane.f32.xlu1 %v2656_v3  ;;  %v1255_v35 = vpop.xlane.xlu0 %1254  ;;  %v1307_v15 = vmul.f32 %v2653_v2, %v2653_v2 }
 0x23e   : > { %v2093_v4 = vpop.eup %2092  ;;  %v733_v5 = vpop.xlane.xlu1 %732 }
 0x23f   : > { %v2095_v32 = vpop.eup %2094  ;;  %v960_v14 = vadd.f32 %v2799_v62, %v938_v37  ;;  %v1440_v42 = vmul.f32 %v2093_v4, %v1424_v40  ;;  %v1650_v7 = vadd.f32 1e-05, %v1634_v11  ;;  %v1169_v37 = vsub.f32 %v2526_v45, %v2887_v12 }
 0x240   : > { %v917_v39 = vmul.f32 %v2095_v32, %v901_v1  ;;  %1334 = vadd.xlane.f32.xlu0 %v1306_v52  ;;  %v1563_v11 = vmul.f32 %v2650_v61, %v2650_v61  ;;  %v2939_v1 = vmul.f32 0.0078125, %v731_v13  ;;  %v1051_v52 = vmul.f32 %v2648_v60, %v2648_v60 }
 0x241   : > { %976 = vst [vmem:[%s2813_s28 + $0x40] sm:$0xff] %v960_v14  ;;  %v1456_v44 = vmul.f32 %v2789_v58, %v1440_v42  ;;  %2104 = vrsqrt.f32 %v1650_v7  ;;  %812 = vadd.xlane.f32.xlu1 %v783_v34  ;;  %v999_v38 = vpop.xlane.xlu0 %998  ;;  %v2947_v34 = vmul.f32 0.0078125, %v1255_v35  ;;  %v1682_v7 = vsub.f32 %v2531_v47, %v2895_v9 }
 0x242   : > { %v2097_v57 = vpop.eup %2096  ;;  %v939_v33 = vmul.f32 %v2789_v58, %v917_v39  ;;  %v1257_v53 = vpop.xlane.xlu1 %1256  ;;  %v1564_v35 = vmul.f32 %v2656_v3, %v2656_v3 }
 0x243   : > { %v2099_v63 = vpop.eup %2098  ;;  %v1472_v41 = vadd.f32 %v2799_v62, %v1456_v44  ;;  %v1184_v36 = vmul.f32 %v2097_v57, %v1168_v59  ;;  %v838_v59 = vmul.f32 %v2939_v1, %v2939_v1 }
 0x244   : > { %v961_v0 = vadd.f32 %v2799_v62, %v939_v33  ;;  %v1441_v56 = vmul.f32 %v2099_v63, %v1425_v31  ;;  %1078 = vadd.xlane.f32.xlu0 %v1050_v10  ;;  %v2958_v33 = vmul.f32 0.0078125, %v733_v5 }
 0x245   : > { %1857 = vst [vmem:[%s2813_s28 + $0x50] sm:$0xff] %v1472_v41  ;;  %v1200_v6 = vmul.f32 %v2789_v58, %v1184_v36  ;;  %1336 = vadd.xlane.f32.xlu1 %v1307_v15  ;;  %v1512_v8 = vpop.xlane.xlu0 %1511  ;;  %v1362_v41 = vmul.f32 %v2947_v34, %v2947_v34 }
 0x246   : > { %v2101_v40 = vpop.eup %2100  ;;  %977 = vst [vmem:[%s2813_s28 + $0x60] sm:$0xff] %v961_v0  ;;  %v1457_v4 = vmul.f32 %v2789_v58, %v1441_v56  ;;  %v1001_v43 = vpop.xlane.xlu1 %1000  ;;  %v2967_v0 = vmul.f32 0.0078125, %v999_v38 }
 0x247   : > { %v2103_v51 = vpop.eup %2102  ;;  %v1216_v32 = vadd.f32 %v2799_v62, %v1200_v6  ;;  %v1697_v14 = vmul.f32 %v2101_v40, %v1681_v46  ;;  %v839_v6 = vmul.f32 %v2958_v33, %v2958_v33  ;;  %v2971_v40 = vmul.f32 0.0078125, %v1257_v53 }
 0x248   : > { %v1473_v42 = vadd.f32 %v2799_v62, %v1457_v4  ;;  %v1185_v45 = vmul.f32 %v2103_v51, %v1169_v37  ;;  %1591 = vadd.xlane.f32.xlu0 %v1563_v11 }
 0x249   : > { %1232 = vst [vmem:[%s2813_s28 + $0x48] sm:$0xff] %v1216_v32  ;;  %v1713_v12 = vmul.f32 %v2789_v58, %v1697_v14  ;;  %1080 = vadd.xlane.f32.xlu1 %v1051_v52  ;;  %v795_v13 = vpop.xlane.xlu0 %794  ;;  %v1106_v52 = vmul.f32 %v2967_v0, %v2967_v0  ;;  %v2979_v32 = vmul.f32 0.0078125, %v1512_v8 }
 0x24a   : > { %1858 = vst [vmem:[%s2813_s28 + $0x70] sm:$0xff] %v1473_v42  ;;  %v1201_v39 = vmul.f32 %v2789_v58, %v1185_v45  ;;  %v822_v44 = vmul.f32 0.0078125, %v795_v13  ;;  %v1514_v57 = vpop.xlane.xlu1 %1513  ;;  %v1363_v45 = vmul.f32 %v2971_v40, %v2971_v40 }
 0x24b   : > { %v2105_v31 = vpop.eup %2104  ;;  %v1729_v10 = vadd.f32 %v2799_v62, %v1713_v12  ;;  %v2983_v12 = vmul.f32 0.0078125, %v1001_v43 }
 0x24c   : > { %v1217_v63 = vadd.f32 %v2799_v62, %v1201_v39  ;;  %v1698_v47 = vmul.f32 %v2105_v31, %v1682_v7  ;;  %v854_v9 = vsub.f32 %v822_v44, %v838_v59  ;;  %750 = vadd.xlane.f32.xlu0 %v2678_v24  ;;  %v1619_v44 = vmul.f32 %v2979_v32, %v2979_v32 }
 0x24d   : > { %1873 = vst [vmem:[%s2813_s28 + $0x58] sm:$0xff] %v1729_v10  ;;  %1593 = vadd.xlane.f32.xlu1 %v1564_v35  ;;  %v1319_v36 = vpop.xlane.xlu0 %1318  ;;  %v1107_v43 = vmul.f32 %v2983_v12, %v2983_v12 }
 0x24e   : > { %1233 = vst [vmem:[%s2813_s28 + $0x68] sm:$0xff] %v1217_v63  ;;  %v1714_v15 = vmul.f32 %v2789_v58, %v1698_v47  ;;  %v870_v5 = vadd.f32 1e-05, %v854_v9  ;;  %v1346_v56 = vmul.f32 0.0078125, %v1319_v36  ;;  %v797_v46 = vpop.xlane.xlu1 %796  ;;  %v2991_v63 = vmul.f32 0.0078125, %v1514_v57 }
 0x24f   : > { %v823_v37 = vmul.f32 0.0078125, %v797_v46  ;;  %v902_v36 = vsub.f32 %v2537_v50, %v2939_v1  ;;  %v784_v46 = vmul.f32 %v2678_v24, %v2678_v24  ;;  %v3497_v50 = vld [vmem:[#allocation9_spill] sm:$0xff] }
 0x250   : > { %v1730_v11 = vadd.f32 %v2799_v62, %v1714_v15  ;;  %2106 = vrsqrt.f32 %v870_v5  ;;  %v1378_v4 = vsub.f32 %v1346_v56, %v1362_v41  ;;  %1274 = vadd.xlane.f32.xlu0 %v2685_v27  ;;  %v1426_v1 = vsub.f32 %v3497_v50, %v2947_v34 }
 0x251   : > { %v855_v51 = vsub.f32 %v823_v37, %v839_v6  ;;  %752 = vadd.xlane.f32.xlu1 %v2683_v26  ;;  %v1063_v38 = vpop.xlane.xlu0 %1062 }
 0x252   : > { %1874 = vst [vmem:[%s2813_s28 + $0x78] sm:$0xff] %v1730_v11  ;;  %v1394_v14 = vadd.f32 1e-05, %v1378_v4  ;;  %v1090_v53 = vmul.f32 0.0078125, %v1063_v38  ;;  %v1321_v42 = vpop.xlane.xlu1 %1320  ;;  %v1620_v11 = vmul.f32 %v2991_v63, %v2991_v63 }
 0x253   : > { %v871_v13 = vadd.f32 1e-05, %v855_v51  ;;  %v1347_v7 = vmul.f32 0.0078125, %v1321_v42 }
 0x254   : > { %2108 = vrsqrt.f32 %v1394_v14  ;;  %v1122_v39 = vsub.f32 %v1090_v53, %v1106_v52  ;;  %1018 = vadd.xlane.f32.xlu0 %v2681_v25  ;;  %v3498_v14 = vld [vmem:[#allocation31_spill] sm:$0xff] }
 0x255   : > { %2110 = vrsqrt.f32 %v871_v13  ;;  %v1379_v59 = vsub.f32 %v1347_v7, %v1363_v45  ;;  %1276 = vadd.xlane.f32.xlu1 %v2693_v30  ;;  %v1576_v8 = vpop.xlane.xlu0 %1575  ;;  %v3499_v45 = vld [vmem:[#allocation11_spill] sm:$0xff]  ;;  %v1308_v7 = vmul.f32 %v2685_v27, %v2685_v27 }
 0x256   : > { %v1138_v31 = vadd.f32 1e-05, %v1122_v39  ;;  %v1603_v35 = vmul.f32 0.0078125, %v1576_v8  ;;  %v1065_v10 = vpop.xlane.xlu1 %1064  ;;  %v903_v13 = vsub.f32 %v3499_v45, %v2958_v33  ;;  %v1565_v45 = vmul.f32 %v2690_v29, %v2690_v29 }
 0x257   : > { %v1395_v47 = vadd.f32 1e-05, %v1379_v59  ;;  %v1091_v9 = vmul.f32 0.0078125, %v1065_v10  ;;  %v3500_v10 = vld [vmem:[#allocation8_spill] sm:$0xff] }
 0x258   : > { %2112 = vrsqrt.f32 %v1138_v31  ;;  %v1635_v41 = vsub.f32 %v1603_v35, %v1619_v44  ;;  %1531 = vadd.xlane.f32.xlu0 %v2690_v29  ;;  %v785_v44 = vmul.f32 %v2683_v26, %v2683_v26 }
 0x259   : > { %2114 = vrsqrt.f32 %v1395_v47  ;;  %v1123_v15 = vsub.f32 %v1091_v9, %v1107_v43  ;;  %1020 = vadd.xlane.f32.xlu1 %v2688_v28  ;;  %v735_v5 = vpop.xlane.xlu0 %734  ;;  %v1170_v43 = vsub.f32 %v3500_v10, %v2967_v0 }
 0x25a   : > { %v2107_v56 = vpop.eup %2106  ;;  %v1651_v57 = vadd.f32 1e-05, %v1635_v41  ;;  %v1578_v6 = vpop.xlane.xlu1 %1577  ;;  %v3501_v41 = vld [vmem:[#allocation13_spill] sm:$0xff] }
 0x25b   : > { %v918_v37 = vmul.f32 %v2107_v56, %v902_v36  ;;  %v1139_v4 = vadd.f32 1e-05, %v1123_v15  ;;  %v1604_v51 = vmul.f32 0.0078125, %v1578_v6  ;;  %v1427_v36 = vsub.f32 %v3501_v41, %v2971_v40  ;;  %v3502_v40 = vld [vmem:[#allocation10_spill] sm:$0xff] }
 0x25c   : > { %2116 = vrsqrt.f32 %v1651_v57  ;;  %814 = vadd.xlane.f32.xlu0 %v784_v46  ;;  %v1052_v15 = vmul.f32 %v2681_v25, %v2681_v25 }
 0x25d   : > { %v940_v38 = vmul.f32 %v2789_v58, %v918_v37  ;;  %2118 = vrsqrt.f32 %v1139_v4  ;;  %v1636_v52 = vsub.f32 %v1604_v51, %v1620_v11  ;;  %1533 = vadd.xlane.f32.xlu1 %v3498_v14  ;;  %v1259_v53 = vpop.xlane.xlu0 %1258  ;;  %v1309_v37 = vmul.f32 %v2693_v30, %v2693_v30 }
 0x25e   : > { %v2109_v42 = vpop.eup %2108  ;;  %v737_v39 = vpop.xlane.xlu1 %736  ;;  %v1683_v51 = vsub.f32 %v3502_v40, %v2979_v32  ;;  %v3043_v10 = vmul.f32 0.0078125, %v1259_v53  ;;  %v1566_v53 = vmul.f32 %v3498_v14, %v3498_v14 }
 0x25f   : > { %v2111_v59 = vpop.eup %2110  ;;  %v962_v8 = vadd.f32 %v2799_v62, %v940_v38  ;;  %v1442_v34 = vmul.f32 %v2109_v42, %v1426_v1  ;;  %v1652_v31 = vadd.f32 1e-05, %v1636_v52  ;;  %v3503_v52 = vld [vmem:[#allocation12_spill] sm:$0xff] }
 0x260   : > { %v919_v35 = vmul.f32 %v2111_v59, %v903_v13  ;;  %1338 = vadd.xlane.f32.xlu0 %v1308_v7  ;;  %v1171_v42 = vsub.f32 %v3503_v52, %v2983_v12  ;;  %v3035_v7 = vmul.f32 0.0078125, %v735_v5 }
 0x261   : > { %978 = vst [vmem:[%s2813_s28 + $0x80] sm:$0xff] %v962_v8  ;;  %v1458_v33 = vmul.f32 %v2789_v58, %v1442_v34  ;;  %2120 = vrsqrt.f32 %v1652_v31  ;;  %816 = vadd.xlane.f32.xlu1 %v785_v44  ;;  %v1003_v47 = vpop.xlane.xlu0 %1002  ;;  %v1053_v8 = vmul.f32 %v2688_v28, %v2688_v28 }
 0x262   : > { %v2113_v9 = vpop.eup %2112  ;;  %v941_v56 = vmul.f32 %v2789_v58, %v919_v35  ;;  %v1261_v46 = vpop.xlane.xlu1 %1260  ;;  %v840_v41 = vmul.f32 %v3035_v7, %v3035_v7 }
 0x263   : > { %v2115_v57 = vpop.eup %2114  ;;  %v1474_v0 = vadd.f32 %v2799_v62, %v1458_v33  ;;  %v1186_v6 = vmul.f32 %v2113_v9, %v1170_v43  ;;  %v3504_v43 = vld [vmem:[#allocation14_spill] sm:$0xff] }
 0x264   : > { %v963_v11 = vadd.f32 %v2799_v62, %v941_v56  ;;  %v1443_v4 = vmul.f32 %v2115_v57, %v1427_v36  ;;  %1082 = vadd.xlane.f32.xlu0 %v1052_v15  ;;  %v1684_v33 = vsub.f32 %v3504_v43, %v2991_v63 }
 0x265   : > { %1859 = vst [vmem:[%s2813_s28 + $0x90] sm:$0xff] %v1474_v0  ;;  %v1202_v50 = vmul.f32 %v2789_v58, %v1186_v6  ;;  %1340 = vadd.xlane.f32.xlu1 %v1309_v37  ;;  %v1516_v1 = vpop.xlane.xlu0 %1515  ;;  %v3054_v0 = vmul.f32 0.0078125, %v737_v39 }
 0x266   : > { %v2117_v38 = vpop.eup %2116  ;;  %979 = vst [vmem:[%s2813_s28 + $0xa0] sm:$0xff] %v963_v11  ;;  %v1459_v13 = vmul.f32 %v2789_v58, %v1443_v4  ;;  %v1005_v32 = vpop.xlane.xlu1 %1004  ;;  %v1364_v11 = vmul.f32 %v3043_v10, %v3043_v10 }
 0x267   : > { %v2119_v59 = vpop.eup %2118  ;;  %v1218_v34 = vadd.f32 %v2799_v62, %v1202_v50  ;;  %v1699_v44 = vmul.f32 %v2117_v38, %v1683_v51  ;;  %v3062_v51 = vmul.f32 0.0078125, %v1003_v47  ;;  %v841_v52 = vmul.f32 %v3054_v0, %v3054_v0 }
 0x268   : > { %v1475_v31 = vadd.f32 %v2799_v62, %v1459_v13  ;;  %v1187_v12 = vmul.f32 %v2119_v59, %v1171_v42  ;;  %1595 = vadd.xlane.f32.xlu0 %v1565_v45  ;;  %v3066_v42 = vmul.f32 0.0078125, %v1261_v46 }
 0x269   : > { %1234 = vst [vmem:[%s2813_s28 + $0x88] sm:$0xff] %v1218_v34  ;;  %v1715_v35 = vmul.f32 %v2789_v58, %v1699_v44  ;;  %1084 = vadd.xlane.f32.xlu1 %v1053_v8  ;;  %v799_v5 = vpop.xlane.xlu0 %798  ;;  %v1108_v47 = vmul.f32 %v3062_v51, %v3062_v51  ;;  %v3072_v44 = vmul.f32 0.0078125, %v1516_v1 }
 0x26a   : > { %1860 = vst [vmem:[%s2813_s28 + $0xb0] sm:$0xff] %v1475_v31  ;;  %v1203_v9 = vmul.f32 %v2789_v58, %v1187_v12  ;;  %v824_v36 = vmul.f32 0.0078125, %v799_v5  ;;  %v1518_v15 = vpop.xlane.xlu1 %1517  ;;  %v1365_v46 = vmul.f32 %v3066_v42, %v3066_v42  ;;  %v3076_v5 = vmul.f32 0.0078125, %v1005_v32 }
 0x26b   : > { %v2121_v56 = vpop.eup %2120  ;;  %v1731_v57 = vadd.f32 %v2799_v62, %v1715_v35 }
 0x26c   : > { %v1219_v6 = vadd.f32 %v2799_v62, %v1203_v9  ;;  %v1700_v63 = vmul.f32 %v2121_v56, %v1684_v33  ;;  %v856_v37 = vsub.f32 %v824_v36, %v840_v41  ;;  %v1621_v56 = vmul.f32 %v3072_v44, %v3072_v44 }
 0x26d   : > { %1875 = vst [vmem:[%s2813_s28 + $0x98] sm:$0xff] %v1731_v57  ;;  %1597 = vadd.xlane.f32.xlu1 %v1566_v53  ;;  %v1323_v4 = vpop.xlane.xlu0 %1322 }
 0x26e   : > { %1235 = vst [vmem:[%s2813_s28 + $0xa8] sm:$0xff] %v1219_v6  ;;  %v1716_v40 = vmul.f32 %v2789_v58, %v1700_v63  ;;  %v872_v50 = vadd.f32 1e-05, %v856_v37  ;;  %v1348_v38 = vmul.f32 0.0078125, %v1323_v4  ;;  %v801_v39 = vpop.xlane.xlu1 %800  ;;  %v1109_v6 = vmul.f32 %v3076_v5, %v3076_v5  ;;  %v3505_v4 = vld [vmem:[#allocation15_spill] sm:$0xff] }
 0x26f   : > { %v825_v45 = vmul.f32 0.0078125, %v801_v39  ;;  %v3082_v63 = vmul.f32 0.0078125, %v1518_v15 }
 0x270   : > { %v1732_v13 = vadd.f32 %v2799_v62, %v1716_v40  ;;  %2122 = vrsqrt.f32 %v872_v50  ;;  %v1380_v59 = vsub.f32 %v1348_v38, %v1364_v11  ;;  %v904_v40 = vsub.f32 %v3505_v4, %v3035_v7 }
 0x271   : > { %v857_v8 = vsub.f32 %v825_v45, %v841_v52  ;;  %v1067_v34 = vpop.xlane.xlu0 %1066 }
 0x272   : > { %1876 = vst [vmem:[%s2813_s28 + $0xb8] sm:$0xff] %v1732_v13  ;;  %v1396_v31 = vadd.f32 1e-05, %v1380_v59  ;;  %v1092_v12 = vmul.f32 0.0078125, %v1067_v34  ;;  %v1325_v35 = vpop.xlane.xlu1 %1324  ;;  %v1622_v59 = vmul.f32 %v3082_v63, %v3082_v63  ;;  %v3506_v34 = vld [vmem:[#allocation17_spill] sm:$0xff] }
 0x273   : > { %v873_v43 = vadd.f32 1e-05, %v857_v8  ;;  %v1349_v33 = vmul.f32 0.0078125, %v1325_v35 }
 0x274   : > { %2124 = vrsqrt.f32 %v1396_v31  ;;  %v1124_v9 = vsub.f32 %v1092_v12, %v1108_v47  ;;  %v1428_v47 = vsub.f32 %v3506_v34, %v3043_v10 }
 0x275   : > { %2126 = vrsqrt.f32 %v873_v43  ;;  %v1381_v41 = vsub.f32 %v1349_v33, %v1365_v46  ;;  %v1580_v36 = vpop.xlane.xlu0 %1579  ;;  %v3507_v46 = vld [vmem:[#allocation19_spill] sm:$0xff] }
 0x276   : > { %v1140_v1 = vadd.f32 1e-05, %v1124_v9  ;;  %v1605_v53 = vmul.f32 0.0078125, %v1580_v36  ;;  %v1069_v57 = vpop.xlane.xlu1 %1068  ;;  %v905_v43 = vsub.f32 %v3507_v46, %v3054_v0  ;;  %v3509_v0 = vld [vmem:[#allocation21_spill] sm:$0xff] }
 0x277   : > { %v1397_v32 = vadd.f32 1e-05, %v1381_v41  ;;  %v1093_v37 = vmul.f32 0.0078125, %v1069_v57 }
 0x278   : > { %2128 = vrsqrt.f32 %v1140_v1  ;;  %v1637_v11 = vsub.f32 %v1605_v53, %v1621_v56  ;;  %v3508_v53 = vld [vmem:[#allocation16_spill] sm:$0xff] }
 0x279   : > { %2130 = vrsqrt.f32 %v1397_v32  ;;  %v1125_v50 = vsub.f32 %v1093_v37, %v1109_v6  ;;  %v739_v38 = vpop.xlane.xlu0 %738  ;;  %v1172_v10 = vsub.f32 %v3508_v53, %v3062_v51  ;;  %v1429_v37 = vsub.f32 %v3509_v0, %v3066_v42  ;;  %v3511_v42 = vld [vmem:[#allocation20_spill] sm:$0xff] }
 0x27a   : > { %v2123_v39 = vpop.eup %2122  ;;  %v1653_v52 = vadd.f32 1e-05, %v1637_v11  ;;  %v1582_v45 = vpop.xlane.xlu1 %1581  ;;  %v1173_v34 = vsub.f32 %v3511_v42, %v3076_v5 }
 0x27b   : > { %v920_v13 = vmul.f32 %v2123_v39, %v904_v40  ;;  %v1141_v8 = vadd.f32 1e-05, %v1125_v50  ;;  %v1606_v15 = vmul.f32 0.0078125, %v1582_v45  ;;  %v3510_v45 = vld [vmem:[#allocation18_spill] sm:$0xff] }
 0x27c   : > { %2132 = vrsqrt.f32 %v1653_v52 }
 0x27d   : > { %v942_v31 = vmul.f32 %v2789_v58, %v920_v13  ;;  %2134 = vrsqrt.f32 %v1141_v8  ;;  %v1638_v7 = vsub.f32 %v1606_v15, %v1622_v59  ;;  %v1263_v12 = vpop.xlane.xlu0 %1262  ;;  %v1685_v13 = vsub.f32 %v3510_v45, %v3072_v44 }
 0x27e   : > { %v2125_v35 = vpop.eup %2124  ;;  %v741_v33 = vpop.xlane.xlu1 %740 }
 0x27f   : > { %v2127_v9 = vpop.eup %2126  ;;  %v964_v41 = vadd.f32 %v2799_v62, %v942_v31  ;;  %v1444_v36 = vmul.f32 %v2125_v35, %v1428_v47  ;;  %v1654_v56 = vadd.f32 1e-05, %v1638_v7  ;;  %v3111_v31 = vmul.f32 0.0078125, %v739_v38 }
 0x280   : > { %v921_v1 = vmul.f32 %v2127_v9, %v905_v43 }
 0x281   : > { %980 = vst [vmem:[%s2813_s28 + $0xc0] sm:$0xff] %v964_v41  ;;  %v1460_v57 = vmul.f32 %v2789_v58, %v1444_v36  ;;  %2136 = vrsqrt.f32 %v1654_v56  ;;  %v1007_v6 = vpop.xlane.xlu0 %1006  ;;  %v3117_v36 = vmul.f32 0.0078125, %v1263_v12  ;;  %v3512_v56 = vld [vmem:[#allocation22_spill] sm:$0xff]  ;;  %v842_v53 = vmul.f32 %v3111_v31, %v3111_v31 }
 0x282   : > { %v2129_v32 = vpop.eup %2128  ;;  %v943_v11 = vmul.f32 %v2789_v58, %v921_v1  ;;  %v1265_v4 = vpop.xlane.xlu1 %1264  ;;  %v1686_v38 = vsub.f32 %v3512_v56, %v3082_v63 }
 0x283   : > { %v2131_v40 = vpop.eup %2130  ;;  %v1476_v50 = vadd.f32 %v2799_v62, %v1460_v57  ;;  %v1188_v39 = vmul.f32 %v2129_v32, %v1172_v10  ;;  %v1366_v63 = vmul.f32 %v3117_v36, %v3117_v36 }
 0x284   : > { %v965_v52 = vadd.f32 %v2799_v62, %v943_v11  ;;  %v1445_v51 = vmul.f32 %v2131_v40, %v1429_v37  ;;  %v3126_v37 = vmul.f32 0.0078125, %v741_v33 }
 0x285   : > { %1861 = vst [vmem:[%s2813_s28 + $0xd0] sm:$0xff] %v1476_v50  ;;  %v1204_v59 = vmul.f32 %v2789_v58, %v1188_v39  ;;  %v1520_v8 = vpop.xlane.xlu0 %1519 }
 0x286   : > { %v2133_v15 = vpop.eup %2132  ;;  %981 = vst [vmem:[%s2813_s28 + $0xe0] sm:$0xff] %v965_v52  ;;  %v1461_v47 = vmul.f32 %v2789_v58, %v1445_v51  ;;  %v1009_v7 = vpop.xlane.xlu1 %1008  ;;  %v3134_v52 = vmul.f32 0.0078125, %v1007_v6  ;;  %v843_v33 = vmul.f32 %v3126_v37, %v3126_v37  ;;  %v3144_v6 = vmul.f32 0.0078125, %v1520_v8 }
 0x287   : > { %v2135_v35 = vpop.eup %2134  ;;  %v1220_v46 = vadd.f32 %v2799_v62, %v1204_v59  ;;  %v1701_v43 = vmul.f32 %v2133_v15, %v1685_v13  ;;  %v3138_v59 = vmul.f32 0.0078125, %v1265_v4 }
 0x288   : > { %v1477_v44 = vadd.f32 %v2799_v62, %v1461_v47  ;;  %v1189_v9 = vmul.f32 %v2135_v35, %v1173_v34 }
 0x289   : > { %1236 = vst [vmem:[%s2813_s28 + $0xc8] sm:$0xff] %v1220_v46  ;;  %v1717_v41 = vmul.f32 %v2789_v58, %v1701_v43  ;;  %v803_v5 = vpop.xlane.xlu0 %802  ;;  %v1367_v4 = vmul.f32 %v3138_v59, %v3138_v59 }
 0x28a   : > { %1862 = vst [vmem:[%s2813_s28 + $0xf0] sm:$0xff] %v1477_v44  ;;  %v1205_v1 = vmul.f32 %v2789_v58, %v1189_v9  ;;  %v826_v10 = vmul.f32 0.0078125, %v803_v5  ;;  %v1522_v57 = vpop.xlane.xlu1 %1521  ;;  %v3148_v9 = vmul.f32 0.0078125, %v1009_v7 }
 0x28b   : > { %v2137_v32 = vpop.eup %2136  ;;  %v1733_v0 = vadd.f32 %v2799_v62, %v1717_v41 }
 0x28c   : > { %v1221_v12 = vadd.f32 %v2799_v62, %v1205_v1  ;;  %v1702_v11 = vmul.f32 %v2137_v32, %v1686_v38  ;;  %v858_v40 = vsub.f32 %v826_v10, %v842_v53  ;;  %v1623_v1 = vmul.f32 %v3144_v6, %v3144_v6 }
 0x28d   : > { %1877 = vst [vmem:[%s2813_s28 + $0xd8] sm:$0xff] %v1733_v0  ;;  %v1327_v50 = vpop.xlane.xlu0 %1326  ;;  %v1111_v32 = vmul.f32 %v3148_v9, %v3148_v9  ;;  %v3154_v0 = vmul.f32 0.0078125, %v1522_v57 }
 0x28e   : > { %1237 = vst [vmem:[%s2813_s28 + $0xe8] sm:$0xff] %v1221_v12  ;;  %v1718_v39 = vmul.f32 %v2789_v58, %v1702_v11  ;;  %v874_v51 = vadd.f32 1e-05, %v858_v40  ;;  %v1350_v45 = vmul.f32 0.0078125, %v1327_v50  ;;  %v805_v13 = vpop.xlane.xlu1 %804  ;;  %v1110_v58 = vmul.f32 %v3134_v52, %v3134_v52  ;;  %v3513_v40 = vld [vmem:[#allocation23_spill] sm:$0xff] }
 0x28f   : > { %v827_v15 = vmul.f32 0.0078125, %v805_v13 }
 0x290   : > { %v1734_v42 = vadd.f32 %v2799_v62, %v1718_v39  ;;  %2138 = vrsqrt.f32 %v874_v51  ;;  %v1382_v34 = vsub.f32 %v1350_v45, %v1366_v63  ;;  %v906_v63 = vsub.f32 %v3513_v40, %v3111_v31  ;;  %v3165_v31 = vld [vmem:[%s3434_s2] ss:$0 sm:$0xff] }
 0x291   : > { %v859_v47 = vsub.f32 %v827_v15, %v843_v33  ;;  %v1071_v35 = vpop.xlane.xlu0 %1070  ;;  %v1624_v15 = vmul.f32 %v3154_v0, %v3154_v0 }
 0x292   : > { %1878 = vst [vmem:[%s2813_s28 + $0xf8] sm:$0xff] %v1734_v42  ;;  %v1398_v46 = vadd.f32 1e-05, %v1382_v34  ;;  %v1094_v43 = vmul.f32 0.0078125, %v1071_v35  ;;  %v1329_v44 = vpop.xlane.xlu1 %1328  ;;  %v3514_v34 = vld [vmem:[#allocation25_spill] sm:$0xff] }
 0x293   : > { %v875_v41 = vadd.f32 1e-05, %v859_v47  ;;  %v1351_v62 = vmul.f32 0.0078125, %v1329_v44  ;;  %v1430_v47 = vsub.f32 %v3514_v34, %v3117_v36  ;;  %v3515_v44 = vld [vmem:[#allocation27_spill] sm:$0xff]  ;;  %v3173_v36 = vld [vmem:[%s3435_s3] ss:$0 sm:$0xff] }
 0x294   : > { %2140 = vrsqrt.f32 %v1398_v46  ;;  %v1126_v5 = vsub.f32 %v1094_v43, %v1110_v58 }
 0x295   : > { %2142 = vrsqrt.f32 %v875_v41  ;;  %v1383_v56 = vsub.f32 %v1351_v62, %v1367_v4  ;;  %v1584_v38 = vpop.xlane.xlu0 %1583  ;;  %v907_v4 = vsub.f32 %v3515_v44, %v3126_v37 }
 0x296   : > { %v1142_v8 = vadd.f32 1e-05, %v1126_v5  ;;  %v1607_v53 = vmul.f32 0.0078125, %v1584_v38  ;;  %v1073_v10 = vpop.xlane.xlu1 %1072 }
 0x297   : > { %v1399_v7 = vadd.f32 1e-05, %v1383_v56  ;;  %v1095_v12 = vmul.f32 0.0078125, %v1073_v10 }
 0x298   : > { %2144 = vrsqrt.f32 %v1142_v8  ;;  %v1639_v11 = vsub.f32 %v1607_v53, %v1623_v1  ;;  %v3516_v8 = vld [vmem:[#allocation24_spill] sm:$0xff] }
 0x299   : > { %2146 = vrsqrt.f32 %v1399_v7  ;;  %v1127_v50 = vsub.f32 %v1095_v12, %v1111_v32  ;;  %v743_v39 = vpop.xlane.xlu0 %742  ;;  %v1174_v53 = vsub.f32 %v3516_v8, %v3134_v52  ;;  %v3517_v7 = vld [vmem:[#allocation29_spill] sm:$0xff] }
 0x29a   : > { %v2139_v51 = vpop.eup %2138  ;;  %v1655_v45 = vadd.f32 1e-05, %v1639_v11  ;;  %v1586_v13 = vpop.xlane.xlu1 %1585  ;;  %v1431_v12 = vsub.f32 %v3517_v7, %v3138_v59  ;;  %v3519_v59 = vld [vmem:[#allocation28_spill] sm:$0xff] }
 0x29b   : > { %v922_v33 = vmul.f32 %v2139_v51, %v906_v63  ;;  %v1143_v42 = vadd.f32 1e-05, %v1127_v50  ;;  %v1608_v57 = vmul.f32 0.0078125, %v1586_v13  ;;  %v3518_v13 = vld [vmem:[#allocation26_spill] sm:$0xff]  ;;  %v1175_v34 = vsub.f32 %v3519_v59, %v3148_v9 }
 0x29c   : > { %2148 = vrsqrt.f32 %v1655_v45 }
 0x29d   : > { %v944_v35 = vmul.f32 %v3165_v31, %v922_v33  ;;  %2150 = vrsqrt.f32 %v1143_v42  ;;  %v1640_v58 = vsub.f32 %v1608_v57, %v1624_v15  ;;  %v1267_v46 = vpop.xlane.xlu0 %1266  ;;  %v1687_v33 = vsub.f32 %v3518_v13, %v3144_v6 }
 0x29e   : > { %v2141_v43 = vpop.eup %2140  ;;  %v745_v41 = vpop.xlane.xlu1 %744 }
 0x29f   : > { %v2143_v62 = vpop.eup %2142  ;;  %v966_v5 = vadd.f32 %v3173_v36, %v944_v35  ;;  %v1446_v56 = vmul.f32 %v2141_v43, %v1430_v47  ;;  %v1656_v38 = vadd.f32 1e-05, %v1640_v58  ;;  %v3193_v35 = vmul.f32 0.0078125, %v743_v39 }
 0x2a0   : > { %v923_v1 = vmul.f32 %v2143_v62, %v907_v4 }
 0x2a1   : > { %982 = vst [vmem:[%s2813_s28 + $0x100] sm:$0xff] %v966_v5  ;;  %v1462_v10 = vmul.f32 %v3165_v31, %v1446_v56  ;;  %2152 = vrsqrt.f32 %v1656_v38  ;;  %v1011_v37 = vpop.xlane.xlu0 %1010  ;;  %v3199_v56 = vmul.f32 0.0078125, %v1267_v46  ;;  %v3520_v38 = vld [vmem:[#allocation30_spill] sm:$0xff]  ;;  %v844_v8 = vmul.f32 %v3193_v35, %v3193_v35 }
 0x2a2   : > { %v2145_v32 = vpop.eup %2144  ;;  %v945_v11 = vmul.f32 %v3165_v31, %v923_v1  ;;  %v1269_v40 = vpop.xlane.xlu1 %1268  ;;  %v1688_v39 = vsub.f32 %v3520_v38, %v3154_v0 }
 0x2a3   : > { %v2147_v63 = vpop.eup %2146  ;;  %v1478_v50 = vadd.f32 %v3173_v36, %v1462_v10  ;;  %v1190_v51 = vmul.f32 %v2145_v32, %v1174_v53  ;;  %v1368_v0 = vmul.f32 %v3199_v56, %v3199_v56 }
 0x2a4   : > { %v967_v45 = vadd.f32 %v3173_v36, %v945_v11  ;;  %v1447_v52 = vmul.f32 %v2147_v63, %v1431_v12  ;;  %v3208_v12 = vmul.f32 0.0078125, %v745_v41 }
 0x2a5   : > { %1863 = vst [vmem:[%s2813_s28 + $0x110] sm:$0xff] %v1478_v50  ;;  %v1206_v15 = vmul.f32 %v3165_v31, %v1190_v51  ;;  %v1524_v42 = vpop.xlane.xlu0 %1523 }
 0x2a6   : > { %v2149_v57 = vpop.eup %2148  ;;  %983 = vst [vmem:[%s2813_s28 + $0x120] sm:$0xff] %v967_v45  ;;  %v1463_v47 = vmul.f32 %v3165_v31, %v1447_v52  ;;  %v1013_v58 = vpop.xlane.xlu1 %1012  ;;  %v3216_v45 = vmul.f32 0.0078125, %v1011_v37  ;;  %v845_v41 = vmul.f32 %v3208_v12, %v3208_v12 }
 0x2a7   : > { %v2151_v43 = vpop.eup %2150  ;;  %v1222_v44 = vadd.f32 %v3173_v36, %v1206_v15  ;;  %v1703_v4 = vmul.f32 %v2149_v57, %v1687_v33  ;;  %v3220_v15 = vmul.f32 0.0078125, %v1269_v40 }
 0x2a8   : > { %v1479_v6 = vadd.f32 %v3173_v36, %v1463_v47  ;;  %v1191_v62 = vmul.f32 %v2151_v43, %v1175_v34  ;;  %v1112_v37 = vmul.f32 %v3216_v45, %v3216_v45 }
 0x2a9   : > { %1238 = vst [vmem:[%s2813_s28 + $0x108] sm:$0xff] %v1222_v44  ;;  %v1719_v5 = vmul.f32 %v3165_v31, %v1703_v4  ;;  %v807_v9 = vpop.xlane.xlu0 %806  ;;  %v3226_v44 = vmul.f32 0.0078125, %v1524_v42  ;;  %v1369_v40 = vmul.f32 %v3220_v15, %v3220_v15 }
 0x2aa   : > { %1864 = vst [vmem:[%s2813_s28 + $0x130] sm:$0xff] %v1479_v6  ;;  %v1207_v1 = vmul.f32 %v3165_v31, %v1191_v62  ;;  %v828_v53 = vmul.f32 0.0078125, %v807_v9  ;;  %v1526_v10 = vpop.xlane.xlu1 %1525 }
 0x2ab   : > { %v2153_v32 = vpop.eup %2152  ;;  %v1735_v7 = vadd.f32 %v3173_v36, %v1719_v5  ;;  %v3230_v5 = vmul.f32 0.0078125, %v1013_v58 }
 0x2ac   : > { %v1223_v46 = vadd.f32 %v3173_v36, %v1207_v1  ;;  %v1704_v11 = vmul.f32 %v2153_v32, %v1688_v39  ;;  %v860_v63 = vsub.f32 %v828_v53, %v844_v8  ;;  %v1625_v53 = vmul.f32 %v3226_v44, %v3226_v44 }
 0x2ad   : > { %1879 = vst [vmem:[%s2813_s28 + $0x118] sm:$0xff] %v1735_v7  ;;  %v1331_v50 = vpop.xlane.xlu0 %1330 }
 0x2ae   : > { %1239 = vst [vmem:[%s2813_s28 + $0x128] sm:$0xff] %v1223_v46  ;;  %v1720_v51 = vmul.f32 %v3165_v31, %v1704_v11  ;;  %v876_v52 = vadd.f32 1e-05, %v860_v63  ;;  %v1352_v13 = vmul.f32 0.0078125, %v1331_v50  ;;  %v809_v33 = vpop.xlane.xlu1 %808  ;;  %v1113_v46 = vmul.f32 %v3230_v5, %v3230_v5 }
 0x2af   : > { %v829_v57 = vmul.f32 0.0078125, %v809_v33  ;;  %v3236_v11 = vmul.f32 0.0078125, %v1526_v10  ;;  %v908_v50 = vsub.f32 %v2601_v16, %v3193_v35 }
 0x2b0   : > { %v1736_v59 = vadd.f32 %v3173_v36, %v1720_v51  ;;  %2154 = vrsqrt.f32 %v876_v52  ;;  %v1384_v34 = vsub.f32 %v1352_v13, %v1368_v0 }
 0x2b1   : > { %v861_v47 = vsub.f32 %v829_v57, %v845_v41  ;;  %v1075_v43 = vpop.xlane.xlu0 %1074 }
 0x2b2   : > { %1880 = vst [vmem:[%s2813_s28 + $0x138] sm:$0xff] %v1736_v59  ;;  %v1400_v4 = vadd.f32 1e-05, %v1384_v34  ;;  %v1096_v6 = vmul.f32 0.0078125, %v1075_v43  ;;  %v1333_v62 = vpop.xlane.xlu1 %1332  ;;  %v1626_v59 = vmul.f32 %v3236_v11, %v3236_v11 }
 0x2b3   : > { %v877_v9 = vadd.f32 1e-05, %v861_v47  ;;  %v1353_v38 = vmul.f32 0.0078125, %v1333_v62  ;;  %v1432_v47 = vsub.f32 %v2606_v18, %v3199_v56  ;;  %v1176_v18 = vsub.f32 %v2604_v17, %v3216_v45 }
 0x2b4   : > { %2156 = vrsqrt.f32 %v1400_v4  ;;  %v1128_v39 = vsub.f32 %v1096_v6, %v1112_v37  ;;  %v909_v4 = vsub.f32 %v2611_v20, %v3208_v12  ;;  %v1433_v20 = vsub.f32 %v2616_v22, %v3220_v15 }
 0x2b5   : > { %2158 = vrsqrt.f32 %v877_v9  ;;  %v1385_v1 = vsub.f32 %v1353_v38, %v1369_v40  ;;  %v1588_v8 = vpop.xlane.xlu0 %1587  ;;  %v1689_v45 = vsub.f32 %v2609_v19, %v3226_v44  ;;  %v1177_v22 = vsub.f32 %v2614_v21, %v3230_v5 }
 0x2b6   : > { %v1144_v42 = vadd.f32 1e-05, %v1128_v39  ;;  %v1609_v32 = vmul.f32 0.0078125, %v1588_v8  ;;  %v1077_v7 = vpop.xlane.xlu1 %1076  ;;  %v1690_v5 = vsub.f32 %v2619_v23, %v3236_v11 }
 0x2b7   : > { %v1401_v58 = vadd.f32 1e-05, %v1385_v1  ;;  %v1097_v63 = vmul.f32 0.0078125, %v1077_v7 }
 0x2b8   : > { %2160 = vrsqrt.f32 %v1144_v42  ;;  %v1641_v0 = vsub.f32 %v1609_v32, %v1625_v53 }
 0x2b9   : > { %2162 = vrsqrt.f32 %v1401_v58  ;;  %v1129_v51 = vsub.f32 %v1097_v63, %v1113_v46  ;;  %v747_v52 = vpop.xlane.xlu0 %746 }
 0x2ba   : > { %v2155_v13 = vpop.eup %2154  ;;  %v1657_v33 = vadd.f32 1e-05, %v1641_v0  ;;  %v1590_v41 = vpop.xlane.xlu1 %1589 }
 0x2bb   : > { %v924_v57 = vmul.f32 %v2155_v13, %v908_v50  ;;  %v1145_v34 = vadd.f32 1e-05, %v1129_v51  ;;  %v1610_v10 = vmul.f32 0.0078125, %v1590_v41  ;;  %v3265_v50 = vmul.f32 0.0078125, %v747_v52 }
 0x2bc   : > { %2164 = vrsqrt.f32 %v1657_v33 }
 0x2bd   : > { %v946_v43 = vmul.f32 %v3165_v31, %v924_v57  ;;  %2166 = vrsqrt.f32 %v1145_v34  ;;  %v1642_v16 = vsub.f32 %v1610_v10, %v1626_v59  ;;  %v1271_v35 = vpop.xlane.xlu0 %1270  ;;  %v846_v34 = vmul.f32 %v3265_v50, %v3265_v50 }
 0x2be   : > { %v2157_v37 = vpop.eup %2156  ;;  %v749_v6 = vpop.xlane.xlu1 %748  ;;  %v3271_v59 = vmul.f32 0.0078125, %v1271_v35 }
 0x2bf   : > { %v2159_v62 = vpop.eup %2158  ;;  %v968_v40 = vadd.f32 %v3173_v36, %v946_v43  ;;  %v1448_v9 = vmul.f32 %v2157_v37, %v1432_v47  ;;  %v1658_v38 = vadd.f32 1e-05, %v1642_v16  ;;  %v3280_v37 = vmul.f32 0.0078125, %v749_v6 }
 0x2c0   : > { %v925_v39 = vmul.f32 %v2159_v62, %v909_v4  ;;  %v1370_v23 = vmul.f32 %v3271_v59, %v3271_v59 }
 0x2c1   : > { %984 = vst [vmem:[%s2813_s28 + $0x140] sm:$0xff] %v968_v40  ;;  %v1464_v56 = vmul.f32 %v3165_v31, %v1448_v9  ;;  %2168 = vrsqrt.f32 %v1658_v38  ;;  %v1015_v1 = vpop.xlane.xlu0 %1014  ;;  %v847_v6 = vmul.f32 %v3280_v37, %v3280_v37 }
 0x2c2   : > { %v2161_v8 = vpop.eup %2160  ;;  %v947_v12 = vmul.f32 %v3165_v31, %v925_v39  ;;  %v1273_v53 = vpop.xlane.xlu1 %1272  ;;  %v3288_v9 = vmul.f32 0.0078125, %v1015_v1 }
 0x2c3   : > { %v2163_v42 = vpop.eup %2162  ;;  %v1480_v32 = vadd.f32 %v3173_v36, %v1464_v56  ;;  %v1192_v7 = vmul.f32 %v2161_v8, %v1176_v18  ;;  %v3292_v56 = vmul.f32 0.0078125, %v1273_v53 }
 0x2c4   : > { %v969_v46 = vadd.f32 %v3173_v36, %v947_v12  ;;  %v1449_v17 = vmul.f32 %v2163_v42, %v1433_v20  ;;  %v1114_v1 = vmul.f32 %v3288_v9, %v3288_v9 }
 0x2c5   : > { %1865 = vst [vmem:[%s2813_s28 + $0x150] sm:$0xff] %v1480_v32  ;;  %v1208_v58 = vmul.f32 %v3165_v31, %v1192_v7  ;;  %v1528_v63 = vpop.xlane.xlu0 %1527  ;;  %v1371_v53 = vmul.f32 %v3292_v56, %v3292_v56 }
 0x2c6   : > { %v2165_v0 = vpop.eup %2164  ;;  %985 = vst [vmem:[%s2813_s28 + $0x160] sm:$0xff] %v969_v46  ;;  %v1465_v15 = vmul.f32 %v3165_v31, %v1449_v17  ;;  %v1017_v51 = vpop.xlane.xlu1 %1016  ;;  %v3298_v7 = vmul.f32 0.0078125, %v1528_v63 }
 0x2c7   : > { %v2167_v13 = vpop.eup %2166  ;;  %v1224_v33 = vadd.f32 %v3173_v36, %v1208_v58  ;;  %v1705_v41 = vmul.f32 %v2165_v0, %v1689_v45  ;;  %v3302_v58 = vmul.f32 0.0078125, %v1017_v51 }
 0x2c8   : > { %v1481_v19 = vadd.f32 %v3173_v36, %v1465_v15  ;;  %v1193_v44 = vmul.f32 %v2167_v13, %v1177_v22 }
 0x2c9   : > { %1240 = vst [vmem:[%s2813_s28 + $0x148] sm:$0xff] %v1224_v33  ;;  %v1721_v57 = vmul.f32 %v3165_v31, %v1705_v41  ;;  %v811_v21 = vpop.xlane.xlu0 %810  ;;  %v1627_v41 = vmul.f32 %v3298_v7, %v3298_v7 }
 0x2ca   : > { %1866 = vst [vmem:[%s2813_s28 + $0x170] sm:$0xff] %v1481_v19  ;;  %v1209_v52 = vmul.f32 %v3165_v31, %v1193_v44  ;;  %v830_v10 = vmul.f32 0.0078125, %v811_v21  ;;  %v1530_v47 = vpop.xlane.xlu1 %1529 }
 0x2cb   : > { %v2169_v43 = vpop.eup %2168  ;;  %v1737_v16 = vadd.f32 %v3173_v36, %v1721_v57  ;;  %v1115_v57 = vmul.f32 %v3302_v58, %v3302_v58  ;;  %v3308_v21 = vmul.f32 0.0078125, %v1530_v47 }
 0x2cc   : > { %v1225_v35 = vadd.f32 %v3173_v36, %v1209_v52  ;;  %v1706_v4 = vmul.f32 %v2169_v43, %v1690_v5  ;;  %v862_v62 = vsub.f32 %v830_v10, %v846_v34  ;;  %v910_v34 = vsub.f32 %v2638_v48, %v3265_v50 }
 0x2cd   : > { %1881 = vst [vmem:[%s2813_s28 + $0x158] sm:$0xff] %v1737_v16  ;;  %v1335_v11 = vpop.xlane.xlu0 %1334 }
 0x2ce   : > { %1241 = vst [vmem:[%s2813_s28 + $0x168] sm:$0xff] %v1225_v35  ;;  %v1722_v40 = vmul.f32 %v3165_v31, %v1706_v4  ;;  %v878_v38 = vadd.f32 1e-05, %v862_v62  ;;  %v1354_v39 = vmul.f32 0.0078125, %v1335_v11  ;;  %v813_v18 = vpop.xlane.xlu1 %812 }
 0x2cf   : > { %v831_v8 = vmul.f32 0.0078125, %v813_v18  ;;  %v911_v18 = vsub.f32 %v2643_v54, %v3280_v37  ;;  %v1435_v54 = vsub.f32 %v2653_v2, %v3292_v56  ;;  %v1179_v2 = vsub.f32 %v2648_v60, %v3302_v58 }
 0x2d0   : > { %v1738_v20 = vadd.f32 %v3173_v36, %v1722_v40  ;;  %2170 = vrsqrt.f32 %v878_v38  ;;  %v1386_v12 = vsub.f32 %v1354_v39, %v1370_v23  ;;  %v1628_v23 = vmul.f32 %v3308_v21, %v3308_v21 }
 0x2d1   : > { %v863_v42 = vsub.f32 %v831_v8, %v847_v6  ;;  %v1079_v32 = vpop.xlane.xlu0 %1078  ;;  %v1434_v40 = vsub.f32 %v2645_v55, %v3271_v59  ;;  %v1178_v55 = vsub.f32 %v2641_v49, %v3288_v9  ;;  %v1691_v9 = vsub.f32 %v2650_v61, %v3298_v7 }
 0x2d2   : > { %1882 = vst [vmem:[%s2813_s28 + $0x178] sm:$0xff] %v1738_v20  ;;  %v1402_v46 = vadd.f32 1e-05, %v1386_v12  ;;  %v1098_v17 = vmul.f32 0.0078125, %v1079_v32  ;;  %v1337_v45 = vpop.xlane.xlu1 %1336  ;;  %v1692_v58 = vsub.f32 %v2656_v3, %v3308_v21 }
 0x2d3   : > { %v879_v0 = vadd.f32 1e-05, %v863_v42  ;;  %v1355_v22 = vmul.f32 0.0078125, %v1337_v45 }
 0x2d4   : > { %2172 = vrsqrt.f32 %v1402_v46  ;;  %v1130_v15 = vsub.f32 %v1098_v17, %v1114_v1 }
 0x2d5   : > { %2174 = vrsqrt.f32 %v879_v0  ;;  %v1387_v13 = vsub.f32 %v1355_v22, %v1371_v53  ;;  %v1592_v33 = vpop.xlane.xlu0 %1591 }
 0x2d6   : > { %v1146_v63 = vadd.f32 1e-05, %v1130_v15  ;;  %v1611_v19 = vmul.f32 0.0078125, %v1592_v33  ;;  %v1081_v44 = vpop.xlane.xlu1 %1080 }
 0x2d7   : > { %v1403_v51 = vadd.f32 1e-05, %v1387_v13  ;;  %v1099_v5 = vmul.f32 0.0078125, %v1081_v44 }
 0x2d8   : > { %2176 = vrsqrt.f32 %v1146_v63  ;;  %v1643_v52 = vsub.f32 %v1611_v19, %v1627_v41 }
 0x2d9   : > { %2178 = vrsqrt.f32 %v1403_v51  ;;  %v1131_v10 = vsub.f32 %v1099_v5, %v1115_v57  ;;  %v751_v43 = vpop.xlane.xlu0 %750 }
 0x2da   : > { %v2171_v16 = vpop.eup %2170  ;;  %v1659_v35 = vadd.f32 1e-05, %v1643_v52  ;;  %v1594_v4 = vpop.xlane.xlu1 %1593  ;;  %v3337_v41 = vmul.f32 0.0078125, %v751_v43 }
 0x2db   : > { %v926_v62 = vmul.f32 %v2171_v16, %v910_v34  ;;  %v1147_v11 = vadd.f32 1e-05, %v1131_v10  ;;  %v1612_v47 = vmul.f32 0.0078125, %v1594_v4 }
 0x2dc   : > { %2180 = vrsqrt.f32 %v1659_v35  ;;  %v848_v34 = vmul.f32 %v3337_v41, %v3337_v41 }
 0x2dd   : > { %v948_v38 = vmul.f32 %v3165_v31, %v926_v62  ;;  %2182 = vrsqrt.f32 %v1147_v11  ;;  %v1644_v48 = vsub.f32 %v1612_v47, %v1628_v23  ;;  %v1275_v50 = vpop.xlane.xlu0 %1274 }
 0x2de   : > { %v2173_v39 = vpop.eup %2172  ;;  %v753_v6 = vpop.xlane.xlu1 %752  ;;  %v3343_v5 = vmul.f32 0.0078125, %v1275_v50 }
 0x2df   : > { %v2175_v8 = vpop.eup %2174  ;;  %v970_v20 = vadd.f32 %v3173_v36, %v948_v38  ;;  %v1450_v12 = vmul.f32 %v2173_v39, %v1434_v40  ;;  %v1660_v42 = vadd.f32 1e-05, %v1644_v48  ;;  %v3352_v4 = vmul.f32 0.0078125, %v753_v6 }
 0x2e0   : > { %v927_v32 = vmul.f32 %v2175_v8, %v911_v18  ;;  %v1372_v3 = vmul.f32 %v3343_v5, %v3343_v5 }
 0x2e1   : > { %986 = vst [vmem:[%s2813_s28 + $0x180] sm:$0xff] %v970_v20  ;;  %v1466_v59 = vmul.f32 %v3165_v31, %v1450_v12  ;;  %2184 = vrsqrt.f32 %v1660_v42  ;;  %v1019_v1 = vpop.xlane.xlu0 %1018  ;;  %v849_v39 = vmul.f32 %v3352_v4, %v3352_v4 }
 0x2e2   : > { %v2177_v46 = vpop.eup %2176  ;;  %v949_v37 = vmul.f32 %v3165_v31, %v927_v32  ;;  %v1277_v17 = vpop.xlane.xlu1 %1276  ;;  %v3360_v40 = vmul.f32 0.0078125, %v1019_v1 }
 0x2e3   : > { %v2179_v45 = vpop.eup %2178  ;;  %v1482_v53 = vadd.f32 %v3173_v36, %v1466_v59  ;;  %v1194_v0 = vmul.f32 %v2177_v46, %v1178_v55  ;;  %v3364_v18 = vmul.f32 0.0078125, %v1277_v17 }
 0x2e4   : > { %v971_v22 = vadd.f32 %v3173_v36, %v949_v37  ;;  %v1451_v49 = vmul.f32 %v2179_v45, %v1435_v54  ;;  %v1116_v32 = vmul.f32 %v3360_v40, %v3360_v40 }
 0x2e5   : > { %1867 = vst [vmem:[%s2813_s28 + $0x190] sm:$0xff] %v1482_v53  ;;  %v1210_v15 = vmul.f32 %v3165_v31, %v1194_v0  ;;  %v1532_v13 = vpop.xlane.xlu0 %1531  ;;  %v1373_v54 = vmul.f32 %v3364_v18, %v3364_v18 }
 0x2e6   : > { %v2181_v33 = vpop.eup %2180  ;;  %987 = vst [vmem:[%s2813_s28 + $0x1a0] sm:$0xff] %v971_v22  ;;  %v1467_v56 = vmul.f32 %v3165_v31, %v1451_v49  ;;  %v1021_v63 = vpop.xlane.xlu1 %1020  ;;  %v3370_v55 = vmul.f32 0.0078125, %v1532_v13 }
 0x2e7   : > { %v2183_v19 = vpop.eup %2182  ;;  %v1226_v44 = vadd.f32 %v3173_v36, %v1210_v15  ;;  %v1707_v57 = vmul.f32 %v2181_v33, %v1691_v9  ;;  %v3374_v37 = vmul.f32 0.0078125, %v1021_v63 }
 0x2e8   : > { %v1483_v61 = vadd.f32 %v3173_v36, %v1467_v56  ;;  %v1195_v7 = vmul.f32 %v2183_v19, %v1179_v2  ;;  %v1629_v49 = vmul.f32 %v3370_v55, %v3370_v55 }
 0x2e9   : > { %1242 = vst [vmem:[%s2813_s28 + $0x188] sm:$0xff] %v1226_v44  ;;  %v1723_v51 = vmul.f32 %v3165_v31, %v1707_v57  ;;  %v815_v60 = vpop.xlane.xlu0 %814  ;;  %v1117_v33 = vmul.f32 %v3374_v37, %v3374_v37  ;;  %v912_v44 = vsub.f32 %v2678_v24, %v3337_v41  ;;  %v913_v24 = vsub.f32 %v2683_v26, %v3352_v4 }
 0x2ea   : > { %1868 = vst [vmem:[%s2813_s28 + $0x1b0] sm:$0xff] %v1483_v61  ;;  %v1211_v52 = vmul.f32 %v3165_v31, %v1195_v7  ;;  %v832_v10 = vmul.f32 0.0078125, %v815_v60  ;;  %v1534_v43 = vpop.xlane.xlu1 %1533 }
 0x2eb   : > { %v2185_v16 = vpop.eup %2184  ;;  %v1739_v35 = vadd.f32 %v3173_v36, %v1723_v51  ;;  %v1550_v2 = vmul.f32 0.0078125, %v1534_v43 }
 0x2ec   : > { %v1227_v62 = vadd.f32 %v3173_v36, %v1211_v52  ;;  %v1708_v23 = vmul.f32 %v2185_v16, %v1692_v58  ;;  %v864_v11 = vsub.f32 %v832_v10, %v848_v34  ;;  %v1436_v10 = vsub.f32 %v2685_v27, %v3343_v5 }
 0x2ed   : > { %1883 = vst [vmem:[%s2813_s28 + $0x198] sm:$0xff] %v1739_v35  ;;  %v1339_v21 = vpop.xlane.xlu0 %1338  ;;  %v1630_v58 = vmul.f32 %v1550_v2, %v1550_v2 }
 0x2ee   : > { %1243 = vst [vmem:[%s2813_s28 + $0x1a8] sm:$0xff] %v1227_v62  ;;  %v1724_v47 = vmul.f32 %v3165_v31, %v1708_v23  ;;  %v880_v38 = vadd.f32 1e-05, %v864_v11  ;;  %v1356_v48 = vmul.f32 0.0078125, %v1339_v21  ;;  %v817_v50 = vpop.xlane.xlu1 %816  ;;  %v1180_v21 = vsub.f32 %v2681_v25, %v3360_v40 }
 0x2ef   : > { %v833_v6 = vmul.f32 0.0078125, %v817_v50  ;;  %v1693_v25 = vsub.f32 %v2690_v29, %v3370_v55  ;;  %v1694_v55 = vsub.f32 %v3498_v14, %v1550_v2 }
 0x2f0   : > { %v1740_v8 = vadd.f32 %v3173_v36, %v1724_v47  ;;  %2186 = vrsqrt.f32 %v880_v38  ;;  %v1388_v20 = vsub.f32 %v1356_v48, %v1372_v3  ;;  %v1437_v47 = vsub.f32 %v2693_v30, %v3364_v18 }
 0x2f1   : > { %v865_v12 = vsub.f32 %v833_v6, %v849_v39  ;;  %v1083_v42 = vpop.xlane.xlu0 %1082  ;;  %v1181_v30 = vsub.f32 %v2688_v28, %v3374_v37 }
 0x2f2   : > { %1884 = vst [vmem:[%s2813_s28 + $0x1b8] sm:$0xff] %v1740_v8  ;;  %v1404_v59 = vadd.f32 1e-05, %v1388_v20  ;;  %v1100_v1 = vmul.f32 0.0078125, %v1083_v42  ;;  %v1341_v46 = vpop.xlane.xlu1 %1340 }
 0x2f3   : > { %v881_v17 = vadd.f32 1e-05, %v865_v12  ;;  %v1357_v45 = vmul.f32 0.0078125, %v1341_v46 }
 0x2f4   : > { %2188 = vrsqrt.f32 %v1404_v59  ;;  %v1132_v53 = vsub.f32 %v1100_v1, %v1116_v32 }
 0x2f5   : > { %2190 = vrsqrt.f32 %v881_v17  ;;  %v1389_v0 = vsub.f32 %v1357_v45, %v1373_v54  ;;  %v1596_v22 = vpop.xlane.xlu0 %1595 }
 0x2f6   : > { %v1148_v9 = vadd.f32 1e-05, %v1132_v53  ;;  %v1613_v15 = vmul.f32 0.0078125, %v1596_v22  ;;  %v1085_v13 = vpop.xlane.xlu1 %1084 }
 0x2f7   : > { %v1405_v56 = vadd.f32 1e-05, %v1389_v0  ;;  %v1101_v63 = vmul.f32 0.0078125, %v1085_v13 }
 0x2f8   : > { %2192 = vrsqrt.f32 %v1148_v9  ;;  %v1645_v19 = vsub.f32 %v1613_v15, %v1629_v49 }
 0x2f9   : > { %2194 = vrsqrt.f32 %v1405_v56  ;;  %v1133_v57 = vsub.f32 %v1101_v63, %v1117_v33 }
 0x2fa   : > { %v2187_v61 = vpop.eup %2186  ;;  %v1661_v7 = vadd.f32 1e-05, %v1645_v19  ;;  %v1598_v51 = vpop.xlane.xlu1 %1597 }
 0x2fb   : > { %v928_v60 = vmul.f32 %v2187_v61, %v912_v44  ;;  %v1149_v52 = vadd.f32 1e-05, %v1133_v57  ;;  %v1614_v34 = vmul.f32 0.0078125, %v1598_v51 }
 0x2fc   : > { %2196 = vrsqrt.f32 %v1661_v7 }
 0x2fd   : > { %v950_v43 = vmul.f32 %v3165_v31, %v928_v60  ;;  %2198 = vrsqrt.f32 %v1149_v52  ;;  %v1646_v16 = vsub.f32 %v1614_v34, %v1630_v58 }
 0x2fe   : > { %v2189_v35 = vpop.eup %2188 }
 0x2ff   : > { %v2191_v41 = vpop.eup %2190  ;;  %v972_v62 = vadd.f32 %v3173_v36, %v950_v43  ;;  %v1452_v23 = vmul.f32 %v2189_v35, %v1436_v10  ;;  %v1662_v11 = vadd.f32 1e-05, %v1646_v16 }
 0x300   : > { %v929_v3 = vmul.f32 %v2191_v41, %v913_v24 }
 0x301   : > { %988 = vst [vmem:[%s2813_s28 + $0x1c0] sm:$0xff] %v972_v62  ;;  %v1468_v27 = vmul.f32 %v3165_v31, %v1452_v23  ;;  %2200 = vrsqrt.f32 %v1662_v11 }
 0x302   : > { %v2193_v5 = vpop.eup %2192  ;;  %v951_v26 = vmul.f32 %v3165_v31, %v929_v3 }
 0x303   : > { %v2195_v4 = vpop.eup %2194  ;;  %v1484_v38 = vadd.f32 %v3173_v36, %v1468_v27  ;;  %v1196_v48 = vmul.f32 %v2193_v5, %v1180_v21 }
 0x304   : > { %v973_v50 = vadd.f32 %v3173_v36, %v951_v26  ;;  %v1453_v39 = vmul.f32 %v2195_v4, %v1437_v47 }
 0x305   : > { %1869 = vst [vmem:[%s2813_s28 + $0x1d0] sm:$0xff] %v1484_v38  ;;  %v1212_v40 = vmul.f32 %v3165_v31, %v1196_v48 }
 0x306   : > { %v2197_v6 = vpop.eup %2196  ;;  %989 = vst [vmem:[%s2813_s28 + $0x1e0] sm:$0xff] %v973_v50  ;;  %v1469_v18 = vmul.f32 %v3165_v31, %v1453_v39 }
 0x307   : > { %v2199_v8 = vpop.eup %2198  ;;  %v1228_v20 = vadd.f32 %v3173_v36, %v1212_v40  ;;  %v1709_v12 = vmul.f32 %v2197_v6, %v1693_v25 }
 0x308   : > { %v1485_v42 = vadd.f32 %v3173_v36, %v1469_v18  ;;  %v1197_v29 = vmul.f32 %v2199_v8, %v1181_v30 }
 0x309   : > { %1244 = vst [vmem:[%s2813_s28 + $0x1c8] sm:$0xff] %v1228_v20  ;;  %v1725_v32 = vmul.f32 %v3165_v31, %v1709_v12 }
 0x30a   : > { %1870 = vst [vmem:[%s2813_s28 + $0x1f0] sm:$0xff] %v1485_v42  ;;  %v1213_v28 = vmul.f32 %v3165_v31, %v1197_v29 }
 0x30b   : > { %v2201_v59 = vpop.eup %2200  ;;  %v1741_v1 = vadd.f32 %v3173_v36, %v1725_v32 }
 0x30c   : > { %v1229_v46 = vadd.f32 %v3173_v36, %v1213_v28  ;;  %v1710_v54 = vmul.f32 %v2201_v59, %v1694_v55 }
 0x30d   : > { %1885 = vst [vmem:[%s2813_s28 + $0x1d8] sm:$0xff] %v1741_v1 }
 0x30e   : > { %1245 = vst [vmem:[%s2813_s28 + $0x1e8] sm:$0xff] %v1229_v46  ;;  %v1726_v37 = vmul.f32 %v3165_v31, %v1710_v54 }
 0x310   : > { %v1742_v17 = vadd.f32 %v3173_v36, %v1726_v37 }
 0x312   : > { %1886 = vst [vmem:[%s2813_s28 + $0x1f8] sm:$0xff] %v1742_v17 }
 0x313 PF: > { %s3521_s23 = smov %s2406_s15  ;;  %p15_p6 = scmp.ge.s32.totalorder %s2380_s26, 4  }
 0x314   : > { %s3522_s15 = smov %s2292_s16  ;;  %s3523_s16 = smov %s2296_s17 }
 0x315   : > { %s3524_s17 = smov %s3521_s23  ;;  %s3525_s18 = smov %s2380_s26 }
 0x316   :  { %17 = sbr.rel (!%p15_p6) target bundleno = 4 (0x4), region = 81 }
 0x31d   :  { %1783 = vsyncpa [#allocation3], 1 }
 0x31e   :  { %1785 = vsyncpa [#allocation3 + $0x1], 1 }
 0x31f   :  { %1786 = vsyncpa [#allocation5], 1 }

</bundles_post_ra>
